<compile_context>
chip_gen: v7x
topology: tpu7x:2x2x1
jax: 0.10.0
libtpu: 0.0.40
codegen_flags: <defaults>
</compile_context>

<pallas_src>
import functools

import jax
import jax.numpy as jnp
from jax.experimental import pallas as pl
from jax.experimental.pallas import tpu as pltpu


COMPUTE_DTYPE = jnp.bfloat16
VMEM_LIMIT = 48 * 1024 * 1024   # > v5e(16MiB)/v6e(32MiB) scoped defaults, < v7x 64MiB physical


def _round_up(x, m):
    return (x + m - 1) // m * m


# ----------------------------- tiled matmul ---------------------------------

def _matmul_kernel(x_ref, w_ref, *rest, activation, has_residual):
    if has_residual:
        r_ref, o_ref, acc_ref = rest
    else:
        r_ref = None
        o_ref, acc_ref = rest

    k = pl.program_id(2)

    @pl.when(k == 0)
    def _():
        acc_ref[...] = jnp.zeros_like(acc_ref)

    # Operands arrive in bf16 (cast once outside); f32 MXU accumulation.
    acc_ref[...] += jnp.dot(x_ref[...], w_ref[...],
                            preferred_element_type=jnp.float32)

    @pl.when(k == pl.num_programs(2) - 1)
    def _():
        acc = acc_ref[...]
        if activation == "gelu":
            # TODO(synk): torch F.gelu default is exact erf; tanh approximation
            # used here for guaranteed TPU lowering of the transcendental.
            acc = jax.nn.gelu(acc, approximate=True)
        if has_residual:
            acc = acc + r_ref[...].astype(jnp.float32)
        o_ref[...] = acc.astype(o_ref.dtype)


def pallas_matmul(x, w, residual=None, activation=None, tm=512, tn=1024, tk=512):
    """x: (M, K) @ w: (K, N) -> (M, N) in bf16, optional fused GELU / residual."""
    x = x.astype(COMPUTE_DTYPE)
    w = w.astype(COMPUTE_DTYPE)
    M, K = x.shape
    K2, N = w.shape
    assert K == K2

    tm = min(tm, _round_up(M, 16))      # bf16 sublane packing -> multiples of 16
    tn = min(tn, _round_up(N, 128))
    tk = min(tk, _round_up(K, 128))
    Mp, Np, Kp = _round_up(M, tm), _round_up(N, tn), _round_up(K, tk)

    # Pads are no-ops when dims are already tile aligned (the common case for
    # real d_model/d_ff; only the toy shapes / ragged vocab actually pad).
    xp = x if (Mp == M and Kp == K) else jnp.pad(x, ((0, Mp - M), (0, Kp - K)))
    wp = w if (Kp == K and Np == N) else jnp.pad(w, ((0, Kp - K), (0, Np - N)))

    has_residual = residual is not None
    inputs = [xp, wp]
    in_specs = [pl.BlockSpec((tm, tk), lambda i, j, k: (i, k)),
                pl.BlockSpec((tk, tn), lambda i, j, k: (k, j))]
    if has_residual:
        r = residual.astype(COMPUTE_DTYPE)
        rp = r if (Mp == M and Np == N) else jnp.pad(r, ((0, Mp - M), (0, Np - N)))
        inputs.append(rp)
        # Same block across k -> fetched once per (i, j), bf16 -> small residency.
        in_specs.append(pl.BlockSpec((tm, tn), lambda i, j, k: (i, j)))

    out = pl.pallas_call(
        functools.partial(_matmul_kernel, activation=activation,
                          has_residual=has_residual),
        out_shape=jax.ShapeDtypeStruct((Mp, Np), COMPUTE_DTYPE),
        grid=(Mp // tm, Np // tn, Kp // tk),
        in_specs=in_specs,
        out_specs=pl.BlockSpec((tm, tn), lambda i, j, k: (i, j)),
        scratch_shapes=[pltpu.VMEM((tm, tn), jnp.float32)],
        compiler_params=pltpu.CompilerParams(
            dimension_semantics=("parallel", "parallel", "arbitrary"),
            vmem_limit_bytes=VMEM_LIMIT),
    )(*inputs)
    return out[:M, :N]


# ------------------------------- RMSNorm ------------------------------------

def _rmsnorm_kernel(x_ref, w_ref, o_ref, *, eps):
    x = x_ref[...].astype(jnp.float32)
    ms = jnp.mean(x * x, axis=-1, keepdims=True)
    y = x * jax.lax.rsqrt(ms + eps) * w_ref[...].astype(jnp.float32)
    o_ref[...] = y.astype(o_ref.dtype)


def pallas_rmsnorm(x, w, eps=1e-5, tm=256):
    """x: (M, D) bf16, w: (D,) -> (M, D) bf16; f32 math inside, row-tiled."""
    # TODO(synk): could be fused into the following matmul (per-row inv_rms
    # applied at x-tile load time) to remove one activation HBM round trip.
    x = x.astype(COMPUTE_DTYPE)
    M, D = x.shape
    tm = min(tm, _round_up(M, 16))
    Mp = _round_up(M, tm)
    xp = x if Mp == M else jnp.pad(x, ((0, Mp - M), (0, 0)))
    out = pl.pallas_call(
        functools.partial(_rmsnorm_kernel, eps=eps),
        out_shape=jax.ShapeDtypeStruct((Mp, D), COMPUTE_DTYPE),
        grid=(Mp // tm,),
        in_specs=[pl.BlockSpec((tm, D), lambda i: (i, 0)),
                  pl.BlockSpec((1, D), lambda i: (0, 0))],
        out_specs=pl.BlockSpec((tm, D), lambda i: (i, 0)),
        compiler_params=pltpu.CompilerParams(
            dimension_semantics=("parallel",),
            vmem_limit_bytes=VMEM_LIMIT),
    )(xp, w.reshape(1, D))
    return out[:M]


# --------------------------- flash causal attention --------------------------

def _flash_attn_kernel(q_ref, k_ref, v_ref, o_ref, m_sc, l_sc, acc_sc,
                       *, num_heads):
    # q_ref/k_ref/v_ref: (t, H, Dh) bf16 views of the fused QKV tensor.
    qi = pl.program_id(1)
    ki = pl.program_id(2)
    tq = q_ref.shape[0]
    tk = k_ref.shape[0]

    @pl.when(ki == 0)
    def _():
        m_sc[...] = jnp.full_like(m_sc, -jnp.inf)
        l_sc[...] = jnp.zeros_like(l_sc)
        acc_sc[...] = jnp.zeros_like(acc_sc)

    def attend(apply_causal_mask):
        if apply_causal_mask:
            # Diagonal tile only (tq == tk): local row >= local col.
            lmask = (jax.lax.broadcasted_iota(jnp.int32, (tq, tk), 0)
                     >= jax.lax.broadcasted_iota(jnp.int32, (tq, tk), 1))
        for h in range(num_heads):
            q = q_ref[:, h, :]                         # (tq, Dh) bf16, scale folded into Wq
            k = k_ref[:, h, :]                         # (tk, Dh) bf16
            s = jax.lax.dot_general(q, k, (((1,), (1,)), ((), ())),
                                    preferred_element_type=jnp.float32)  # (tq, tk)
            if apply_causal_mask:
                s = jnp.where(lmask, s, jnp.float32(-1e30))
            m_prev = m_sc[h]
            m_new = jnp.maximum(m_prev, jnp.max(s, axis=-1, keepdims=True))
            alpha = jnp.exp(m_prev - m_new)
            # exp kept in f32 for v5e compatibility (no bf16 EUP there).
            p = jnp.exp(s - m_new)
            l_sc[h] = alpha * l_sc[h] + jnp.sum(p, axis=-1, keepdims=True)
            acc_sc[h] = alpha * acc_sc[h] + jnp.dot(
                p.astype(jnp.bfloat16), v_ref[:, h, :],
                preferred_element_type=jnp.float32)
            m_sc[h] = m_new

    @pl.when(ki < qi)          # strictly below the diagonal: no masking needed
    def _():
        attend(False)

    @pl.when(ki == qi)         # diagonal tile: mask, then finalize this q block
    def _():
        attend(True)
        for h in range(num_heads):
            inv_l = pl.reciprocal(l_sc[h], approx=True)   # EUP slot, ~free
            o_ref[:, h, :] = (acc_sc[h] * inv_l).astype(o_ref.dtype)


def pallas_flash_attention(qkv, batch, seq_len, num_heads, head_dim,
                           block_size=256):
    """qkv: (B, S, 3, H, Dh) bf16 -> (B, S, H, Dh) bf16 causal attention.

    All heads are processed per grid step; K/V blocks for fully masked tiles
    are index-clamped so no DMA is issued for them.
    """
    B, S = batch, seq_len
    t = min(block_size, _round_up(S, 16))
    Sp = _round_up(S, t)
    if Sp != S:
        qkv = jnp.pad(qkv, ((0, 0), (0, Sp - S), (0, 0), (0, 0), (0, 0)))

    blk = (None, t, None, num_heads, head_dim)
    q_spec = pl.BlockSpec(blk, lambda b, qi, ki: (b, qi, 0, 0, 0))
    # Clamp -> block index stops changing above the diagonal -> DMA skipped.
    k_spec = pl.BlockSpec(blk, lambda b, qi, ki: (b, jnp.minimum(ki, qi), 1, 0, 0))
    v_spec = pl.BlockSpec(blk, lambda b, qi, ki: (b, jnp.minimum(ki, qi), 2, 0, 0))

    out = pl.pallas_call(
        functools.partial(_flash_attn_kernel, num_heads=num_heads),
        out_shape=jax.ShapeDtypeStruct((B, Sp, num_heads, head_dim), COMPUTE_DTYPE),
        grid=(B, Sp // t, Sp // t),
        in_specs=[q_spec, k_spec, v_spec],
        out_specs=pl.BlockSpec((None, t, num_heads, head_dim),
                               lambda b, qi, ki: (b, qi, 0, 0)),
        scratch_shapes=[pltpu.VMEM((num_heads, t, 1), jnp.float32),
                        pltpu.VMEM((num_heads, t, 1), jnp.float32),
                        pltpu.VMEM((num_heads, t, head_dim), jnp.float32)],
        compiler_params=pltpu.CompilerParams(
            dimension_semantics=("parallel", "parallel", "arbitrary"),
            vmem_limit_bytes=VMEM_LIMIT),
    )(qkv, qkv, qkv)
    return out[:, :S]


# ----------------------------- Model (glue) ---------------------------------

def init_params(key, vocab_size, context_length, num_layers, d_model,
                num_heads, d_ff):
    std = 0.02
    head_dim = d_model // num_heads
    q_scale = 1.0 / (head_dim ** 0.5)     # attention scale folded into Wq
    dt = COMPUTE_DTYPE
    keys = jax.random.split(key, 3 + num_layers)
    params = {
        "token_emb": (std * jax.random.normal(keys[0], (vocab_size, d_model), jnp.float32)).astype(dt),
        "pos_emb": (std * jax.random.normal(keys[1], (context_length, d_model), jnp.float32)).astype(dt),
        "ln_final_w": jnp.ones((d_model,), jnp.float32),
        "lm_head_w": (std * jax.random.normal(keys[2], (d_model, vocab_size), jnp.float32)).astype(dt),
        "layers": [],
    }
    for l in range(num_layers):
        lk = jax.random.split(keys[3 + l], 6)
        wq = std * jax.random.normal(lk[0], (d_model, d_model), jnp.float32) * q_scale
        wk = std * jax.random.normal(lk[1], (d_model, d_model), jnp.float32)
        wv = std * jax.random.normal(lk[2], (d_model, d_model), jnp.float32)
        params["layers"].append({
            "ln1_w": jnp.ones((d_model,), jnp.float32),
            "ln2_w": jnp.ones((d_model,), jnp.float32),
            # Fused QKV projection (columns = [q | k | v], head-major within each).
            "wqkv": jnp.concatenate([wq, wk, wv], axis=1).astype(dt),
            "wo": (std * jax.random.normal(lk[3], (d_model, d_model), jnp.float32)).astype(dt),
            "w1": (std * jax.random.normal(lk[4], (d_model, d_ff), jnp.float32)).astype(dt),
            "w2": (std * jax.random.normal(lk[5], (d_ff, d_model), jnp.float32)).astype(dt),
        })
    return params


def transformer_block(x_flat, p, B, S, num_heads):
    D = x_flat.shape[1]
    Dh = D // num_heads

    # Attention sub-block (pre-norm); attn_pdrop / residual_pdrop -> identity.
    h = pallas_rmsnorm(x_flat, p["ln1_w"])
    qkv = pallas_matmul(h, p["wqkv"])                    # (B*S, 3D) bf16
    qkv = qkv.reshape(B, S, 3, num_heads, Dh)            # free reshape, no transpose
    attn = pallas_flash_attention(qkv, B, S, num_heads, Dh)   # (B, S, H, Dh)
    attn = attn.reshape(B * S, D)                        # free reshape, no transpose
    x_flat = pallas_matmul(attn, p["wo"], residual=x_flat)    # fused residual

    # FFN sub-block (pre-norm).
    h2 = pallas_rmsnorm(x_flat, p["ln2_w"])
    ff = pallas_matmul(h2, p["w1"], activation="gelu")   # fused GELU
    x_flat = pallas_matmul(ff, p["w2"], residual=x_flat) # fused residual
    return x_flat


def transformer_lm_forward(params, input_ids, num_heads):
    B, S = input_ids.shape
    d_model = params["token_emb"].shape[1]
    # TODO(synk): embedding lookups are gathers -> plain JAX glue (bf16 tables);
    # dropout(p=None) -> identity.
    x = params["token_emb"][input_ids] + params["pos_emb"][:S][None, :, :]
    x = x.reshape(B * S, d_model).astype(COMPUTE_DTYPE)
    for layer in params["layers"]:
        x = transformer_block(x, layer, B, S, num_heads)
    x = pallas_rmsnorm(x, params["ln_final_w"], eps=1e-5)
    logits = pallas_matmul(x, params["lm_head_w"])       # bf16 logits (largest HBM write halved)
    return logits.reshape(B, S, -1)


if __name__ == "__main__":
    vocab_size = 64
    context_length = 16
    num_layers = 2
    d_model = 32
    num_heads = 4
    d_ff = 64
    B, S = 2, 8

    key = jax.random.PRNGKey(0)
    pkey, dkey = jax.random.split(key)
    params = init_params(pkey, vocab_size, context_length, num_layers,
                         d_model, num_heads, d_ff)
    input_ids = jax.random.randint(dkey, (B, S), 0, vocab_size, dtype=jnp.int32)

    fwd = jax.jit(functools.partial(transformer_lm_forward, num_heads=num_heads))
    logits = jax.block_until_ready(fwd(params, input_ids))
    assert logits.shape == (B, S, vocab_size)
    assert bool(jnp.all(jnp.isfinite(logits.astype(jnp.float32))))
    print("KERNEL_OK")
</pallas_src>

<mosaic_0001>
module attributes {stable_mosaic.version = 11 : i64} {
  func.func @_rmsnorm_kernel(%arg0: i32, %arg1: memref<16x32xbf16, #tpu.memory_space<vmem>>, %arg2: memref<1x32xf32, #tpu.memory_space<vmem>>, %arg3: memref<16x32xbf16, #tpu.memory_space<vmem>>) attributes {dimension_semantics = [#tpu.dimension_semantics<parallel>], iteration_bounds = array<i64: 1>, scalar_prefetch = 0 : i64, scratch_operands = 0 : i64, tpu.core_type = #tpu.core_type<tc>, window_params = [{transform_indices = @transform_0, window_bounds = array<i64: 16, 32>}, {pipeline_mode = #tpu.pipeline_mode<synchronous>, transform_indices = @transform_1, window_bounds = array<i64: 1, 32>}, {transform_indices = @transform_2, window_bounds = array<i64: 16, 32>}]} {
    %c0 = arith.constant 0 : index
    %c0_0 = arith.constant 0 : index
    %0 = vector.load %arg1[%c0, %c0_0] : memref<16x32xbf16, #tpu.memory_space<vmem>>, vector<16x32xbf16>
    %1 = arith.extf %0 : vector<16x32xbf16> to vector<16x32xf32>
    %2 = arith.mulf %1, %1 : vector<16x32xf32>
    %cst = arith.constant dense<0.000000e+00> : vector<16xf32>
    %3 = vector.multi_reduction <add>, %2, %cst [1] : vector<16x32xf32> to vector<16xf32>
    %4 = vector.shape_cast %3 : vector<16xf32> to vector<16x1xf32>
    %cst_1 = arith.constant 3.200000e+01 : f32
    %5 = vector.broadcast %cst_1 : f32 to vector<16x1xf32>
    %6 = arith.divf %4, %5 : vector<16x1xf32>
    %cst_2 = arith.constant 9.99999974E-6 : f32
    %7 = vector.broadcast %cst_2 : f32 to vector<16x1xf32>
    %8 = arith.addf %6, %7 : vector<16x1xf32>
    %9 = math.rsqrt %8 : vector<16x1xf32>
    %10 = vector.broadcast %9 : vector<16x1xf32> to vector<16x32xf32>
    %11 = arith.mulf %1, %10 : vector<16x32xf32>
    %c0_3 = arith.constant 0 : index
    %c0_4 = arith.constant 0 : index
    %12 = vector.load %arg2[%c0_3, %c0_4] : memref<1x32xf32, #tpu.memory_space<vmem>>, vector<1x32xf32>
    %13 = vector.broadcast %12 : vector<1x32xf32> to vector<16x32xf32>
    %14 = arith.mulf %11, %13 : vector<16x32xf32>
    %15 = arith.truncf %14 : vector<16x32xf32> to vector<16x32xbf16>
    %c0_5 = arith.constant 0 : index
    %c0_6 = arith.constant 0 : index
    %16 = vector.load %arg3[%c0_5, %c0_6] : memref<16x32xbf16, #tpu.memory_space<vmem>>, vector<16x32xbf16>
    tpu.vector_store %arg3[%c0_5, %c0_6], %15 {strides = array<i32>} : memref<16x32xbf16, #tpu.memory_space<vmem>>, vector<16x32xbf16>,
    return
  }
  func.func @transform_0(%arg0: i32) -> (i32, i32) {
    %c0_i32 = arith.constant 0 : i32
    %c0_i32_0 = arith.constant 0 : i32
    return %arg0, %c0_i32 : i32, i32
  }
  func.func @transform_1(%arg0: i32) -> (i32, i32) {
    %c0_i32 = arith.constant 0 : i32
    %c0_i32_0 = arith.constant 0 : i32
    %c0_i32_1 = arith.constant 0 : i32
    return %c0_i32, %c0_i32_0 : i32, i32
  }
  func.func @transform_2(%arg0: i32) -> (i32, i32) {
    %c0_i32 = arith.constant 0 : i32
    %c0_i32_0 = arith.constant 0 : i32
    return %arg0, %c0_i32 : i32, i32
  }
}

module attributes {stable_mosaic.version = 11 : i64} {
  func.func @_matmul_kernel(%arg0: i32, %arg1: i32, %arg2: i32, %arg3: memref<16x128xbf16, #tpu.memory_space<vmem>>, %arg4: memref<128x128xbf16, #tpu.memory_space<vmem>>, %arg5: memref<16x128xbf16, #tpu.memory_space<vmem>>, %arg6: memref<16x128xf32, #tpu.memory_space<vmem>>) attributes {dimension_semantics = [#tpu.dimension_semantics<parallel>, #tpu.dimension_semantics<parallel>, #tpu.dimension_semantics<arbitrary>], iteration_bounds = array<i64: 1, 1, 1>, scalar_prefetch = 0 : i64, scratch_operands = 1 : i64, tpu.core_type = #tpu.core_type<tc>, window_params = [{transform_indices = @transform_0, window_bounds = array<i64: 16, 128>}, {transform_indices = @transform_1, window_bounds = array<i64: 128, 128>}, {transform_indices = @transform_2, window_bounds = array<i64: 16, 128>}]} {
    %c0_i32 = arith.constant 0 : i32
    %0 = arith.cmpi eq, %arg2, %c0_i32 : i32
    %1 = arith.extui %0 : i1 to i32
    %c0_i32_0 = arith.constant 0 : i32
    %2 = arith.cmpi ne, %1, %c0_i32_0 : i32
    scf.if %2 {
      %cst_10 = arith.constant 0.000000e+00 : f32
      %12 = vector.broadcast %cst_10 : f32 to vector<16x128xf32>
      %c0_11 = arith.constant 0 : index
      %c0_12 = arith.constant 0 : index
      %13 = vector.load %arg6[%c0_11, %c0_12] : memref<16x128xf32, #tpu.memory_space<vmem>>, vector<16x128xf32>
      tpu.vector_store %arg6[%c0_11, %c0_12], %12 {strides = array<i32>} : memref<16x128xf32, #tpu.memory_space<vmem>>, vector<16x128xf32>,
    } else {
    }
    %c0 = arith.constant 0 : index
    %c0_1 = arith.constant 0 : index
    %3 = vector.load %arg6[%c0, %c0_1] : memref<16x128xf32, #tpu.memory_space<vmem>>, vector<16x128xf32>
    %c0_2 = arith.constant 0 : index
    %c0_3 = arith.constant 0 : index
    %4 = vector.load %arg3[%c0_2, %c0_3] : memref<16x128xbf16, #tpu.memory_space<vmem>>, vector<16x128xbf16>
    %c0_4 = arith.constant 0 : index
    %c0_5 = arith.constant 0 : index
    %5 = vector.load %arg4[%c0_4, %c0_5] : memref<128x128xbf16, #tpu.memory_space<vmem>>, vector<128x128xbf16>
    %cst = arith.constant dense<0.000000e+00> : vector<16x128xf32>
    %6 = tpu.matmul %4, %5, %cst {dimension_numbers = #tpu.dot_dimension_numbers<[1], [0], [0], [1], [0, 0, 1, 1], [], []>} : vector<16x128xbf16>, vector<128x128xbf16>, vector<16x128xf32> -> vector<16x128xf32>
    %7 = arith.addf %3, %6 : vector<16x128xf32>
    %c0_6 = arith.constant 0 : index
    %c0_7 = arith.constant 0 : index
    %8 = vector.load %arg6[%c0_6, %c0_7] : memref<16x128xf32, #tpu.memory_space<vmem>>, vector<16x128xf32>
    tpu.vector_store %arg6[%c0_6, %c0_7], %7 {strides = array<i32>} : memref<16x128xf32, #tpu.memory_space<vmem>>, vector<16x128xf32>,
    %c0_i32_8 = arith.constant 0 : i32
    %9 = arith.cmpi eq, %arg2, %c0_i32_8 : i32
    %10 = arith.extui %9 : i1 to i32
    %c0_i32_9 = arith.constant 0 : i32
    %11 = arith.cmpi ne, %10, %c0_i32_9 : i32
    scf.if %11 {
      %c0_10 = arith.constant 0 : index
      %c0_11 = arith.constant 0 : index
      %12 = vector.load %arg6[%c0_10, %c0_11] : memref<16x128xf32, #tpu.memory_space<vmem>>, vector<16x128xf32>
      %13 = arith.truncf %12 : vector<16x128xf32> to vector<16x128xbf16>
      %c0_12 = arith.constant 0 : index
      %c0_13 = arith.constant 0 : index
      %14 = vector.load %arg5[%c0_12, %c0_13] : memref<16x128xbf16, #tpu.memory_space<vmem>>, vector<16x128xbf16>
      tpu.vector_store %arg5[%c0_12, %c0_13], %13 {strides = array<i32>} : memref<16x128xbf16, #tpu.memory_space<vmem>>, vector<16x128xbf16>,
    } else {
    }
    return
  }
  func.func @transform_0(%arg0: i32, %arg1: i32, %arg2: i32) -> (i32, i32) {
    %c0_i32 = arith.constant 0 : i32
    return %arg0, %arg2 : i32, i32
  }
  func.func @transform_1(%arg0: i32, %arg1: i32, %arg2: i32) -> (i32, i32) {
    %c0_i32 = arith.constant 0 : i32
    return %arg2, %arg1 : i32, i32
  }
  func.func @transform_2(%arg0: i32, %arg1: i32, %arg2: i32) -> (i32, i32) {
    %c0_i32 = arith.constant 0 : i32
    return %arg0, %arg1 : i32, i32
  }
}

module attributes {stable_mosaic.version = 11 : i64} {
  func.func @_flash_attn_kernel(%arg0: i32, %arg1: i32, %arg2: i32, %arg3: memref<1x16x1x4x8xbf16, #tpu.memory_space<vmem>>, %arg4: memref<1x16x1x4x8xbf16, #tpu.memory_space<vmem>>, %arg5: memref<1x16x1x4x8xbf16, #tpu.memory_space<vmem>>, %arg6: memref<1x16x4x8xbf16, #tpu.memory_space<vmem>>, %arg7: memref<4x16x1xf32, #tpu.memory_space<vmem>>, %arg8: memref<4x16x1xf32, #tpu.memory_space<vmem>>, %arg9: memref<4x16x8xf32, #tpu.memory_space<vmem>>) attributes {dimension_semantics = [#tpu.dimension_semantics<parallel>, #tpu.dimension_semantics<parallel>, #tpu.dimension_semantics<arbitrary>], iteration_bounds = array<i64: 2, 1, 1>, scalar_prefetch = 0 : i64, scratch_operands = 3 : i64, tpu.core_type = #tpu.core_type<tc>, window_params = [{transform_indices = @transform_0, window_bounds = array<i64: 1, 16, 1, 4, 8>}, {transform_indices = @transform_1, window_bounds = array<i64: 1, 16, 1, 4, 8>}, {transform_indices = @transform_2, window_bounds = array<i64: 1, 16, 1, 4, 8>}, {transform_indices = @transform_3, window_bounds = array<i64: 1, 16, 4, 8>}]} {
    %c0_i32 = arith.constant 0 : i32
    %0 = arith.cmpi eq, %arg2, %c0_i32 : i32
    %1 = arith.extui %0 : i1 to i32
    %c0_i32_0 = arith.constant 0 : i32
    %2 = arith.cmpi ne, %1, %c0_i32_0 : i32
    scf.if %2 {
      %cst = arith.constant 0xFF800000 : f32
      %9 = vector.broadcast %cst : f32 to vector<4x16x1xf32>
      %c0 = arith.constant 0 : index
      %c0_3 = arith.constant 0 : index
      %c0_4 = arith.constant 0 : index
      %10 = vector.load %arg7[%c0, %c0_3, %c0_4] : memref<4x16x1xf32, #tpu.memory_space<vmem>>, vector<4x16x1xf32>
      tpu.vector_store %arg7[%c0, %c0_3, %c0_4], %9 {strides = array<i32>} : memref<4x16x1xf32, #tpu.memory_space<vmem>>, vector<4x16x1xf32>,
      %cst_5 = arith.constant 0.000000e+00 : f32
      %11 = vector.broadcast %cst_5 : f32 to vector<4x16x1xf32>
      %c0_6 = arith.constant 0 : index
      %c0_7 = arith.constant 0 : index
      %c0_8 = arith.constant 0 : index
      %12 = vector.load %arg8[%c0_6, %c0_7, %c0_8] : memref<4x16x1xf32, #tpu.memory_space<vmem>>, vector<4x16x1xf32>
      tpu.vector_store %arg8[%c0_6, %c0_7, %c0_8], %11 {strides = array<i32>} : memref<4x16x1xf32, #tpu.memory_space<vmem>>, vector<4x16x1xf32>,
      %cst_9 = arith.constant 0.000000e+00 : f32
      %13 = vector.broadcast %cst_9 : f32 to vector<4x16x8xf32>
      %c0_10 = arith.constant 0 : index
      %c0_11 = arith.constant 0 : index
      %c0_12 = arith.constant 0 : index
      %14 = vector.load %arg9[%c0_10, %c0_11, %c0_12] : memref<4x16x8xf32, #tpu.memory_space<vmem>>, vector<4x16x8xf32>
      tpu.vector_store %arg9[%c0_10, %c0_11, %c0_12], %13 {strides = array<i32>} : memref<4x16x8xf32, #tpu.memory_space<vmem>>, vector<4x16x8xf32>,
    } else {
    }
    %3 = arith.cmpi slt, %arg2, %arg1 : i32
    %4 = arith.extui %3 : i1 to i32
    %c0_i32_1 = arith.constant 0 : i32
    %5 = arith.cmpi ne, %4, %c0_i32_1 : i32
    scf.if %5 {
      %c0 = arith.constant 0 : index
      %c0_3 = arith.constant 0 : index
      %c0_4 = arith.constant 0 : index
      %c0_5 = arith.constant 0 : index
      %c0_6 = arith.constant 0 : index
      %9 = vector.load %arg3[%c0, %c0_3, %c0_4, %c0_5, %c0_6] : memref<1x16x1x4x8xbf16, #tpu.memory_space<vmem>>, vector<1x16x1x1x8xbf16>
      %10 = vector.shape_cast %9 : vector<1x16x1x1x8xbf16> to vector<16x8xbf16>
      %c0_7 = arith.constant 0 : index
      %c0_8 = arith.constant 0 : index
      %c0_9 = arith.constant 0 : index
      %c0_10 = arith.constant 0 : index
      %c0_11 = arith.constant 0 : index
      %11 = vector.load %arg4[%c0_7, %c0_8, %c0_9, %c0_10, %c0_11] : memref<1x16x1x4x8xbf16, #tpu.memory_space<vmem>>, vector<1x16x1x1x8xbf16>
      %12 = vector.shape_cast %11 : vector<1x16x1x1x8xbf16> to vector<16x8xbf16>
      %cst = arith.constant dense<0.000000e+00> : vector<16x16xf32>
      %13 = tpu.matmul %10, %12, %cst {dimension_numbers = #tpu.dot_dimension_numbers<[1], [1], [0], [0], [0, 0, 1, 0], [], []>} : vector<16x8xbf16>, vector<16x8xbf16>, vector<16x16xf32> -> vector<16x16xf32>
      %c0_12 = arith.constant 0 : index
      %c0_13 = arith.constant 0 : index
      %c0_14 = arith.constant 0 : index
      %14 = vector.load %arg7[%c0_12, %c0_13, %c0_14] : memref<4x16x1xf32, #tpu.memory_space<vmem>>, vector<1x16x1xf32>
      %15 = vector.shape_cast %14 : vector<1x16x1xf32> to vector<16x1xf32>
      %cst_15 = arith.constant dense<0xFF800000> : vector<16xf32>
      %16 = vector.multi_reduction <maximumf>, %13, %cst_15 [1] : vector<16x16xf32> to vector<16xf32>
      %17 = vector.shape_cast %16 : vector<16xf32> to vector<16x1xf32>
      %18 = arith.maximumf %15, %17 : vector<16x1xf32>
      %19 = arith.subf %15, %18 : vector<16x1xf32>
      %20 = math.exp %19 : vector<16x1xf32>
      %21 = vector.broadcast %18 : vector<16x1xf32> to vector<16x16xf32>
      %22 = arith.subf %13, %21 : vector<16x16xf32>
      %23 = math.exp %22 : vector<16x16xf32>
      %c0_16 = arith.constant 0 : index
      %c0_17 = arith.constant 0 : index
      %c0_18 = arith.constant 0 : index
      %24 = vector.load %arg8[%c0_16, %c0_17, %c0_18] : memref<4x16x1xf32, #tpu.memory_space<vmem>>, vector<1x16x1xf32>
      %25 = vector.shape_cast %24 : vector<1x16x1xf32> to vector<16x1xf32>
      %26 = arith.mulf %20, %25 : vector<16x1xf32>
      %cst_19 = arith.constant dense<0.000000e+00> : vector<16xf32>
      %27 = vector.multi_reduction <add>, %23, %cst_19 [1] : vector<16x16xf32> to vector<16xf32>
      %28 = vector.shape_cast %27 : vector<16xf32> to vector<16x1xf32>
      %29 = arith.addf %26, %28 : vector<16x1xf32>
      %c0_20 = arith.constant 0 : index
      %c0_21 = arith.constant 0 : index
      %c0_22 = arith.constant 0 : index
      %30 = vector.load %arg8[%c0_20, %c0_21, %c0_22] : memref<4x16x1xf32, #tpu.memory_space<vmem>>, vector<1x16x1xf32>
      %31 = vector.shape_cast %30 : vector<1x16x1xf32> to vector<16x1xf32>
      %32 = vector.shape_cast %29 : vector<16x1xf32> to vector<1x16x1xf32>
      tpu.vector_store %arg8[%c0_20, %c0_21, %c0_22], %32 {strides = array<i32>} : memref<4x16x1xf32, #tpu.memory_space<vmem>>, vector<1x16x1xf32>,
      %c0_23 = arith.constant 0 : index
      %c0_24 = arith.constant 0 : index
      %c0_25 = arith.constant 0 : index
      %33 = vector.load %arg9[%c0_23, %c0_24, %c0_25] : memref<4x16x8xf32, #tpu.memory_space<vmem>>, vector<1x16x8xf32>
      %34 = vector.shape_cast %33 : vector<1x16x8xf32> to vector<16x8xf32>
      %35 = vector.broadcast %20 : vector<16x1xf32> to vector<16x8xf32>
      %36 = arith.mulf %35, %34 : vector<16x8xf32>
      %37 = arith.truncf %23 : vector<16x16xf32> to vector<16x16xbf16>
      %c0_26 = arith.constant 0 : index
      %c0_27 = arith.constant 0 : index
      %c0_28 = arith.constant 0 : index
      %c0_29 = arith.constant 0 : index
      %c0_30 = arith.constant 0 : index
      %38 = vector.load %arg5[%c0_26, %c0_27, %c0_28, %c0_29, %c0_30] : memref<1x16x1x4x8xbf16, #tpu.memory_space<vmem>>, vector<1x16x1x1x8xbf16>
      %39 = vector.shape_cast %38 : vector<1x16x1x1x8xbf16> to vector<16x8xbf16>
      %cst_31 = arith.constant dense<0.000000e+00> : vector<16x8xf32>
      %40 = tpu.matmul %37, %39, %cst_31 {dimension_numbers = #tpu.dot_dimension_numbers<[1], [0], [0], [1], [0, 0, 1, 1], [], []>} : vector<16x16xbf16>, vector<16x8xbf16>, vector<16x8xf32> -> vector<16x8xf32>
      %41 = arith.addf %36, %40 : vector<16x8xf32>
      %c0_32 = arith.constant 0 : index
      %c0_33 = arith.constant 0 : index
      %c0_34 = arith.constant 0 : index
      %42 = vector.load %arg9[%c0_32, %c0_33, %c0_34] : memref<4x16x8xf32, #tpu.memory_space<vmem>>, vector<1x16x8xf32>
      %43 = vector.shape_cast %42 : vector<1x16x8xf32> to vector<16x8xf32>
      %44 = vector.shape_cast %41 : vector<16x8xf32> to vector<1x16x8xf32>
      tpu.vector_store %arg9[%c0_32, %c0_33, %c0_34], %44 {strides = array<i32>} : memref<4x16x8xf32, #tpu.memory_space<vmem>>, vector<1x16x8xf32>,
      %c0_35 = arith.constant 0 : index
      %c0_36 = arith.constant 0 : index
      %c0_37 = arith.constant 0 : index
      %45 = vector.load %arg7[%c0_35, %c0_36, %c0_37] : memref<4x16x1xf32, #tpu.memory_space<vmem>>, vector<1x16x1xf32>
      %46 = vector.shape_cast %45 : vector<1x16x1xf32> to vector<16x1xf32>
      %47 = vector.shape_cast %18 : vector<16x1xf32> to vector<1x16x1xf32>
      tpu.vector_store %arg7[%c0_35, %c0_36, %c0_37], %47 {strides = array<i32>} : memref<4x16x1xf32, #tpu.memory_space<vmem>>, vector<1x16x1xf32>,
      %c0_38 = arith.constant 0 : index
      %c0_39 = arith.constant 0 : index
      %c0_40 = arith.constant 0 : index
      %c1 = arith.constant 1 : index
      %c0_41 = arith.constant 0 : index
      %48 = vector.load %arg3[%c0_38, %c0_39, %c0_40, %c1, %c0_41] : memref<1x16x1x4x8xbf16, #tpu.memory_space<vmem>>, vector<1x16x1x1x8xbf16>
      %49 = vector.shape_cast %48 : vector<1x16x1x1x8xbf16> to vector<16x8xbf16>
      %c0_42 = arith.constant 0 : index
      %c0_43 = arith.constant 0 : index
      %c0_44 = arith.constant 0 : index
      %c1_45 = arith.constant 1 : index
      %c0_46 = arith.constant 0 : index
      %50 = vector.load %arg4[%c0_42, %c0_43, %c0_44, %c1_45, %c0_46] : memref<1x16x1x4x8xbf16, #tpu.memory_space<vmem>>, vector<1x16x1x1x8xbf16>
      %51 = vector.shape_cast %50 : vector<1x16x1x1x8xbf16> to vector<16x8xbf16>
      %cst_47 = arith.constant dense<0.000000e+00> : vector<16x16xf32>
      %52 = tpu.matmul %49, %51, %cst_47 {dimension_numbers = #tpu.dot_dimension_numbers<[1], [1], [0], [0], [0, 0, 1, 0], [], []>} : vector<16x8xbf16>, vector<16x8xbf16>, vector<16x16xf32> -> vector<16x16xf32>
      %c1_48 = arith.constant 1 : index
      %c0_49 = arith.constant 0 : index
      %c0_50 = arith.constant 0 : index
      %53 = vector.load %arg7[%c1_48, %c0_49, %c0_50] : memref<4x16x1xf32, #tpu.memory_space<vmem>>, vector<1x16x1xf32>
      %54 = vector.shape_cast %53 : vector<1x16x1xf32> to vector<16x1xf32>
      %cst_51 = arith.constant dense<0xFF800000> : vector<16xf32>
      %55 = vector.multi_reduction <maximumf>, %52, %cst_51 [1] : vector<16x16xf32> to vector<16xf32>
      %56 = vector.shape_cast %55 : vector<16xf32> to vector<16x1xf32>
      %57 = arith.maximumf %54, %56 : vector<16x1xf32>
      %58 = arith.subf %54, %57 : vector<16x1xf32>
      %59 = math.exp %58 : vector<16x1xf32>
      %60 = vector.broadcast %57 : vector<16x1xf32> to vector<16x16xf32>
      %61 = arith.subf %52, %60 : vector<16x16xf32>
      %62 = math.exp %61 : vector<16x16xf32>
      %c1_52 = arith.constant 1 : index
      %c0_53 = arith.constant 0 : index
      %c0_54 = arith.constant 0 : index
      %63 = vector.load %arg8[%c1_52, %c0_53, %c0_54] : memref<4x16x1xf32, #tpu.memory_space<vmem>>, vector<1x16x1xf32>
      %64 = vector.shape_cast %63 : vector<1x16x1xf32> to vector<16x1xf32>
      %65 = arith.mulf %59, %64 : vector<16x1xf32>
      %cst_55 = arith.constant dense<0.000000e+00> : vector<16xf32>
      %66 = vector.multi_reduction <add>, %62, %cst_55 [1] : vector<16x16xf32> to vector<16xf32>
      %67 = vector.shape_cast %66 : vector<16xf32> to vector<16x1xf32>
      %68 = arith.addf %65, %67 : vector<16x1xf32>
      %c1_56 = arith.constant 1 : index
      %c0_57 = arith.constant 0 : index
      %c0_58 = arith.constant 0 : index
      %69 = vector.load %arg8[%c1_56, %c0_57, %c0_58] : memref<4x16x1xf32, #tpu.memory_space<vmem>>, vector<1x16x1xf32>
      %70 = vector.shape_cast %69 : vector<1x16x1xf32> to vector<16x1xf32>
      %71 = vector.shape_cast %68 : vector<16x1xf32> to vector<1x16x1xf32>
      tpu.vector_store %arg8[%c1_56, %c0_57, %c0_58], %71 {strides = array<i32>} : memref<4x16x1xf32, #tpu.memory_space<vmem>>, vector<1x16x1xf32>,
      %c1_59 = arith.constant 1 : index
      %c0_60 = arith.constant 0 : index
      %c0_61 = arith.constant 0 : index
      %72 = vector.load %arg9[%c1_59, %c0_60, %c0_61] : memref<4x16x8xf32, #tpu.memory_space<vmem>>, vector<1x16x8xf32>
      %73 = vector.shape_cast %72 : vector<1x16x8xf32> to vector<16x8xf32>
      %74 = vector.broadcast %59 : vector<16x1xf32> to vector<16x8xf32>
      %75 = arith.mulf %74, %73 : vector<16x8xf32>
      %76 = arith.truncf %62 : vector<16x16xf32> to vector<16x16xbf16>
      %c0_62 = arith.constant 0 : index
      %c0_63 = arith.constant 0 : index
      %c0_64 = arith.constant 0 : index
      %c1_65 = arith.constant 1 : index
      %c0_66 = arith.constant 0 : index
      %77 = vector.load %arg5[%c0_62, %c0_63, %c0_64, %c1_65, %c0_66] : memref<1x16x1x4x8xbf16, #tpu.memory_space<vmem>>, vector<1x16x1x1x8xbf16>
      %78 = vector.shape_cast %77 : vector<1x16x1x1x8xbf16> to vector<16x8xbf16>
      %cst_67 = arith.constant dense<0.000000e+00> : vector<16x8xf32>
      %79 = tpu.matmul %76, %78, %cst_67 {dimension_numbers = #tpu.dot_dimension_numbers<[1], [0], [0], [1], [0, 0, 1, 1], [], []>} : vector<16x16xbf16>, vector<16x8xbf16>, vector<16x8xf32> -> vector<16x8xf32>
      %80 = arith.addf %75, %79 : vector<16x8xf32>
      %c1_68 = arith.constant 1 : index
      %c0_69 = arith.constant 0 : index
      %c0_70 = arith.constant 0 : index
      %81 = vector.load %arg9[%c1_68, %c0_69, %c0_70] : memref<4x16x8xf32, #tpu.memory_space<vmem>>, vector<1x16x8xf32>
      %82 = vector.shape_cast %81 : vector<1x16x8xf32> to vector<16x8xf32>
      %83 = vector.shape_cast %80 : vector<16x8xf32> to vector<1x16x8xf32>
      tpu.vector_store %arg9[%c1_68, %c0_69, %c0_70], %83 {strides = array<i32>} : memref<4x16x8xf32, #tpu.memory_space<vmem>>, vector<1x16x8xf32>,
      %c1_71 = arith.constant 1 : index
      %c0_72 = arith.constant 0 : index
      %c0_73 = arith.constant 0 : index
      %84 = vector.load %arg7[%c1_71, %c0_72, %c0_73] : memref<4x16x1xf32, #tpu.memory_space<vmem>>, vector<1x16x1xf32>
      %85 = vector.shape_cast %84 : vector<1x16x1xf32> to vector<16x1xf32>
      %86 = vector.shape_cast %57 : vector<16x1xf32> to vector<1x16x1xf32>
      tpu.vector_store %arg7[%c1_71, %c0_72, %c0_73], %86 {strides = array<i32>} : memref<4x16x1xf32, #tpu.memory_space<vmem>>, vector<1x16x1xf32>,
      %c0_74 = arith.constant 0 : index
      %c0_75 = arith.constant 0 : index
      %c0_76 = arith.constant 0 : index
      %c2 = arith.constant 2 : index
      %c0_77 = arith.constant 0 : index
      %87 = vector.load %arg3[%c0_74, %c0_75, %c0_76, %c2, %c0_77] : memref<1x16x1x4x8xbf16, #tpu.memory_space<vmem>>, vector<1x16x1x1x8xbf16>
      %88 = vector.shape_cast %87 : vector<1x16x1x1x8xbf16> to vector<16x8xbf16>
      %c0_78 = arith.constant 0 : index
      %c0_79 = arith.constant 0 : index
      %c0_80 = arith.constant 0 : index
      %c2_81 = arith.constant 2 : index
      %c0_82 = arith.constant 0 : index
      %89 = vector.load %arg4[%c0_78, %c0_79, %c0_80, %c2_81, %c0_82] : memref<1x16x1x4x8xbf16, #tpu.memory_space<vmem>>, vector<1x16x1x1x8xbf16>
      %90 = vector.shape_cast %89 : vector<1x16x1x1x8xbf16> to vector<16x8xbf16>
      %cst_83 = arith.constant dense<0.000000e+00> : vector<16x16xf32>
      %91 = tpu.matmul %88, %90, %cst_83 {dimension_numbers = #tpu.dot_dimension_numbers<[1], [1], [0], [0], [0, 0, 1, 0], [], []>} : vector<16x8xbf16>, vector<16x8xbf16>, vector<16x16xf32> -> vector<16x16xf32>
      %c2_84 = arith.constant 2 : index
      %c0_85 = arith.constant 0 : index
      %c0_86 = arith.constant 0 : index
      %92 = vector.load %arg7[%c2_84, %c0_85, %c0_86] : memref<4x16x1xf32, #tpu.memory_space<vmem>>, vector<1x16x1xf32>
      %93 = vector.shape_cast %92 : vector<1x16x1xf32> to vector<16x1xf32>
      %cst_87 = arith.constant dense<0xFF800000> : vector<16xf32>
      %94 = vector.multi_reduction <maximumf>, %91, %cst_87 [1] : vector<16x16xf32> to vector<16xf32>
      %95 = vector.shape_cast %94 : vector<16xf32> to vector<16x1xf32>
      %96 = arith.maximumf %93, %95 : vector<16x1xf32>
      %97 = arith.subf %93, %96 : vector<16x1xf32>
      %98 = math.exp %97 : vector<16x1xf32>
      %99 = vector.broadcast %96 : vector<16x1xf32> to vector<16x16xf32>
      %100 = arith.subf %91, %99 : vector<16x16xf32>
      %101 = math.exp %100 : vector<16x16xf32>
      %c2_88 = arith.constant 2 : index
      %c0_89 = arith.constant 0 : index
      %c0_90 = arith.constant 0 : index
      %102 = vector.load %arg8[%c2_88, %c0_89, %c0_90] : memref<4x16x1xf32, #tpu.memory_space<vmem>>, vector<1x16x1xf32>
      %103 = vector.shape_cast %102 : vector<1x16x1xf32> to vector<16x1xf32>
      %104 = arith.mulf %98, %103 : vector<16x1xf32>
      %cst_91 = arith.constant dense<0.000000e+00> : vector<16xf32>
      %105 = vector.multi_reduction <add>, %101, %cst_91 [1] : vector<16x16xf32> to vector<16xf32>
      %106 = vector.shape_cast %105 : vector<16xf32> to vector<16x1xf32>
      %107 = arith.addf %104, %106 : vector<16x1xf32>
      %c2_92 = arith.constant 2 : index
      %c0_93 = arith.constant 0 : index
      %c0_94 = arith.constant 0 : index
      %108 = vector.load %arg8[%c2_92, %c0_93, %c0_94] : memref<4x16x1xf32, #tpu.memory_space<vmem>>, vector<1x16x1xf32>
      %109 = vector.shape_cast %108 : vector<1x16x1xf32> to vector<16x1xf32>
      %110 = vector.shape_cast %107 : vector<16x1xf32> to vector<1x16x1xf32>
      tpu.vector_store %arg8[%c2_92, %c0_93, %c0_94], %110 {strides = array<i32>} : memref<4x16x1xf32, #tpu.memory_space<vmem>>, vector<1x16x1xf32>,
      %c2_95 = arith.constant 2 : index
      %c0_96 = arith.constant 0 : index
      %c0_97 = arith.constant 0 : index
      %111 = vector.load %arg9[%c2_95, %c0_96, %c0_97] : memref<4x16x8xf32, #tpu.memory_space<vmem>>, vector<1x16x8xf32>
      %112 = vector.shape_cast %111 : vector<1x16x8xf32> to vector<16x8xf32>
      %113 = vector.broadcast %98 : vector<16x1xf32> to vector<16x8xf32>
      %114 = arith.mulf %113, %112 : vector<16x8xf32>
      %115 = arith.truncf %101 : vector<16x16xf32> to vector<16x16xbf16>
      %c0_98 = arith.constant 0 : index
      %c0_99 = arith.constant 0 : index
      %c0_100 = arith.constant 0 : index
      %c2_101 = arith.constant 2 : index
      %c0_102 = arith.constant 0 : index
      %116 = vector.load %arg5[%c0_98, %c0_99, %c0_100, %c2_101, %c0_102] : memref<1x16x1x4x8xbf16, #tpu.memory_space<vmem>>, vector<1x16x1x1x8xbf16>
      %117 = vector.shape_cast %116 : vector<1x16x1x1x8xbf16> to vector<16x8xbf16>
      %cst_103 = arith.constant dense<0.000000e+00> : vector<16x8xf32>
      %118 = tpu.matmul %115, %117, %cst_103 {dimension_numbers = #tpu.dot_dimension_numbers<[1], [0], [0], [1], [0, 0, 1, 1], [], []>} : vector<16x16xbf16>, vector<16x8xbf16>, vector<16x8xf32> -> vector<16x8xf32>
      %119 = arith.addf %114, %118 : vector<16x8xf32>
      %c2_104 = arith.constant 2 : index
      %c0_105 = arith.constant 0 : index
      %c0_106 = arith.constant 0 : index
      %120 = vector.load %arg9[%c2_104, %c0_105, %c0_106] : memref<4x16x8xf32, #tpu.memory_space<vmem>>, vector<1x16x8xf32>
      %121 = vector.shape_cast %120 : vector<1x16x8xf32> to vector<16x8xf32>
      %122 = vector.shape_cast %119 : vector<16x8xf32> to vector<1x16x8xf32>
      tpu.vector_store %arg9[%c2_104, %c0_105, %c0_106], %122 {strides = array<i32>} : memref<4x16x8xf32, #tpu.memory_space<vmem>>, vector<1x16x8xf32>,
      %c2_107 = arith.constant 2 : index
      %c0_108 = arith.constant 0 : index
      %c0_109 = arith.constant 0 : index
      %123 = vector.load %arg7[%c2_107, %c0_108, %c0_109] : memref<4x16x1xf32, #tpu.memory_space<vmem>>, vector<1x16x1xf32>
      %124 = vector.shape_cast %123 : vector<1x16x1xf32> to vector<16x1xf32>
      %125 = vector.shape_cast %96 : vector<16x1xf32> to vector<1x16x1xf32>
      tpu.vector_store %arg7[%c2_107, %c0_108, %c0_109], %125 {strides = array<i32>} : memref<4x16x1xf32, #tpu.memory_space<vmem>>, vector<1x16x1xf32>,
      %c0_110 = arith.constant 0 : index
      %c0_111 = arith.constant 0 : index
      %c0_112 = arith.constant 0 : index
      %c3 = arith.constant 3 : index
      %c0_113 = arith.constant 0 : index
      %126 = vector.load %arg3[%c0_110, %c0_111, %c0_112, %c3, %c0_113] : memref<1x16x1x4x8xbf16, #tpu.memory_space<vmem>>, vector<1x16x1x1x8xbf16>
      %127 = vector.shape_cast %126 : vector<1x16x1x1x8xbf16> to vector<16x8xbf16>
      %c0_114 = arith.constant 0 : index
      %c0_115 = arith.constant 0 : index
      %c0_116 = arith.constant 0 : index
      %c3_117 = arith.constant 3 : index
      %c0_118 = arith.constant 0 : index
      %128 = vector.load %arg4[%c0_114, %c0_115, %c0_116, %c3_117, %c0_118] : memref<1x16x1x4x8xbf16, #tpu.memory_space<vmem>>, vector<1x16x1x1x8xbf16>
      %129 = vector.shape_cast %128 : vector<1x16x1x1x8xbf16> to vector<16x8xbf16>
      %cst_119 = arith.constant dense<0.000000e+00> : vector<16x16xf32>
      %130 = tpu.matmul %127, %129, %cst_119 {dimension_numbers = #tpu.dot_dimension_numbers<[1], [1], [0], [0], [0, 0, 1, 0], [], []>} : vector<16x8xbf16>, vector<16x8xbf16>, vector<16x16xf32> -> vector<16x16xf32>
      %c3_120 = arith.constant 3 : index
      %c0_121 = arith.constant 0 : index
      %c0_122 = arith.constant 0 : index
      %131 = vector.load %arg7[%c3_120, %c0_121, %c0_122] : memref<4x16x1xf32, #tpu.memory_space<vmem>>, vector<1x16x1xf32>
      %132 = vector.shape_cast %131 : vector<1x16x1xf32> to vector<16x1xf32>
      %cst_123 = arith.constant dense<0xFF800000> : vector<16xf32>
      %133 = vector.multi_reduction <maximumf>, %130, %cst_123 [1] : vector<16x16xf32> to vector<16xf32>
      %134 = vector.shape_cast %133 : vector<16xf32> to vector<16x1xf32>
      %135 = arith.maximumf %132, %134 : vector<16x1xf32>
      %136 = arith.subf %132, %135 : vector<16x1xf32>
      %137 = math.exp %136 : vector<16x1xf32>
      %138 = vector.broadcast %135 : vector<16x1xf32> to vector<16x16xf32>
      %139 = arith.subf %130, %138 : vector<16x16xf32>
      %140 = math.exp %139 : vector<16x16xf32>
      %c3_124 = arith.constant 3 : index
      %c0_125 = arith.constant 0 : index
      %c0_126 = arith.constant 0 : index
      %141 = vector.load %arg8[%c3_124, %c0_125, %c0_126] : memref<4x16x1xf32, #tpu.memory_space<vmem>>, vector<1x16x1xf32>
      %142 = vector.shape_cast %141 : vector<1x16x1xf32> to vector<16x1xf32>
      %143 = arith.mulf %137, %142 : vector<16x1xf32>
      %cst_127 = arith.constant dense<0.000000e+00> : vector<16xf32>
      %144 = vector.multi_reduction <add>, %140, %cst_127 [1] : vector<16x16xf32> to vector<16xf32>
      %145 = vector.shape_cast %144 : vector<16xf32> to vector<16x1xf32>
      %146 = arith.addf %143, %145 : vector<16x1xf32>
      %c3_128 = arith.constant 3 : index
      %c0_129 = arith.constant 0 : index
      %c0_130 = arith.constant 0 : index
      %147 = vector.load %arg8[%c3_128, %c0_129, %c0_130] : memref<4x16x1xf32, #tpu.memory_space<vmem>>, vector<1x16x1xf32>
      %148 = vector.shape_cast %147 : vector<1x16x1xf32> to vector<16x1xf32>
      %149 = vector.shape_cast %146 : vector<16x1xf32> to vector<1x16x1xf32>
      tpu.vector_store %arg8[%c3_128, %c0_129, %c0_130], %149 {strides = array<i32>} : memref<4x16x1xf32, #tpu.memory_space<vmem>>, vector<1x16x1xf32>,
      %c3_131 = arith.constant 3 : index
      %c0_132 = arith.constant 0 : index
      %c0_133 = arith.constant 0 : index
      %150 = vector.load %arg9[%c3_131, %c0_132, %c0_133] : memref<4x16x8xf32, #tpu.memory_space<vmem>>, vector<1x16x8xf32>
      %151 = vector.shape_cast %150 : vector<1x16x8xf32> to vector<16x8xf32>
      %152 = vector.broadcast %137 : vector<16x1xf32> to vector<16x8xf32>
      %153 = arith.mulf %152, %151 : vector<16x8xf32>
      %154 = arith.truncf %140 : vector<16x16xf32> to vector<16x16xbf16>
      %c0_134 = arith.constant 0 : index
      %c0_135 = arith.constant 0 : index
      %c0_136 = arith.constant 0 : index
      %c3_137 = arith.constant 3 : index
      %c0_138 = arith.constant 0 : index
      %155 = vector.load %arg5[%c0_134, %c0_135, %c0_136, %c3_137, %c0_138] : memref<1x16x1x4x8xbf16, #tpu.memory_space<vmem>>, vector<1x16x1x1x8xbf16>
      %156 = vector.shape_cast %155 : vector<1x16x1x1x8xbf16> to vector<16x8xbf16>
      %cst_139 = arith.constant dense<0.000000e+00> : vector<16x8xf32>
      %157 = tpu.matmul %154, %156, %cst_139 {dimension_numbers = #tpu.dot_dimension_numbers<[1], [0], [0], [1], [0, 0, 1, 1], [], []>} : vector<16x16xbf16>, vector<16x8xbf16>, vector<16x8xf32> -> vector<16x8xf32>
      %158 = arith.addf %153, %157 : vector<16x8xf32>
      %c3_140 = arith.constant 3 : index
      %c0_141 = arith.constant 0 : index
      %c0_142 = arith.constant 0 : index
      %159 = vector.load %arg9[%c3_140, %c0_141, %c0_142] : memref<4x16x8xf32, #tpu.memory_space<vmem>>, vector<1x16x8xf32>
      %160 = vector.shape_cast %159 : vector<1x16x8xf32> to vector<16x8xf32>
      %161 = vector.shape_cast %158 : vector<16x8xf32> to vector<1x16x8xf32>
      tpu.vector_store %arg9[%c3_140, %c0_141, %c0_142], %161 {strides = array<i32>} : memref<4x16x8xf32, #tpu.memory_space<vmem>>, vector<1x16x8xf32>,
      %c3_143 = arith.constant 3 : index
      %c0_144 = arith.constant 0 : index
      %c0_145 = arith.constant 0 : index
      %162 = vector.load %arg7[%c3_143, %c0_144, %c0_145] : memref<4x16x1xf32, #tpu.memory_space<vmem>>, vector<1x16x1xf32>
      %163 = vector.shape_cast %162 : vector<1x16x1xf32> to vector<16x1xf32>
      %164 = vector.shape_cast %135 : vector<16x1xf32> to vector<1x16x1xf32>
      tpu.vector_store %arg7[%c3_143, %c0_144, %c0_145], %164 {strides = array<i32>} : memref<4x16x1xf32, #tpu.memory_space<vmem>>, vector<1x16x1xf32>,
    } else {
    }
    %6 = arith.cmpi eq, %arg2, %arg1 : i32
    %7 = arith.extui %6 : i1 to i32
    %c0_i32_2 = arith.constant 0 : i32
    %8 = arith.cmpi ne, %7, %c0_i32_2 : i32
    scf.if %8 {
      %9 = tpu.iota {dimensions = array<i32: 0>} : vector<16x16xi32>
      %10 = tpu.iota {dimensions = array<i32: 1>} : vector<16x16xi32>
      %11 = arith.cmpi sge, %9, %10 : vector<16x16xi32>
      %c0 = arith.constant 0 : index
      %c0_3 = arith.constant 0 : index
      %c0_4 = arith.constant 0 : index
      %c0_5 = arith.constant 0 : index
      %c0_6 = arith.constant 0 : index
      %12 = vector.load %arg3[%c0, %c0_3, %c0_4, %c0_5, %c0_6] : memref<1x16x1x4x8xbf16, #tpu.memory_space<vmem>>, vector<1x16x1x1x8xbf16>
      %13 = vector.shape_cast %12 : vector<1x16x1x1x8xbf16> to vector<16x8xbf16>
      %c0_7 = arith.constant 0 : index
      %c0_8 = arith.constant 0 : index
      %c0_9 = arith.constant 0 : index
      %c0_10 = arith.constant 0 : index
      %c0_11 = arith.constant 0 : index
      %14 = vector.load %arg4[%c0_7, %c0_8, %c0_9, %c0_10, %c0_11] : memref<1x16x1x4x8xbf16, #tpu.memory_space<vmem>>, vector<1x16x1x1x8xbf16>
      %15 = vector.shape_cast %14 : vector<1x16x1x1x8xbf16> to vector<16x8xbf16>
      %cst = arith.constant dense<0.000000e+00> : vector<16x16xf32>
      %16 = tpu.matmul %13, %15, %cst {dimension_numbers = #tpu.dot_dimension_numbers<[1], [1], [0], [0], [0, 0, 1, 0], [], []>} : vector<16x8xbf16>, vector<16x8xbf16>, vector<16x16xf32> -> vector<16x16xf32>
      %cst_12 = arith.constant -1.000000e+30 : f32
      %17 = vector.broadcast %cst_12 : f32 to vector<16x16xf32>
      %18 = arith.select %11, %16, %17 : vector<16x16xi1>, vector<16x16xf32>
      %c0_13 = arith.constant 0 : index
      %c0_14 = arith.constant 0 : index
      %c0_15 = arith.constant 0 : index
      %19 = vector.load %arg7[%c0_13, %c0_14, %c0_15] : memref<4x16x1xf32, #tpu.memory_space<vmem>>, vector<1x16x1xf32>
      %20 = vector.shape_cast %19 : vector<1x16x1xf32> to vector<16x1xf32>
      %cst_16 = arith.constant dense<0xFF800000> : vector<16xf32>
      %21 = vector.multi_reduction <maximumf>, %18, %cst_16 [1] : vector<16x16xf32> to vector<16xf32>
      %22 = vector.shape_cast %21 : vector<16xf32> to vector<16x1xf32>
      %23 = arith.maximumf %20, %22 : vector<16x1xf32>
      %24 = arith.subf %20, %23 : vector<16x1xf32>
      %25 = math.exp %24 : vector<16x1xf32>
      %26 = vector.broadcast %23 : vector<16x1xf32> to vector<16x16xf32>
      %27 = arith.subf %18, %26 : vector<16x16xf32>
      %28 = math.exp %27 : vector<16x16xf32>
      %c0_17 = arith.constant 0 : index
      %c0_18 = arith.constant 0 : index
      %c0_19 = arith.constant 0 : index
      %29 = vector.load %arg8[%c0_17, %c0_18, %c0_19] : memref<4x16x1xf32, #tpu.memory_space<vmem>>, vector<1x16x1xf32>
      %30 = vector.shape_cast %29 : vector<1x16x1xf32> to vector<16x1xf32>
      %31 = arith.mulf %25, %30 : vector<16x1xf32>
      %cst_20 = arith.constant dense<0.000000e+00> : vector<16xf32>
      %32 = vector.multi_reduction <add>, %28, %cst_20 [1] : vector<16x16xf32> to vector<16xf32>
      %33 = vector.shape_cast %32 : vector<16xf32> to vector<16x1xf32>
      %34 = arith.addf %31, %33 : vector<16x1xf32>
      %c0_21 = arith.constant 0 : index
      %c0_22 = arith.constant 0 : index
      %c0_23 = arith.constant 0 : index
      %35 = vector.load %arg8[%c0_21, %c0_22, %c0_23] : memref<4x16x1xf32, #tpu.memory_space<vmem>>, vector<1x16x1xf32>
      %36 = vector.shape_cast %35 : vector<1x16x1xf32> to vector<16x1xf32>
      %37 = vector.shape_cast %34 : vector<16x1xf32> to vector<1x16x1xf32>
      tpu.vector_store %arg8[%c0_21, %c0_22, %c0_23], %37 {strides = array<i32>} : memref<4x16x1xf32, #tpu.memory_space<vmem>>, vector<1x16x1xf32>,
      %c0_24 = arith.constant 0 : index
      %c0_25 = arith.constant 0 : index
      %c0_26 = arith.constant 0 : index
      %38 = vector.load %arg9[%c0_24, %c0_25, %c0_26] : memref<4x16x8xf32, #tpu.memory_space<vmem>>, vector<1x16x8xf32>
      %39 = vector.shape_cast %38 : vector<1x16x8xf32> to vector<16x8xf32>
      %40 = vector.broadcast %25 : vector<16x1xf32> to vector<16x8xf32>
      %41 = arith.mulf %40, %39 : vector<16x8xf32>
      %42 = arith.truncf %28 : vector<16x16xf32> to vector<16x16xbf16>
      %c0_27 = arith.constant 0 : index
      %c0_28 = arith.constant 0 : index
      %c0_29 = arith.constant 0 : index
      %c0_30 = arith.constant 0 : index
      %c0_31 = arith.constant 0 : index
      %43 = vector.load %arg5[%c0_27, %c0_28, %c0_29, %c0_30, %c0_31] : memref<1x16x1x4x8xbf16, #tpu.memory_space<vmem>>, vector<1x16x1x1x8xbf16>
      %44 = vector.shape_cast %43 : vector<1x16x1x1x8xbf16> to vector<16x8xbf16>
      %cst_32 = arith.constant dense<0.000000e+00> : vector<16x8xf32>
      %45 = tpu.matmul %42, %44, %cst_32 {dimension_numbers = #tpu.dot_dimension_numbers<[1], [0], [0], [1], [0, 0, 1, 1], [], []>} : vector<16x16xbf16>, vector<16x8xbf16>, vector<16x8xf32> -> vector<16x8xf32>
      %46 = arith.addf %41, %45 : vector<16x8xf32>
      %c0_33 = arith.constant 0 : index
      %c0_34 = arith.constant 0 : index
      %c0_35 = arith.constant 0 : index
      %47 = vector.load %arg9[%c0_33, %c0_34, %c0_35] : memref<4x16x8xf32, #tpu.memory_space<vmem>>, vector<1x16x8xf32>
      %48 = vector.shape_cast %47 : vector<1x16x8xf32> to vector<16x8xf32>
      %49 = vector.shape_cast %46 : vector<16x8xf32> to vector<1x16x8xf32>
      tpu.vector_store %arg9[%c0_33, %c0_34, %c0_35], %49 {strides = array<i32>} : memref<4x16x8xf32, #tpu.memory_space<vmem>>, vector<1x16x8xf32>,
      %c0_36 = arith.constant 0 : index
      %c0_37 = arith.constant 0 : index
      %c0_38 = arith.constant 0 : index
      %50 = vector.load %arg7[%c0_36, %c0_37, %c0_38] : memref<4x16x1xf32, #tpu.memory_space<vmem>>, vector<1x16x1xf32>
      %51 = vector.shape_cast %50 : vector<1x16x1xf32> to vector<16x1xf32>
      %52 = vector.shape_cast %23 : vector<16x1xf32> to vector<1x16x1xf32>
      tpu.vector_store %arg7[%c0_36, %c0_37, %c0_38], %52 {strides = array<i32>} : memref<4x16x1xf32, #tpu.memory_space<vmem>>, vector<1x16x1xf32>,
      %c0_39 = arith.constant 0 : index
      %c0_40 = arith.constant 0 : index
      %c0_41 = arith.constant 0 : index
      %c1 = arith.constant 1 : index
      %c0_42 = arith.constant 0 : index
      %53 = vector.load %arg3[%c0_39, %c0_40, %c0_41, %c1, %c0_42] : memref<1x16x1x4x8xbf16, #tpu.memory_space<vmem>>, vector<1x16x1x1x8xbf16>
      %54 = vector.shape_cast %53 : vector<1x16x1x1x8xbf16> to vector<16x8xbf16>
      %c0_43 = arith.constant 0 : index
      %c0_44 = arith.constant 0 : index
      %c0_45 = arith.constant 0 : index
      %c1_46 = arith.constant 1 : index
      %c0_47 = arith.constant 0 : index
      %55 = vector.load %arg4[%c0_43, %c0_44, %c0_45, %c1_46, %c0_47] : memref<1x16x1x4x8xbf16, #tpu.memory_space<vmem>>, vector<1x16x1x1x8xbf16>
      %56 = vector.shape_cast %55 : vector<1x16x1x1x8xbf16> to vector<16x8xbf16>
      %cst_48 = arith.constant dense<0.000000e+00> : vector<16x16xf32>
      %57 = tpu.matmul %54, %56, %cst_48 {dimension_numbers = #tpu.dot_dimension_numbers<[1], [1], [0], [0], [0, 0, 1, 0], [], []>} : vector<16x8xbf16>, vector<16x8xbf16>, vector<16x16xf32> -> vector<16x16xf32>
      %cst_49 = arith.constant -1.000000e+30 : f32
      %58 = vector.broadcast %cst_49 : f32 to vector<16x16xf32>
      %59 = arith.select %11, %57, %58 : vector<16x16xi1>, vector<16x16xf32>
      %c1_50 = arith.constant 1 : index
      %c0_51 = arith.constant 0 : index
      %c0_52 = arith.constant 0 : index
      %60 = vector.load %arg7[%c1_50, %c0_51, %c0_52] : memref<4x16x1xf32, #tpu.memory_space<vmem>>, vector<1x16x1xf32>
      %61 = vector.shape_cast %60 : vector<1x16x1xf32> to vector<16x1xf32>
      %cst_53 = arith.constant dense<0xFF800000> : vector<16xf32>
      %62 = vector.multi_reduction <maximumf>, %59, %cst_53 [1] : vector<16x16xf32> to vector<16xf32>
      %63 = vector.shape_cast %62 : vector<16xf32> to vector<16x1xf32>
      %64 = arith.maximumf %61, %63 : vector<16x1xf32>
      %65 = arith.subf %61, %64 : vector<16x1xf32>
      %66 = math.exp %65 : vector<16x1xf32>
      %67 = vector.broadcast %64 : vector<16x1xf32> to vector<16x16xf32>
      %68 = arith.subf %59, %67 : vector<16x16xf32>
      %69 = math.exp %68 : vector<16x16xf32>
      %c1_54 = arith.constant 1 : index
      %c0_55 = arith.constant 0 : index
      %c0_56 = arith.constant 0 : index
      %70 = vector.load %arg8[%c1_54, %c0_55, %c0_56] : memref<4x16x1xf32, #tpu.memory_space<vmem>>, vector<1x16x1xf32>
      %71 = vector.shape_cast %70 : vector<1x16x1xf32> to vector<16x1xf32>
      %72 = arith.mulf %66, %71 : vector<16x1xf32>
      %cst_57 = arith.constant dense<0.000000e+00> : vector<16xf32>
      %73 = vector.multi_reduction <add>, %69, %cst_57 [1] : vector<16x16xf32> to vector<16xf32>
      %74 = vector.shape_cast %73 : vector<16xf32> to vector<16x1xf32>
      %75 = arith.addf %72, %74 : vector<16x1xf32>
      %c1_58 = arith.constant 1 : index
      %c0_59 = arith.constant 0 : index
      %c0_60 = arith.constant 0 : index
      %76 = vector.load %arg8[%c1_58, %c0_59, %c0_60] : memref<4x16x1xf32, #tpu.memory_space<vmem>>, vector<1x16x1xf32>
      %77 = vector.shape_cast %76 : vector<1x16x1xf32> to vector<16x1xf32>
      %78 = vector.shape_cast %75 : vector<16x1xf32> to vector<1x16x1xf32>
      tpu.vector_store %arg8[%c1_58, %c0_59, %c0_60], %78 {strides = array<i32>} : memref<4x16x1xf32, #tpu.memory_space<vmem>>, vector<1x16x1xf32>,
      %c1_61 = arith.constant 1 : index
      %c0_62 = arith.constant 0 : index
      %c0_63 = arith.constant 0 : index
      %79 = vector.load %arg9[%c1_61, %c0_62, %c0_63] : memref<4x16x8xf32, #tpu.memory_space<vmem>>, vector<1x16x8xf32>
      %80 = vector.shape_cast %79 : vector<1x16x8xf32> to vector<16x8xf32>
      %81 = vector.broadcast %66 : vector<16x1xf32> to vector<16x8xf32>
      %82 = arith.mulf %81, %80 : vector<16x8xf32>
      %83 = arith.truncf %69 : vector<16x16xf32> to vector<16x16xbf16>
      %c0_64 = arith.constant 0 : index
      %c0_65 = arith.constant 0 : index
      %c0_66 = arith.constant 0 : index
      %c1_67 = arith.constant 1 : index
      %c0_68 = arith.constant 0 : index
      %84 = vector.load %arg5[%c0_64, %c0_65, %c0_66, %c1_67, %c0_68] : memref<1x16x1x4x8xbf16, #tpu.memory_space<vmem>>, vector<1x16x1x1x8xbf16>
      %85 = vector.shape_cast %84 : vector<1x16x1x1x8xbf16> to vector<16x8xbf16>
      %cst_69 = arith.constant dense<0.000000e+00> : vector<16x8xf32>
      %86 = tpu.matmul %83, %85, %cst_69 {dimension_numbers = #tpu.dot_dimension_numbers<[1], [0], [0], [1], [0, 0, 1, 1], [], []>} : vector<16x16xbf16>, vector<16x8xbf16>, vector<16x8xf32> -> vector<16x8xf32>
      %87 = arith.addf %82, %86 : vector<16x8xf32>
      %c1_70 = arith.constant 1 : index
      %c0_71 = arith.constant 0 : index
      %c0_72 = arith.constant 0 : index
      %88 = vector.load %arg9[%c1_70, %c0_71, %c0_72] : memref<4x16x8xf32, #tpu.memory_space<vmem>>, vector<1x16x8xf32>
      %89 = vector.shape_cast %88 : vector<1x16x8xf32> to vector<16x8xf32>
      %90 = vector.shape_cast %87 : vector<16x8xf32> to vector<1x16x8xf32>
      tpu.vector_store %arg9[%c1_70, %c0_71, %c0_72], %90 {strides = array<i32>} : memref<4x16x8xf32, #tpu.memory_space<vmem>>, vector<1x16x8xf32>,
      %c1_73 = arith.constant 1 : index
      %c0_74 = arith.constant 0 : index
      %c0_75 = arith.constant 0 : index
      %91 = vector.load %arg7[%c1_73, %c0_74, %c0_75] : memref<4x16x1xf32, #tpu.memory_space<vmem>>, vector<1x16x1xf32>
      %92 = vector.shape_cast %91 : vector<1x16x1xf32> to vector<16x1xf32>
      %93 = vector.shape_cast %64 : vector<16x1xf32> to vector<1x16x1xf32>
      tpu.vector_store %arg7[%c1_73, %c0_74, %c0_75], %93 {strides = array<i32>} : memref<4x16x1xf32, #tpu.memory_space<vmem>>, vector<1x16x1xf32>,
      %c0_76 = arith.constant 0 : index
      %c0_77 = arith.constant 0 : index
      %c0_78 = arith.constant 0 : index
      %c2 = arith.constant 2 : index
      %c0_79 = arith.constant 0 : index
      %94 = vector.load %arg3[%c0_76, %c0_77, %c0_78, %c2, %c0_79] : memref<1x16x1x4x8xbf16, #tpu.memory_space<vmem>>, vector<1x16x1x1x8xbf16>
      %95 = vector.shape_cast %94 : vector<1x16x1x1x8xbf16> to vector<16x8xbf16>
      %c0_80 = arith.constant 0 : index
      %c0_81 = arith.constant 0 : index
      %c0_82 = arith.constant 0 : index
      %c2_83 = arith.constant 2 : index
      %c0_84 = arith.constant 0 : index
      %96 = vector.load %arg4[%c0_80, %c0_81, %c0_82, %c2_83, %c0_84] : memref<1x16x1x4x8xbf16, #tpu.memory_space<vmem>>, vector<1x16x1x1x8xbf16>
      %97 = vector.shape_cast %96 : vector<1x16x1x1x8xbf16> to vector<16x8xbf16>
      %cst_85 = arith.constant dense<0.000000e+00> : vector<16x16xf32>
      %98 = tpu.matmul %95, %97, %cst_85 {dimension_numbers = #tpu.dot_dimension_numbers<[1], [1], [0], [0], [0, 0, 1, 0], [], []>} : vector<16x8xbf16>, vector<16x8xbf16>, vector<16x16xf32> -> vector<16x16xf32>
      %cst_86 = arith.constant -1.000000e+30 : f32
      %99 = vector.broadcast %cst_86 : f32 to vector<16x16xf32>
      %100 = arith.select %11, %98, %99 : vector<16x16xi1>, vector<16x16xf32>
      %c2_87 = arith.constant 2 : index
      %c0_88 = arith.constant 0 : index
      %c0_89 = arith.constant 0 : index
      %101 = vector.load %arg7[%c2_87, %c0_88, %c0_89] : memref<4x16x1xf32, #tpu.memory_space<vmem>>, vector<1x16x1xf32>
      %102 = vector.shape_cast %101 : vector<1x16x1xf32> to vector<16x1xf32>
      %cst_90 = arith.constant dense<0xFF800000> : vector<16xf32>
      %103 = vector.multi_reduction <maximumf>, %100, %cst_90 [1] : vector<16x16xf32> to vector<16xf32>
      %104 = vector.shape_cast %103 : vector<16xf32> to vector<16x1xf32>
      %105 = arith.maximumf %102, %104 : vector<16x1xf32>
      %106 = arith.subf %102, %105 : vector<16x1xf32>
      %107 = math.exp %106 : vector<16x1xf32>
      %108 = vector.broadcast %105 : vector<16x1xf32> to vector<16x16xf32>
      %109 = arith.subf %100, %108 : vector<16x16xf32>
      %110 = math.exp %109 : vector<16x16xf32>
      %c2_91 = arith.constant 2 : index
      %c0_92 = arith.constant 0 : index
      %c0_93 = arith.constant 0 : index
      %111 = vector.load %arg8[%c2_91, %c0_92, %c0_93] : memref<4x16x1xf32, #tpu.memory_space<vmem>>, vector<1x16x1xf32>
      %112 = vector.shape_cast %111 : vector<1x16x1xf32> to vector<16x1xf32>
      %113 = arith.mulf %107, %112 : vector<16x1xf32>
      %cst_94 = arith.constant dense<0.000000e+00> : vector<16xf32>
      %114 = vector.multi_reduction <add>, %110, %cst_94 [1] : vector<16x16xf32> to vector<16xf32>
      %115 = vector.shape_cast %114 : vector<16xf32> to vector<16x1xf32>
      %116 = arith.addf %113, %115 : vector<16x1xf32>
      %c2_95 = arith.constant 2 : index
      %c0_96 = arith.constant 0 : index
      %c0_97 = arith.constant 0 : index
      %117 = vector.load %arg8[%c2_95, %c0_96, %c0_97] : memref<4x16x1xf32, #tpu.memory_space<vmem>>, vector<1x16x1xf32>
      %118 = vector.shape_cast %117 : vector<1x16x1xf32> to vector<16x1xf32>
      %119 = vector.shape_cast %116 : vector<16x1xf32> to vector<1x16x1xf32>
      tpu.vector_store %arg8[%c2_95, %c0_96, %c0_97], %119 {strides = array<i32>} : memref<4x16x1xf32, #tpu.memory_space<vmem>>, vector<1x16x1xf32>,
      %c2_98 = arith.constant 2 : index
      %c0_99 = arith.constant 0 : index
      %c0_100 = arith.constant 0 : index
      %120 = vector.load %arg9[%c2_98, %c0_99, %c0_100] : memref<4x16x8xf32, #tpu.memory_space<vmem>>, vector<1x16x8xf32>
      %121 = vector.shape_cast %120 : vector<1x16x8xf32> to vector<16x8xf32>
      %122 = vector.broadcast %107 : vector<16x1xf32> to vector<16x8xf32>
      %123 = arith.mulf %122, %121 : vector<16x8xf32>
      %124 = arith.truncf %110 : vector<16x16xf32> to vector<16x16xbf16>
      %c0_101 = arith.constant 0 : index
      %c0_102 = arith.constant 0 : index
      %c0_103 = arith.constant 0 : index
      %c2_104 = arith.constant 2 : index
      %c0_105 = arith.constant 0 : index
      %125 = vector.load %arg5[%c0_101, %c0_102, %c0_103, %c2_104, %c0_105] : memref<1x16x1x4x8xbf16, #tpu.memory_space<vmem>>, vector<1x16x1x1x8xbf16>
      %126 = vector.shape_cast %125 : vector<1x16x1x1x8xbf16> to vector<16x8xbf16>
      %cst_106 = arith.constant dense<0.000000e+00> : vector<16x8xf32>
      %127 = tpu.matmul %124, %126, %cst_106 {dimension_numbers = #tpu.dot_dimension_numbers<[1], [0], [0], [1], [0, 0, 1, 1], [], []>} : vector<16x16xbf16>, vector<16x8xbf16>, vector<16x8xf32> -> vector<16x8xf32>
      %128 = arith.addf %123, %127 : vector<16x8xf32>
      %c2_107 = arith.constant 2 : index
      %c0_108 = arith.constant 0 : index
      %c0_109 = arith.constant 0 : index
      %129 = vector.load %arg9[%c2_107, %c0_108, %c0_109] : memref<4x16x8xf32, #tpu.memory_space<vmem>>, vector<1x16x8xf32>
      %130 = vector.shape_cast %129 : vector<1x16x8xf32> to vector<16x8xf32>
      %131 = vector.shape_cast %128 : vector<16x8xf32> to vector<1x16x8xf32>
      tpu.vector_store %arg9[%c2_107, %c0_108, %c0_109], %131 {strides = array<i32>} : memref<4x16x8xf32, #tpu.memory_space<vmem>>, vector<1x16x8xf32>,
      %c2_110 = arith.constant 2 : index
      %c0_111 = arith.constant 0 : index
      %c0_112 = arith.constant 0 : index
      %132 = vector.load %arg7[%c2_110, %c0_111, %c0_112] : memref<4x16x1xf32, #tpu.memory_space<vmem>>, vector<1x16x1xf32>
      %133 = vector.shape_cast %132 : vector<1x16x1xf32> to vector<16x1xf32>
      %134 = vector.shape_cast %105 : vector<16x1xf32> to vector<1x16x1xf32>
      tpu.vector_store %arg7[%c2_110, %c0_111, %c0_112], %134 {strides = array<i32>} : memref<4x16x1xf32, #tpu.memory_space<vmem>>, vector<1x16x1xf32>,
      %c0_113 = arith.constant 0 : index
      %c0_114 = arith.constant 0 : index
      %c0_115 = arith.constant 0 : index
      %c3 = arith.constant 3 : index
      %c0_116 = arith.constant 0 : index
      %135 = vector.load %arg3[%c0_113, %c0_114, %c0_115, %c3, %c0_116] : memref<1x16x1x4x8xbf16, #tpu.memory_space<vmem>>, vector<1x16x1x1x8xbf16>
      %136 = vector.shape_cast %135 : vector<1x16x1x1x8xbf16> to vector<16x8xbf16>
      %c0_117 = arith.constant 0 : index
      %c0_118 = arith.constant 0 : index
      %c0_119 = arith.constant 0 : index
      %c3_120 = arith.constant 3 : index
      %c0_121 = arith.constant 0 : index
      %137 = vector.load %arg4[%c0_117, %c0_118, %c0_119, %c3_120, %c0_121] : memref<1x16x1x4x8xbf16, #tpu.memory_space<vmem>>, vector<1x16x1x1x8xbf16>
      %138 = vector.shape_cast %137 : vector<1x16x1x1x8xbf16> to vector<16x8xbf16>
      %cst_122 = arith.constant dense<0.000000e+00> : vector<16x16xf32>
      %139 = tpu.matmul %136, %138, %cst_122 {dimension_numbers = #tpu.dot_dimension_numbers<[1], [1], [0], [0], [0, 0, 1, 0], [], []>} : vector<16x8xbf16>, vector<16x8xbf16>, vector<16x16xf32> -> vector<16x16xf32>
      %cst_123 = arith.constant -1.000000e+30 : f32
      %140 = vector.broadcast %cst_123 : f32 to vector<16x16xf32>
      %141 = arith.select %11, %139, %140 : vector<16x16xi1>, vector<16x16xf32>
      %c3_124 = arith.constant 3 : index
      %c0_125 = arith.constant 0 : index
      %c0_126 = arith.constant 0 : index
      %142 = vector.load %arg7[%c3_124, %c0_125, %c0_126] : memref<4x16x1xf32, #tpu.memory_space<vmem>>, vector<1x16x1xf32>
      %143 = vector.shape_cast %142 : vector<1x16x1xf32> to vector<16x1xf32>
      %cst_127 = arith.constant dense<0xFF800000> : vector<16xf32>
      %144 = vector.multi_reduction <maximumf>, %141, %cst_127 [1] : vector<16x16xf32> to vector<16xf32>
      %145 = vector.shape_cast %144 : vector<16xf32> to vector<16x1xf32>
      %146 = arith.maximumf %143, %145 : vector<16x1xf32>
      %147 = arith.subf %143, %146 : vector<16x1xf32>
      %148 = math.exp %147 : vector<16x1xf32>
      %149 = vector.broadcast %146 : vector<16x1xf32> to vector<16x16xf32>
      %150 = arith.subf %141, %149 : vector<16x16xf32>
      %151 = math.exp %150 : vector<16x16xf32>
      %c3_128 = arith.constant 3 : index
      %c0_129 = arith.constant 0 : index
      %c0_130 = arith.constant 0 : index
      %152 = vector.load %arg8[%c3_128, %c0_129, %c0_130] : memref<4x16x1xf32, #tpu.memory_space<vmem>>, vector<1x16x1xf32>
      %153 = vector.shape_cast %152 : vector<1x16x1xf32> to vector<16x1xf32>
      %154 = arith.mulf %148, %153 : vector<16x1xf32>
      %cst_131 = arith.constant dense<0.000000e+00> : vector<16xf32>
      %155 = vector.multi_reduction <add>, %151, %cst_131 [1] : vector<16x16xf32> to vector<16xf32>
      %156 = vector.shape_cast %155 : vector<16xf32> to vector<16x1xf32>
      %157 = arith.addf %154, %156 : vector<16x1xf32>
      %c3_132 = arith.constant 3 : index
      %c0_133 = arith.constant 0 : index
      %c0_134 = arith.constant 0 : index
      %158 = vector.load %arg8[%c3_132, %c0_133, %c0_134] : memref<4x16x1xf32, #tpu.memory_space<vmem>>, vector<1x16x1xf32>
      %159 = vector.shape_cast %158 : vector<1x16x1xf32> to vector<16x1xf32>
      %160 = vector.shape_cast %157 : vector<16x1xf32> to vector<1x16x1xf32>
      tpu.vector_store %arg8[%c3_132, %c0_133, %c0_134], %160 {strides = array<i32>} : memref<4x16x1xf32, #tpu.memory_space<vmem>>, vector<1x16x1xf32>,
      %c3_135 = arith.constant 3 : index
      %c0_136 = arith.constant 0 : index
      %c0_137 = arith.constant 0 : index
      %161 = vector.load %arg9[%c3_135, %c0_136, %c0_137] : memref<4x16x8xf32, #tpu.memory_space<vmem>>, vector<1x16x8xf32>
      %162 = vector.shape_cast %161 : vector<1x16x8xf32> to vector<16x8xf32>
      %163 = vector.broadcast %148 : vector<16x1xf32> to vector<16x8xf32>
      %164 = arith.mulf %163, %162 : vector<16x8xf32>
      %165 = arith.truncf %151 : vector<16x16xf32> to vector<16x16xbf16>
      %c0_138 = arith.constant 0 : index
      %c0_139 = arith.constant 0 : index
      %c0_140 = arith.constant 0 : index
      %c3_141 = arith.constant 3 : index
      %c0_142 = arith.constant 0 : index
      %166 = vector.load %arg5[%c0_138, %c0_139, %c0_140, %c3_141, %c0_142] : memref<1x16x1x4x8xbf16, #tpu.memory_space<vmem>>, vector<1x16x1x1x8xbf16>
      %167 = vector.shape_cast %166 : vector<1x16x1x1x8xbf16> to vector<16x8xbf16>
      %cst_143 = arith.constant dense<0.000000e+00> : vector<16x8xf32>
      %168 = tpu.matmul %165, %167, %cst_143 {dimension_numbers = #tpu.dot_dimension_numbers<[1], [0], [0], [1], [0, 0, 1, 1], [], []>} : vector<16x16xbf16>, vector<16x8xbf16>, vector<16x8xf32> -> vector<16x8xf32>
      %169 = arith.addf %164, %168 : vector<16x8xf32>
      %c3_144 = arith.constant 3 : index
      %c0_145 = arith.constant 0 : index
      %c0_146 = arith.constant 0 : index
      %170 = vector.load %arg9[%c3_144, %c0_145, %c0_146] : memref<4x16x8xf32, #tpu.memory_space<vmem>>, vector<1x16x8xf32>
      %171 = vector.shape_cast %170 : vector<1x16x8xf32> to vector<16x8xf32>
      %172 = vector.shape_cast %169 : vector<16x8xf32> to vector<1x16x8xf32>
      tpu.vector_store %arg9[%c3_144, %c0_145, %c0_146], %172 {strides = array<i32>} : memref<4x16x8xf32, #tpu.memory_space<vmem>>, vector<1x16x8xf32>,
      %c3_147 = arith.constant 3 : index
      %c0_148 = arith.constant 0 : index
      %c0_149 = arith.constant 0 : index
      %173 = vector.load %arg7[%c3_147, %c0_148, %c0_149] : memref<4x16x1xf32, #tpu.memory_space<vmem>>, vector<1x16x1xf32>
      %174 = vector.shape_cast %173 : vector<1x16x1xf32> to vector<16x1xf32>
      %175 = vector.shape_cast %146 : vector<16x1xf32> to vector<1x16x1xf32>
      tpu.vector_store %arg7[%c3_147, %c0_148, %c0_149], %175 {strides = array<i32>} : memref<4x16x1xf32, #tpu.memory_space<vmem>>, vector<1x16x1xf32>,
      %c0_150 = arith.constant 0 : index
      %c0_151 = arith.constant 0 : index
      %c0_152 = arith.constant 0 : index
      %176 = vector.load %arg8[%c0_150, %c0_151, %c0_152] : memref<4x16x1xf32, #tpu.memory_space<vmem>>, vector<1x16x1xf32>
      %177 = vector.shape_cast %176 : vector<1x16x1xf32> to vector<16x1xf32>
      %178 = tpu.reciprocal %177 {approx = true} : vector<16x1xf32> -> vector<16x1xf32>
      %c0_153 = arith.constant 0 : index
      %c0_154 = arith.constant 0 : index
      %c0_155 = arith.constant 0 : index
      %179 = vector.load %arg9[%c0_153, %c0_154, %c0_155] : memref<4x16x8xf32, #tpu.memory_space<vmem>>, vector<1x16x8xf32>
      %180 = vector.shape_cast %179 : vector<1x16x8xf32> to vector<16x8xf32>
      %181 = vector.broadcast %178 : vector<16x1xf32> to vector<16x8xf32>
      %182 = arith.mulf %180, %181 : vector<16x8xf32>
      %183 = arith.truncf %182 : vector<16x8xf32> to vector<16x8xbf16>
      %c0_156 = arith.constant 0 : index
      %c0_157 = arith.constant 0 : index
      %c0_158 = arith.constant 0 : index
      %c0_159 = arith.constant 0 : index
      %184 = vector.load %arg6[%c0_156, %c0_157, %c0_158, %c0_159] : memref<1x16x4x8xbf16, #tpu.memory_space<vmem>>, vector<1x16x1x8xbf16>
      %185 = vector.shape_cast %184 : vector<1x16x1x8xbf16> to vector<16x8xbf16>
      %186 = vector.shape_cast %183 : vector<16x8xbf16> to vector<1x16x1x8xbf16>
      tpu.vector_store %arg6[%c0_156, %c0_157, %c0_158, %c0_159], %186 {strides = array<i32>} : memref<1x16x4x8xbf16, #tpu.memory_space<vmem>>, vector<1x16x1x8xbf16>,
      %c1_160 = arith.constant 1 : index
      %c0_161 = arith.constant 0 : index
      %c0_162 = arith.constant 0 : index
      %187 = vector.load %arg8[%c1_160, %c0_161, %c0_162] : memref<4x16x1xf32, #tpu.memory_space<vmem>>, vector<1x16x1xf32>
      %188 = vector.shape_cast %187 : vector<1x16x1xf32> to vector<16x1xf32>
      %189 = tpu.reciprocal %188 {approx = true} : vector<16x1xf32> -> vector<16x1xf32>
      %c1_163 = arith.constant 1 : index
      %c0_164 = arith.constant 0 : index
      %c0_165 = arith.constant 0 : index
      %190 = vector.load %arg9[%c1_163, %c0_164, %c0_165] : memref<4x16x8xf32, #tpu.memory_space<vmem>>, vector<1x16x8xf32>
      %191 = vector.shape_cast %190 : vector<1x16x8xf32> to vector<16x8xf32>
      %192 = vector.broadcast %189 : vector<16x1xf32> to vector<16x8xf32>
      %193 = arith.mulf %191, %192 : vector<16x8xf32>
      %194 = arith.truncf %193 : vector<16x8xf32> to vector<16x8xbf16>
      %c0_166 = arith.constant 0 : index
      %c0_167 = arith.constant 0 : index
      %c1_168 = arith.constant 1 : index
      %c0_169 = arith.constant 0 : index
      %195 = vector.load %arg6[%c0_166, %c0_167, %c1_168, %c0_169] : memref<1x16x4x8xbf16, #tpu.memory_space<vmem>>, vector<1x16x1x8xbf16>
      %196 = vector.shape_cast %195 : vector<1x16x1x8xbf16> to vector<16x8xbf16>
      %197 = vector.shape_cast %194 : vector<16x8xbf16> to vector<1x16x1x8xbf16>
      tpu.vector_store %arg6[%c0_166, %c0_167, %c1_168, %c0_169], %197 {strides = array<i32>} : memref<1x16x4x8xbf16, #tpu.memory_space<vmem>>, vector<1x16x1x8xbf16>,
      %c2_170 = arith.constant 2 : index
      %c0_171 = arith.constant 0 : index
      %c0_172 = arith.constant 0 : index
      %198 = vector.load %arg8[%c2_170, %c0_171, %c0_172] : memref<4x16x1xf32, #tpu.memory_space<vmem>>, vector<1x16x1xf32>
      %199 = vector.shape_cast %198 : vector<1x16x1xf32> to vector<16x1xf32>
      %200 = tpu.reciprocal %199 {approx = true} : vector<16x1xf32> -> vector<16x1xf32>
      %c2_173 = arith.constant 2 : index
      %c0_174 = arith.constant 0 : index
      %c0_175 = arith.constant 0 : index
      %201 = vector.load %arg9[%c2_173, %c0_174, %c0_175] : memref<4x16x8xf32, #tpu.memory_space<vmem>>, vector<1x16x8xf32>
      %202 = vector.shape_cast %201 : vector<1x16x8xf32> to vector<16x8xf32>
      %203 = vector.broadcast %200 : vector<16x1xf32> to vector<16x8xf32>
      %204 = arith.mulf %202, %203 : vector<16x8xf32>
      %205 = arith.truncf %204 : vector<16x8xf32> to vector<16x8xbf16>
      %c0_176 = arith.constant 0 : index
      %c0_177 = arith.constant 0 : index
      %c2_178 = arith.constant 2 : index
      %c0_179 = arith.constant 0 : index
      %206 = vector.load %arg6[%c0_176, %c0_177, %c2_178, %c0_179] : memref<1x16x4x8xbf16, #tpu.memory_space<vmem>>, vector<1x16x1x8xbf16>
      %207 = vector.shape_cast %206 : vector<1x16x1x8xbf16> to vector<16x8xbf16>
      %208 = vector.shape_cast %205 : vector<16x8xbf16> to vector<1x16x1x8xbf16>
      tpu.vector_store %arg6[%c0_176, %c0_177, %c2_178, %c0_179], %208 {strides = array<i32>} : memref<1x16x4x8xbf16, #tpu.memory_space<vmem>>, vector<1x16x1x8xbf16>,
      %c3_180 = arith.constant 3 : index
      %c0_181 = arith.constant 0 : index
      %c0_182 = arith.constant 0 : index
      %209 = vector.load %arg8[%c3_180, %c0_181, %c0_182] : memref<4x16x1xf32, #tpu.memory_space<vmem>>, vector<1x16x1xf32>
      %210 = vector.shape_cast %209 : vector<1x16x1xf32> to vector<16x1xf32>
      %211 = tpu.reciprocal %210 {approx = true} : vector<16x1xf32> -> vector<16x1xf32>
      %c3_183 = arith.constant 3 : index
      %c0_184 = arith.constant 0 : index
      %c0_185 = arith.constant 0 : index
      %212 = vector.load %arg9[%c3_183, %c0_184, %c0_185] : memref<4x16x8xf32, #tpu.memory_space<vmem>>, vector<1x16x8xf32>
      %213 = vector.shape_cast %212 : vector<1x16x8xf32> to vector<16x8xf32>
      %214 = vector.broadcast %211 : vector<16x1xf32> to vector<16x8xf32>
      %215 = arith.mulf %213, %214 : vector<16x8xf32>
      %216 = arith.truncf %215 : vector<16x8xf32> to vector<16x8xbf16>
      %c0_186 = arith.constant 0 : index
      %c0_187 = arith.constant 0 : index
      %c3_188 = arith.constant 3 : index
      %c0_189 = arith.constant 0 : index
      %217 = vector.load %arg6[%c0_186, %c0_187, %c3_188, %c0_189] : memref<1x16x4x8xbf16, #tpu.memory_space<vmem>>, vector<1x16x1x8xbf16>
      %218 = vector.shape_cast %217 : vector<1x16x1x8xbf16> to vector<16x8xbf16>
      %219 = vector.shape_cast %216 : vector<16x8xbf16> to vector<1x16x1x8xbf16>
      tpu.vector_store %arg6[%c0_186, %c0_187, %c3_188, %c0_189], %219 {strides = array<i32>} : memref<1x16x4x8xbf16, #tpu.memory_space<vmem>>, vector<1x16x1x8xbf16>,
    } else {
    }
    return
  }
  func.func @transform_0(%arg0: i32, %arg1: i32, %arg2: i32) -> (i32, i32, i32, i32, i32) {
    %c0_i32 = arith.constant 0 : i32
    %c0_i32_0 = arith.constant 0 : i32
    %c0_i32_1 = arith.constant 0 : i32
    %c0_i32_2 = arith.constant 0 : i32
    return %arg0, %arg1, %c0_i32, %c0_i32_0, %c0_i32_1 : i32, i32, i32, i32, i32
  }
  func.func @transform_1(%arg0: i32, %arg1: i32, %arg2: i32) -> (i32, i32, i32, i32, i32) {
    %0 = arith.minsi %arg2, %arg1 : i32
    %c1_i32 = arith.constant 1 : i32
    %c0_i32 = arith.constant 0 : i32
    %c0_i32_0 = arith.constant 0 : i32
    %c0_i32_1 = arith.constant 0 : i32
    return %arg0, %0, %c1_i32, %c0_i32, %c0_i32_0 : i32, i32, i32, i32, i32
  }
  func.func @transform_2(%arg0: i32, %arg1: i32, %arg2: i32) -> (i32, i32, i32, i32, i32) {
    %0 = arith.minsi %arg2, %arg1 : i32
    %c2_i32 = arith.constant 2 : i32
    %c0_i32 = arith.constant 0 : i32
    %c0_i32_0 = arith.constant 0 : i32
    %c0_i32_1 = arith.constant 0 : i32
    return %arg0, %0, %c2_i32, %c0_i32, %c0_i32_0 : i32, i32, i32, i32, i32
  }
  func.func @transform_3(%arg0: i32, %arg1: i32, %arg2: i32) -> (i32, i32, i32, i32) {
    %c0_i32 = arith.constant 0 : i32
    %c0_i32_0 = arith.constant 0 : i32
    %c0_i32_1 = arith.constant 0 : i32
    return %arg0, %arg1, %c0_i32, %c0_i32_0 : i32, i32, i32, i32
  }
}

module attributes {stable_mosaic.version = 11 : i64} {
  func.func @_matmul_kernel(%arg0: i32, %arg1: i32, %arg2: i32, %arg3: memref<16x128xbf16, #tpu.memory_space<vmem>>, %arg4: memref<128x128xbf16, #tpu.memory_space<vmem>>, %arg5: memref<16x128xbf16, #tpu.memory_space<vmem>>, %arg6: memref<16x128xbf16, #tpu.memory_space<vmem>>, %arg7: memref<16x128xf32, #tpu.memory_space<vmem>>) attributes {dimension_semantics = [#tpu.dimension_semantics<parallel>, #tpu.dimension_semantics<parallel>, #tpu.dimension_semantics<arbitrary>], iteration_bounds = array<i64: 1, 1, 1>, scalar_prefetch = 0 : i64, scratch_operands = 1 : i64, tpu.core_type = #tpu.core_type<tc>, window_params = [{transform_indices = @transform_0, window_bounds = array<i64: 16, 128>}, {transform_indices = @transform_1, window_bounds = array<i64: 128, 128>}, {transform_indices = @transform_2, window_bounds = array<i64: 16, 128>}, {transform_indices = @transform_3, window_bounds = array<i64: 16, 128>}]} {
    %c0_i32 = arith.constant 0 : i32
    %0 = arith.cmpi eq, %arg2, %c0_i32 : i32
    %1 = arith.extui %0 : i1 to i32
    %c0_i32_0 = arith.constant 0 : i32
    %2 = arith.cmpi ne, %1, %c0_i32_0 : i32
    scf.if %2 {
      %cst_10 = arith.constant 0.000000e+00 : f32
      %12 = vector.broadcast %cst_10 : f32 to vector<16x128xf32>
      %c0_11 = arith.constant 0 : index
      %c0_12 = arith.constant 0 : index
      %13 = vector.load %arg7[%c0_11, %c0_12] : memref<16x128xf32, #tpu.memory_space<vmem>>, vector<16x128xf32>
      tpu.vector_store %arg7[%c0_11, %c0_12], %12 {strides = array<i32>} : memref<16x128xf32, #tpu.memory_space<vmem>>, vector<16x128xf32>,
    } else {
    }
    %c0 = arith.constant 0 : index
    %c0_1 = arith.constant 0 : index
    %3 = vector.load %arg7[%c0, %c0_1] : memref<16x128xf32, #tpu.memory_space<vmem>>, vector<16x128xf32>
    %c0_2 = arith.constant 0 : index
    %c0_3 = arith.constant 0 : index
    %4 = vector.load %arg3[%c0_2, %c0_3] : memref<16x128xbf16, #tpu.memory_space<vmem>>, vector<16x128xbf16>
    %c0_4 = arith.constant 0 : index
    %c0_5 = arith.constant 0 : index
    %5 = vector.load %arg4[%c0_4, %c0_5] : memref<128x128xbf16, #tpu.memory_space<vmem>>, vector<128x128xbf16>
    %cst = arith.constant dense<0.000000e+00> : vector<16x128xf32>
    %6 = tpu.matmul %4, %5, %cst {dimension_numbers = #tpu.dot_dimension_numbers<[1], [0], [0], [1], [0, 0, 1, 1], [], []>} : vector<16x128xbf16>, vector<128x128xbf16>, vector<16x128xf32> -> vector<16x128xf32>
    %7 = arith.addf %3, %6 : vector<16x128xf32>
    %c0_6 = arith.constant 0 : index
    %c0_7 = arith.constant 0 : index
    %8 = vector.load %arg7[%c0_6, %c0_7] : memref<16x128xf32, #tpu.memory_space<vmem>>, vector<16x128xf32>
    tpu.vector_store %arg7[%c0_6, %c0_7], %7 {strides = array<i32>} : memref<16x128xf32, #tpu.memory_space<vmem>>, vector<16x128xf32>,
    %c0_i32_8 = arith.constant 0 : i32
    %9 = arith.cmpi eq, %arg2, %c0_i32_8 : i32
    %10 = arith.extui %9 : i1 to i32
    %c0_i32_9 = arith.constant 0 : i32
    %11 = arith.cmpi ne, %10, %c0_i32_9 : i32
    scf.if %11 {
      %c0_10 = arith.constant 0 : index
      %c0_11 = arith.constant 0 : index
      %12 = vector.load %arg7[%c0_10, %c0_11] : memref<16x128xf32, #tpu.memory_space<vmem>>, vector<16x128xf32>
      %c0_12 = arith.constant 0 : index
      %c0_13 = arith.constant 0 : index
      %13 = vector.load %arg5[%c0_12, %c0_13] : memref<16x128xbf16, #tpu.memory_space<vmem>>, vector<16x128xbf16>
      %14 = arith.extf %13 : vector<16x128xbf16> to vector<16x128xf32>
      %15 = arith.addf %12, %14 : vector<16x128xf32>
      %16 = arith.truncf %15 : vector<16x128xf32> to vector<16x128xbf16>
      %c0_14 = arith.constant 0 : index
      %c0_15 = arith.constant 0 : index
      %17 = vector.load %arg6[%c0_14, %c0_15] : memref<16x128xbf16, #tpu.memory_space<vmem>>, vector<16x128xbf16>
      tpu.vector_store %arg6[%c0_14, %c0_15], %16 {strides = array<i32>} : memref<16x128xbf16, #tpu.memory_space<vmem>>, vector<16x128xbf16>,
    } else {
    }
    return
  }
  func.func @transform_0(%arg0: i32, %arg1: i32, %arg2: i32) -> (i32, i32) {
    %c0_i32 = arith.constant 0 : i32
    return %arg0, %arg2 : i32, i32
  }
  func.func @transform_1(%arg0: i32, %arg1: i32, %arg2: i32) -> (i32, i32) {
    %c0_i32 = arith.constant 0 : i32
    return %arg2, %arg1 : i32, i32
  }
  func.func @transform_2(%arg0: i32, %arg1: i32, %arg2: i32) -> (i32, i32) {
    %c0_i32 = arith.constant 0 : i32
    return %arg0, %arg1 : i32, i32
  }
  func.func @transform_3(%arg0: i32, %arg1: i32, %arg2: i32) -> (i32, i32) {
    %c0_i32 = arith.constant 0 : i32
    return %arg0, %arg1 : i32, i32
  }
}

module attributes {stable_mosaic.version = 11 : i64} {
  func.func @_matmul_kernel(%arg0: i32, %arg1: i32, %arg2: i32, %arg3: memref<16x128xbf16, #tpu.memory_space<vmem>>, %arg4: memref<128x128xbf16, #tpu.memory_space<vmem>>, %arg5: memref<16x128xbf16, #tpu.memory_space<vmem>>, %arg6: memref<16x128xf32, #tpu.memory_space<vmem>>) attributes {dimension_semantics = [#tpu.dimension_semantics<parallel>, #tpu.dimension_semantics<parallel>, #tpu.dimension_semantics<arbitrary>], iteration_bounds = array<i64: 1, 1, 1>, scalar_prefetch = 0 : i64, scratch_operands = 1 : i64, tpu.core_type = #tpu.core_type<tc>, window_params = [{transform_indices = @transform_0, window_bounds = array<i64: 16, 128>}, {transform_indices = @transform_1, window_bounds = array<i64: 128, 128>}, {transform_indices = @transform_2, window_bounds = array<i64: 16, 128>}]} {
    %c0_i32 = arith.constant 0 : i32
    %0 = arith.cmpi eq, %arg2, %c0_i32 : i32
    %1 = arith.extui %0 : i1 to i32
    %c0_i32_0 = arith.constant 0 : i32
    %2 = arith.cmpi ne, %1, %c0_i32_0 : i32
    scf.if %2 {
      %cst_10 = arith.constant 0.000000e+00 : f32
      %12 = vector.broadcast %cst_10 : f32 to vector<16x128xf32>
      %c0_11 = arith.constant 0 : index
      %c0_12 = arith.constant 0 : index
      %13 = vector.load %arg6[%c0_11, %c0_12] : memref<16x128xf32, #tpu.memory_space<vmem>>, vector<16x128xf32>
      tpu.vector_store %arg6[%c0_11, %c0_12], %12 {strides = array<i32>} : memref<16x128xf32, #tpu.memory_space<vmem>>, vector<16x128xf32>,
    } else {
    }
    %c0 = arith.constant 0 : index
    %c0_1 = arith.constant 0 : index
    %3 = vector.load %arg6[%c0, %c0_1] : memref<16x128xf32, #tpu.memory_space<vmem>>, vector<16x128xf32>
    %c0_2 = arith.constant 0 : index
    %c0_3 = arith.constant 0 : index
    %4 = vector.load %arg3[%c0_2, %c0_3] : memref<16x128xbf16, #tpu.memory_space<vmem>>, vector<16x128xbf16>
    %c0_4 = arith.constant 0 : index
    %c0_5 = arith.constant 0 : index
    %5 = vector.load %arg4[%c0_4, %c0_5] : memref<128x128xbf16, #tpu.memory_space<vmem>>, vector<128x128xbf16>
    %cst = arith.constant dense<0.000000e+00> : vector<16x128xf32>
    %6 = tpu.matmul %4, %5, %cst {dimension_numbers = #tpu.dot_dimension_numbers<[1], [0], [0], [1], [0, 0, 1, 1], [], []>} : vector<16x128xbf16>, vector<128x128xbf16>, vector<16x128xf32> -> vector<16x128xf32>
    %7 = arith.addf %3, %6 : vector<16x128xf32>
    %c0_6 = arith.constant 0 : index
    %c0_7 = arith.constant 0 : index
    %8 = vector.load %arg6[%c0_6, %c0_7] : memref<16x128xf32, #tpu.memory_space<vmem>>, vector<16x128xf32>
    tpu.vector_store %arg6[%c0_6, %c0_7], %7 {strides = array<i32>} : memref<16x128xf32, #tpu.memory_space<vmem>>, vector<16x128xf32>,
    %c0_i32_8 = arith.constant 0 : i32
    %9 = arith.cmpi eq, %arg2, %c0_i32_8 : i32
    %10 = arith.extui %9 : i1 to i32
    %c0_i32_9 = arith.constant 0 : i32
    %11 = arith.cmpi ne, %10, %c0_i32_9 : i32
    scf.if %11 {
      %c0_10 = arith.constant 0 : index
      %c0_11 = arith.constant 0 : index
      %12 = vector.load %arg6[%c0_10, %c0_11] : memref<16x128xf32, #tpu.memory_space<vmem>>, vector<16x128xf32>
      %13 = arith.mulf %12, %12 : vector<16x128xf32>
      %14 = arith.mulf %12, %13 : vector<16x128xf32>
      %cst_12 = arith.constant 4.471500e-02 : f32
      %15 = vector.broadcast %cst_12 : f32 to vector<16x128xf32>
      %16 = arith.mulf %15, %14 : vector<16x128xf32>
      %17 = arith.addf %12, %16 : vector<16x128xf32>
      %cst_13 = arith.constant 0.797884583 : f32
      %18 = vector.broadcast %cst_13 : f32 to vector<16x128xf32>
      %19 = arith.mulf %18, %17 : vector<16x128xf32>
      %20 = math.tanh %19 : vector<16x128xf32>
      %cst_14 = arith.constant 1.000000e+00 : f32
      %21 = vector.broadcast %cst_14 : f32 to vector<16x128xf32>
      %22 = arith.addf %21, %20 : vector<16x128xf32>
      %cst_15 = arith.constant 5.000000e-01 : f32
      %23 = vector.broadcast %cst_15 : f32 to vector<16x128xf32>
      %24 = arith.mulf %23, %22 : vector<16x128xf32>
      %25 = arith.mulf %12, %24 : vector<16x128xf32>
      %26 = arith.truncf %25 : vector<16x128xf32> to vector<16x128xbf16>
      %c0_16 = arith.constant 0 : index
      %c0_17 = arith.constant 0 : index
      %27 = vector.load %arg5[%c0_16, %c0_17] : memref<16x128xbf16, #tpu.memory_space<vmem>>, vector<16x128xbf16>
      tpu.vector_store %arg5[%c0_16, %c0_17], %26 {strides = array<i32>} : memref<16x128xbf16, #tpu.memory_space<vmem>>, vector<16x128xbf16>,
    } else {
    }
    return
  }
  func.func @transform_0(%arg0: i32, %arg1: i32, %arg2: i32) -> (i32, i32) {
    %c0_i32 = arith.constant 0 : i32
    return %arg0, %arg2 : i32, i32
  }
  func.func @transform_1(%arg0: i32, %arg1: i32, %arg2: i32) -> (i32, i32) {
    %c0_i32 = arith.constant 0 : i32
    return %arg2, %arg1 : i32, i32
  }
  func.func @transform_2(%arg0: i32, %arg1: i32, %arg2: i32) -> (i32, i32) {
    %c0_i32 = arith.constant 0 : i32
    return %arg0, %arg1 : i32, i32
  }
}

</mosaic_0001>

<bundles_post_ra>
// kernel: transformer_lm_forward.16
= control target key start
LH: loop header
LB: loop body
LE: loop exit
PB: predicated region body
PF: predicated region fallthrough
CT: control target
= control target key end

     0   :  { %vm17_vm0 = vcmask 261120   ;;  %vm50_vm1 = vcmask 257024   ;;  %s97_s0 = inlined_call_operand.vmem [shape: bf16[16,32], index: 0, kind: input, shape index: {}]   ;;  %s98_s1 = inlined_call_operand.vmem [shape: f32[1,32], index: 1, kind: input, shape index: {}]   ;;  %s99_s2 = inlined_call_operand.vmem [shape: bf16[16,32], index: 2, kind: output, shape index: {}]  }
   0x1   :  { %v63_v0 = vld [vmem:[%s97_s0] sm:$0xff]  }
   0x2   :  { %v64_v1 = vunpack.c.l.bf16 %v63_v0  ;;  %v65_v2 = vunpack.c.h.bf16 %v63_v0  ;;  %v57_v14 = vld [vmem:[%s98_s1] ss:$0 sm:$0xff] }
   0x4   :  { %v15_v3 = vmul.f32 %v64_v1, %v64_v1  ;;  %v16_v4 = vmul.f32 %v65_v2, %v65_v2 }
   0x6   :  { %v18_v5 = vsel %vm17_vm0, %v15_v3, 0.0  ;;  %v21_v6 = vsel %vm17_vm0, %v16_v4, 0.0 }
   0x7   :  { %19 = vadd.xlane.f32.xlu0 %v18_v5 }
   0xb   :  { %22 = vadd.xlane.f32.xlu0 %v21_v6 }
  0x94   :  { %v20_v7 = vpop.xlane.xlu0 %19 }
  0x95   :  { %v25_v8 = vmul.f32 0.03125, %v20_v7 }
  0x97   :  { %v27_v9 = vadd.f32 1e-05, %v25_v8 }
  0x98   :  { %v23_v10 = vpop.xlane.xlu0 %22 }
  0x99   :  { %66 = vrsqrt.f32 %v27_v9  ;;  %v26_v11 = vmul.f32 0.03125, %v23_v10 }
  0x9b   :  { %v28_v12 = vadd.f32 1e-05, %v26_v11 }
  0x9d   :  { %68 = vrsqrt.f32 %v28_v12 }
  0xa3   :  { %v67_v13 = vpop.eup %66 }
  0xa4   :  { %v31_v15 = vmul.f32 %v67_v13, %v64_v1 }
  0xa6   :  { %v40_v16 = vmul.f32 %v57_v14, %v31_v15 }
  0xa7   :  { %v69_v17 = vpop.eup %68 }
  0xa8   :  { %v60_v18 = vpack.c.bf16 %v40_v16, %v40_v16  ;;  %v32_v19 = vmul.f32 %v69_v17, %v65_v2 }
  0xaa   :  { %51 = vst.msk [vmem:[%s99_s2] sm:$0xf] %vm50_vm1, %v60_v18  ;;  %v41_v20 = vmul.f32 %v57_v14, %v32_v19 }
  0xac   :  { %v61_v21 = vpack.c.bf16 %v41_v20, %v41_v20 }
  0xae   :  { %52 = vst.msk [vmem:[%s99_s2 + $0x4] sm:$0xf] %vm50_vm1, %v61_v21 }

// kernel: transformer_lm_forward.17
= control target key start
LH: loop header
LB: loop body
LE: loop exit
PB: predicated region body
PF: predicated region fallthrough
CT: control target
= control target key end

     0   :  { %v214_v0 = vmov 0.0   ;;  %vm215_vm0 = vmmov 0   ;;  %s261_s1 = inlined_call_operand.vmem [shape: bf16[128,128], index: 1, kind: input, shape index: {}]   ;;  %s262_s0 = inlined_call_operand.vmem [shape: bf16[16,128], index: 0, kind: input, shape index: {}]   ;;  %s263_s2 = inlined_call_operand.vmem [shape: bf16[16,128], index: 2, kind: output, shape index: {}]  }
   0x1   :  { %183 = vmatprep.subr.bf16.mxu0 %v214_v0  ;;  %v205_v1 = vld [vmem:[%s261_s1] sm:$0xff]   ;;  %199 = vmatprep.mubr.msk.bf16.mxu0 %vm215_vm0, %v214_v0  ;;  %v206_v2 = vld [vmem:[%s261_s1 + $0x8] sm:$0xff]   ;;  %v207_v3 = vld [vmem:[%s261_s1 + $0x10] sm:$0xff]  }
   0x2   :  { %184 = vmatpush3.bf16.msra.mxu0 %v205_v1  ;;  %v208_v4 = vld [vmem:[%s261_s1 + $0x18] sm:$0xff]   ;;  %v209_v5 = vld [vmem:[%s261_s1 + $0x20] sm:$0xff]   ;;  %v210_v6 = vld [vmem:[%s261_s1 + $0x28] sm:$0xff]  }
   0x3   :  { %185 = vmatprep.subr.bf16.mxu0 %v214_v0  ;;  %v211_v7 = vld [vmem:[%s261_s1 + $0x30] sm:$0xff]   ;;  %v212_v8 = vld [vmem:[%s261_s1 + $0x38] sm:$0xff]   ;;  %v213_v9 = vld [vmem:[%s262_s0] sm:$0xff]  }
   0x6   :  { %186 = vmatpush3.bf16.msra.mxu0 %v206_v2 }
   0x7   :  { %187 = vmatprep.subr.bf16.mxu0 %v214_v0 }
   0xa   :  { %188 = vmatpush3.bf16.msra.mxu0 %v207_v3 }
   0xb   :  { %189 = vmatprep.subr.bf16.mxu0 %v214_v0 }
   0xe   :  { %190 = vmatpush3.bf16.msra.mxu0 %v208_v4 }
   0xf   :  { %191 = vmatprep.subr.bf16.mxu0 %v214_v0 }
  0x12   :  { %192 = vmatpush3.bf16.msra.mxu0 %v209_v5 }
  0x13   :  { %193 = vmatprep.subr.bf16.mxu0 %v214_v0 }
  0x16   :  { %194 = vmatpush3.bf16.msra.mxu0 %v210_v6 }
  0x17   :  { %195 = vmatprep.subr.bf16.mxu0 %v214_v0 }
  0x1a   :  { %196 = vmatpush3.bf16.msra.mxu0 %v211_v7 }
  0x1b   :  { %197 = vmatprep.subr.bf16.mxu0 %v214_v0 }
  0x1e   :  { %198 = vmatpush3.bf16.msra.mxu0 %v212_v8 }
  0x21   :  { %200 = vmatmul.mubr.bf16.vlgmr.msra.gmra.mrb[0].mxu0 %v213_v9 }
  0xf4   :  { %v126_v10 = vpop.f32.mrb[0].mxu0 }
  0xf5   :  { %v201_v11 = vpop.f32.mrb[1].mxu0 }
  0xf6   :  { %v129_v12 = vpop.f32.mrb[2].mxu0 }
  0xf7   :  { %v172_v13 = vpack.c.bf16 %v129_v12, %v126_v10  ;;  %v202_v14 = vpop.f32.mrb[3].mxu0 }
  0xf9   :  { %173 = vst [vmem:[%s263_s2] sm:$0xff] %v172_v13  }

// kernel: transformer_lm_forward.19
= control target key start
LH: loop header
LB: loop body
LE: loop exit
PB: predicated region body
PF: predicated region fallthrough
CT: control target
= control target key end

     0   :  { %v227_v0 = vmov 0.0   ;;  %vm228_vm0 = vmmov 0   ;;  %s282_s1 = inlined_call_operand.vmem [shape: bf16[128,128], index: 1, kind: input, shape index: {}]   ;;  %s283_s0 = inlined_call_operand.vmem [shape: bf16[16,128], index: 0, kind: input, shape index: {}]   ;;  %s284_s2 = inlined_call_operand.vmem [shape: bf16[16,128], index: 2, kind: input, shape index: {}]   ;;  %s285_s3 = inlined_call_operand.vmem [shape: bf16[16,128], index: 3, kind: output, shape index: {}]  }
   0x1   :  { %196 = vmatprep.subr.bf16.mxu0 %v227_v0  ;;  %v218_v1 = vld [vmem:[%s282_s1] sm:$0xff]   ;;  %212 = vmatprep.mubr.msk.bf16.mxu0 %vm228_vm0, %v227_v0  ;;  %v219_v2 = vld [vmem:[%s282_s1 + $0x8] sm:$0xff]   ;;  %v220_v3 = vld [vmem:[%s282_s1 + $0x10] sm:$0xff]  }
   0x2   :  { %197 = vmatpush3.bf16.msra.mxu0 %v218_v1  ;;  %v221_v4 = vld [vmem:[%s282_s1 + $0x18] sm:$0xff]   ;;  %v222_v5 = vld [vmem:[%s282_s1 + $0x20] sm:$0xff]   ;;  %v223_v6 = vld [vmem:[%s282_s1 + $0x28] sm:$0xff]  }
   0x3   :  { %198 = vmatprep.subr.bf16.mxu0 %v227_v0  ;;  %v224_v7 = vld [vmem:[%s282_s1 + $0x30] sm:$0xff]   ;;  %v225_v8 = vld [vmem:[%s282_s1 + $0x38] sm:$0xff]   ;;  %v226_v9 = vld [vmem:[%s283_s0] sm:$0xff]  }
   0x4   :  { %v179_v10 = vld [vmem:[%s284_s2] sm:$0xff]  }
   0x5   :  { %v180_v11 = vunpack.c.l.bf16 %v179_v10  ;;  %v181_v12 = vunpack.c.h.bf16 %v179_v10 }
   0x6   :  { %199 = vmatpush3.bf16.msra.mxu0 %v219_v2 }
   0x7   :  { %200 = vmatprep.subr.bf16.mxu0 %v227_v0 }
   0xa   :  { %201 = vmatpush3.bf16.msra.mxu0 %v220_v3 }
   0xb   :  { %202 = vmatprep.subr.bf16.mxu0 %v227_v0 }
   0xe   :  { %203 = vmatpush3.bf16.msra.mxu0 %v221_v4 }
   0xf   :  { %204 = vmatprep.subr.bf16.mxu0 %v227_v0 }
  0x12   :  { %205 = vmatpush3.bf16.msra.mxu0 %v222_v5 }
  0x13   :  { %206 = vmatprep.subr.bf16.mxu0 %v227_v0 }
  0x16   :  { %207 = vmatpush3.bf16.msra.mxu0 %v223_v6 }
  0x17   :  { %208 = vmatprep.subr.bf16.mxu0 %v227_v0 }
  0x1a   :  { %209 = vmatpush3.bf16.msra.mxu0 %v224_v7 }
  0x1b   :  { %210 = vmatprep.subr.bf16.mxu0 %v227_v0 }
  0x1e   :  { %211 = vmatpush3.bf16.msra.mxu0 %v225_v8 }
  0x21   :  { %213 = vmatmul.mubr.bf16.vlgmr.msra.gmra.mrb[0].mxu0 %v226_v9 }
  0xf4   :  { %v129_v13 = vpop.f32.mrb[0].mxu0 }
  0xf5   :  { %v214_v14 = vpop.f32.mrb[1].mxu0  ;;  %v149_v16 = vadd.f32 %v180_v11, %v129_v13 }
  0xf6   :  { %v132_v15 = vpop.f32.mrb[2].mxu0 }
  0xf7   :  { %v150_v17 = vadd.f32 %v181_v12, %v132_v15  ;;  %v215_v18 = vpop.f32.mrb[3].mxu0 }
  0xf9   :  { %v185_v19 = vpack.c.bf16 %v150_v17, %v149_v16 }
  0xfb   :  { %186 = vst [vmem:[%s285_s3] sm:$0xff] %v185_v19  }

// kernel: transformer_lm_forward.21
= control target key start
LH: loop header
LB: loop body
LE: loop exit
PB: predicated region body
PF: predicated region fallthrough
CT: control target
= control target key end

     0   :  { %v236_v0 = vmov 0.0   ;;  %vm237_vm0 = vmmov 0   ;;  %s283_s1 = inlined_call_operand.vmem [shape: bf16[128,128], index: 1, kind: input, shape index: {}]   ;;  %s284_s0 = inlined_call_operand.vmem [shape: bf16[16,128], index: 0, kind: input, shape index: {}]   ;;  %s285_s2 = inlined_call_operand.vmem [shape: bf16[16,128], index: 2, kind: output, shape index: {}]  }
   0x1   :  { %201 = vmatprep.subr.bf16.mxu0 %v236_v0  ;;  %v223_v1 = vld [vmem:[%s283_s1] sm:$0xff]   ;;  %217 = vmatprep.mubr.msk.bf16.mxu0 %vm237_vm0, %v236_v0  ;;  %v224_v2 = vld [vmem:[%s283_s1 + $0x8] sm:$0xff]   ;;  %v225_v3 = vld [vmem:[%s283_s1 + $0x10] sm:$0xff]  }
   0x2   :  { %202 = vmatpush3.bf16.msra.mxu0 %v223_v1  ;;  %v226_v4 = vld [vmem:[%s283_s1 + $0x18] sm:$0xff]   ;;  %v227_v5 = vld [vmem:[%s283_s1 + $0x20] sm:$0xff]   ;;  %v228_v6 = vld [vmem:[%s283_s1 + $0x28] sm:$0xff]  }
   0x3   :  { %203 = vmatprep.subr.bf16.mxu0 %v236_v0  ;;  %v229_v7 = vld [vmem:[%s283_s1 + $0x30] sm:$0xff]   ;;  %v230_v8 = vld [vmem:[%s283_s1 + $0x38] sm:$0xff]   ;;  %v231_v9 = vld [vmem:[%s284_s0] sm:$0xff]  }
   0x6   :  { %204 = vmatpush3.bf16.msra.mxu0 %v224_v2 }
   0x7   :  { %205 = vmatprep.subr.bf16.mxu0 %v236_v0 }
   0xa   :  { %206 = vmatpush3.bf16.msra.mxu0 %v225_v3 }
   0xb   :  { %207 = vmatprep.subr.bf16.mxu0 %v236_v0 }
   0xe   :  { %208 = vmatpush3.bf16.msra.mxu0 %v226_v4 }
   0xf   :  { %209 = vmatprep.subr.bf16.mxu0 %v236_v0 }
  0x12   :  { %210 = vmatpush3.bf16.msra.mxu0 %v227_v5 }
  0x13   :  { %211 = vmatprep.subr.bf16.mxu0 %v236_v0 }
  0x16   :  { %212 = vmatpush3.bf16.msra.mxu0 %v228_v6 }
  0x17   :  { %213 = vmatprep.subr.bf16.mxu0 %v236_v0 }
  0x1a   :  { %214 = vmatpush3.bf16.msra.mxu0 %v229_v7 }
  0x1b   :  { %215 = vmatprep.subr.bf16.mxu0 %v236_v0 }
  0x1e   :  { %216 = vmatpush3.bf16.msra.mxu0 %v230_v8 }
  0x21   :  { %218 = vmatmul.mubr.bf16.vlgmr.msra.gmra.mrb[0].mxu0 %v231_v9 }
  0xf4   :  { %v126_v10 = vpop.f32.mrb[0].mxu0 }
  0xf5   :  { %v142_v11 = vmul.f32 %v126_v10, %v126_v10  ;;  %v219_v12 = vpop.f32.mrb[1].mxu0 }
  0xf6   :  { %v129_v13 = vpop.f32.mrb[2].mxu0 }
  0xf7   :  { %v144_v14 = vmul.f32 %v142_v11, %v126_v10  ;;  %v143_v15 = vmul.f32 %v129_v13, %v129_v13  ;;  %v220_v16 = vpop.f32.mrb[3].mxu0 }
  0xf9   :  { %v146_v17 = vmul.f32 0.044715, %v144_v14  ;;  %v145_v18 = vmul.f32 %v143_v15, %v129_v13 }
  0xfb   :  { %v148_v19 = vadd.f32 %v146_v17, %v126_v10  ;;  %v147_v20 = vmul.f32 0.044715, %v145_v18 }
  0xfd   :  { %v150_v21 = vmul.f32 0.7978846, %v148_v19  ;;  %v149_v22 = vadd.f32 %v147_v20, %v129_v13 }
  0xff   :  { %232 = vtanh.f32 %v150_v21  ;;  %v151_v23 = vmul.f32 0.7978846, %v149_v22 }
 0x101   :  { %234 = vtanh.f32 %v151_v23 }
 0x109   :  { %v233_v24 = vpop.eup %232 }
 0x10a   :  { %v154_v25 = vadd.f32 1.0, %v233_v24 }
 0x10b   :  { %v235_v26 = vpop.eup %234 }
 0x10c   :  { %v156_v27 = vmul.f32 0.5, %v154_v25  ;;  %v155_v28 = vadd.f32 1.0, %v235_v26 }
 0x10e   :  { %v157_v29 = vmul.f32 0.5, %v155_v28  ;;  %v158_v30 = vmul.f32 %v156_v27, %v126_v10 }
 0x110   :  { %v159_v31 = vmul.f32 %v157_v29, %v129_v13 }
 0x112   :  { %v190_v32 = vpack.c.bf16 %v159_v31, %v158_v30 }
 0x114   :  { %191 = vst [vmem:[%s285_s2] sm:$0xff] %v190_v32  }

// kernel: transformer_lm_forward.18
= control target key start
LH: loop header
LB: loop body
LE: loop exit
PB: predicated region body
PF: predicated region fallthrough
CT: control target
= control target key end

     0   :  { %s8452_s12 = smov 0   ;;  %s8454_s13 = smov 0   ;;  %s10099_s0 = inlined_call_operand.vmem [shape: bf16[2,16,3,4,8], index: 0, kind: input, shape index: {}, may-alias: {0,1,2}]   ;;  %s10100_s1 = inlined_call_operand.vmem [shape: bf16[2,16,3,4,8], index: 1, kind: input, shape index: {}, may-alias: {0,1,2}]   ;;  %s10101_s2 = inlined_call_operand.vmem [shape: bf16[2,16,3,4,8], index: 2, kind: input, shape index: {}, may-alias: {0,1,2}]   ;;  %s10102_s3 = inlined_call_operand.vmem [shape: bf16[2,16,4,8], index: 3, kind: output, shape index: {}]  }
   0x1   :  { %s8456_s14 = smov 0   ;;  %s8458_s15 = smov 0  }
   0x2   :  { %s8460_s16 = smov 0  }
   0x3 LB: > { %s32_s17 = sadd.s32 1, %s8420_s15  ;;  %p48_p1 = scmp.ne.s32.totalorder %s8412_s13, %s8408_s12  ;;  %s8424_s16 = sphi %s8460_s16, %s13_s16   ;;  %s8420_s15 = sphi %s8458_s15, %s10205_s15   ;;  %s8416_s14 = sphi %s8456_s14, %s10204_s14   ;;  %s8412_s13 = sphi %s8454_s13, %s10203_s13   ;;  %s8408_s12 = sphi %s8452_s12, %s10202_s12  }
   0x4   : > { %p34_p0 = scmp.ge.s32.totalorder %s32_s17, 2  ;;  %p49_p2 = scmp.eq.s32.totalorder %s8424_s16, 0 }
   0x5   : > { %s41_s20 = sadd.s32 1, %s8412_s13  ;;  %p7741_p5 = scmp.ge.s32.totalorder %s8424_s16, 2 }
   0x6   : > { %s10207_s17 = smov (%p34_p0, %s32_s17), 0  ;;  %p8483_p3 = por %p49_p2, %p48_p1 }
   0x7   : > { %s36_s19 = ssub.s32 %s8420_s15, %s10207_s17  ;;  %166 = sbr.rel (%p7741_p5) target bundleno = 59 (0x3b), region = 16 }
   0x8   : > { %p39_p4 = scmp.eq.s32.totalorder %s36_s19, 0 }
   0xa   : > { %s8491_s21 = scalar_select %p39_p4, %s8412_s13, %s41_s20  }
   0xe   : > { %169 = sbr.rel (!%p8483_p3) target bundleno = 29 (0x1d), region = 20  ;;  %s171_s22 = sand.u32 (%p8483_p3), 1, %s8412_s13  }
   0xf   : > { %s8289_s23 = smul.u32 (%p8483_p3), 96, %s8420_s15  ;;  %s7742_s24 = sshll.u32 (%p8483_p3), %s171_s22, 5 }
  0x10   : > { %s173_s28 = scalar_lea.vmem (%p8483_p3), [#allocation5], %s7742_s24 }
  0x11   : > { %s8501_s27 = scalar_lea.vmem (%p8483_p3), %s10099_s0, %s8289_s23 }
  0x12   : > { %v195_v0 = vld [vmem:[%s8501_s27] sm:$0x3] (%p8483_p3)  ;;  %v197_v1 = vld [vmem:[%s8501_s27 + $0x6] sm:$0x3] (%p8483_p3)  ;;  %v199_v2 = vld [vmem:[%s8501_s27 + $0xc] sm:$0x3] (%p8483_p3) }
  0x13   : > { %196 = vst [vmem:[%s173_s28] sm:$0x3] (%p8483_p3), %v195_v0  ;;  %198 = vst [vmem:[%s173_s28 + $0x2] sm:$0x3] (%p8483_p3), %v197_v1  ;;  %v201_v3 = vld [vmem:[%s8501_s27 + $0x12] sm:$0x3] (%p8483_p3) }
  0x14   : > { %200 = vst [vmem:[%s173_s28 + $0x4] sm:$0x3] (%p8483_p3), %v199_v2  ;;  %v203_v4 = vld [vmem:[%s8501_s27 + $0x18] sm:$0x3] (%p8483_p3)  ;;  %v205_v5 = vld [vmem:[%s8501_s27 + $0x1e] sm:$0x3] (%p8483_p3) }
  0x15   : > { %202 = vst [vmem:[%s173_s28 + $0x6] sm:$0x3] %v201_v3  ;;  %204 = vst [vmem:[%s173_s28 + $0x8] sm:$0x3] %v203_v4  ;;  %v207_v6 = vld [vmem:[%s8501_s27 + $0x24] sm:$0x3] }
  0x16   : > { %206 = vst [vmem:[%s173_s28 + $0xa] sm:$0x3] %v205_v5  ;;  %v209_v7 = vld [vmem:[%s8501_s27 + $0x2a] sm:$0x3]  ;;  %v211_v8 = vld [vmem:[%s8501_s27 + $0x30] sm:$0x3] }
  0x17   : > { %208 = vst [vmem:[%s173_s28 + $0xc] sm:$0x3] %v207_v6  ;;  %210 = vst [vmem:[%s173_s28 + $0xe] sm:$0x3] %v209_v7  ;;  %v213_v9 = vld [vmem:[%s8501_s27 + $0x36] sm:$0x3] }
  0x18   : > { %212 = vst [vmem:[%s173_s28 + $0x10] sm:$0x3] %v211_v8  ;;  %v215_v10 = vld [vmem:[%s8501_s27 + $0x3c] sm:$0x3]  ;;  %v217_v11 = vld [vmem:[%s8501_s27 + $0x42] sm:$0x3] }
  0x19   : > { %214 = vst [vmem:[%s173_s28 + $0x12] sm:$0x3] %v213_v9  ;;  %216 = vst [vmem:[%s173_s28 + $0x14] sm:$0x3] %v215_v10  ;;  %v219_v12 = vld [vmem:[%s8501_s27 + $0x48] sm:$0x3] }
  0x1a   : > { %218 = vst [vmem:[%s173_s28 + $0x16] sm:$0x3] %v217_v11  ;;  %v221_v13 = vld [vmem:[%s8501_s27 + $0x4e] sm:$0x3]  ;;  %v223_v14 = vld [vmem:[%s8501_s27 + $0x54] sm:$0x3] }
  0x1b   : > { %220 = vst [vmem:[%s173_s28 + $0x18] sm:$0x3] %v219_v12  ;;  %222 = vst [vmem:[%s173_s28 + $0x1a] sm:$0x3] %v221_v13  ;;  %v225_v15 = vld [vmem:[%s8501_s27 + $0x5a] sm:$0x3] }
  0x1c   : > { %224 = vst [vmem:[%s173_s28 + $0x1c] sm:$0x3] %v223_v14  ;;  %226 = vst [vmem:[%s173_s28 + $0x1e] sm:$0x3] %v225_v15 }
  0x1d PF: > { %281 = sbr.rel (!%p8483_p3) target bundleno = 44 (0x2c), region = 61  ;;  %s283_s29 = sand.u32 (%p8483_p3), 1, %s8412_s13  }
  0x1e   : > { %s7745_s30 = smul.u32 (%p8483_p3), 96, %s8420_s15  ;;  %s7744_s4 = sshll.u32 (%p8483_p3), %s283_s29, 5 }
  0x1f   : > { %s285_s8 = scalar_lea.vmem (%p8483_p3), [#allocation6], %s7744_s4 }
  0x20   : > { %s8526_s7 = scalar_lea.vmem (%p8483_p3), %s10100_s1, %s7745_s30 }
  0x21   : > { %v7746_v16 = vld [vmem:[%s8526_s7 + $0x2] sm:$0x3] (%p8483_p3)  ;;  %v7747_v17 = vld [vmem:[%s8526_s7 + $0x8] sm:$0x3] (%p8483_p3)  ;;  %v7748_v18 = vld [vmem:[%s8526_s7 + $0xe] sm:$0x3] (%p8483_p3) }
  0x22   : > { %311 = vst [vmem:[%s285_s8] sm:$0x3] (%p8483_p3), %v7746_v16  ;;  %313 = vst [vmem:[%s285_s8 + $0x2] sm:$0x3] (%p8483_p3), %v7747_v17  ;;  %v7749_v19 = vld [vmem:[%s8526_s7 + $0x14] sm:$0x3] (%p8483_p3) }
  0x23   : > { %315 = vst [vmem:[%s285_s8 + $0x4] sm:$0x3] (%p8483_p3), %v7748_v18  ;;  %v7750_v20 = vld [vmem:[%s8526_s7 + $0x1a] sm:$0x3] (%p8483_p3)  ;;  %v7751_v21 = vld [vmem:[%s8526_s7 + $0x20] sm:$0x3] (%p8483_p3) }
  0x24   : > { %317 = vst [vmem:[%s285_s8 + $0x6] sm:$0x3] %v7749_v19  ;;  %319 = vst [vmem:[%s285_s8 + $0x8] sm:$0x3] %v7750_v20  ;;  %v7752_v22 = vld [vmem:[%s8526_s7 + $0x26] sm:$0x3] }
  0x25   : > { %321 = vst [vmem:[%s285_s8 + $0xa] sm:$0x3] %v7751_v21  ;;  %v7753_v23 = vld [vmem:[%s8526_s7 + $0x2c] sm:$0x3]  ;;  %v7754_v24 = vld [vmem:[%s8526_s7 + $0x32] sm:$0x3] }
  0x26   : > { %323 = vst [vmem:[%s285_s8 + $0xc] sm:$0x3] %v7752_v22  ;;  %325 = vst [vmem:[%s285_s8 + $0xe] sm:$0x3] %v7753_v23  ;;  %v7755_v25 = vld [vmem:[%s8526_s7 + $0x38] sm:$0x3] }
  0x27   : > { %327 = vst [vmem:[%s285_s8 + $0x10] sm:$0x3] %v7754_v24  ;;  %v7756_v26 = vld [vmem:[%s8526_s7 + $0x3e] sm:$0x3]  ;;  %v7757_v27 = vld [vmem:[%s8526_s7 + $0x44] sm:$0x3] }
  0x28   : > { %329 = vst [vmem:[%s285_s8 + $0x12] sm:$0x3] %v7755_v25  ;;  %331 = vst [vmem:[%s285_s8 + $0x14] sm:$0x3] %v7756_v26  ;;  %v7758_v28 = vld [vmem:[%s8526_s7 + $0x4a] sm:$0x3] }
  0x29   : > { %333 = vst [vmem:[%s285_s8 + $0x16] sm:$0x3] %v7757_v27  ;;  %v7759_v29 = vld [vmem:[%s8526_s7 + $0x50] sm:$0x3]  ;;  %v7760_v30 = vld [vmem:[%s8526_s7 + $0x56] sm:$0x3] }
  0x2a   : > { %335 = vst [vmem:[%s285_s8 + $0x18] sm:$0x3] %v7758_v28  ;;  %337 = vst [vmem:[%s285_s8 + $0x1a] sm:$0x3] %v7759_v29  ;;  %v7761_v31 = vld [vmem:[%s8526_s7 + $0x5c] sm:$0x3] }
  0x2b   : > { %339 = vst [vmem:[%s285_s8 + $0x1c] sm:$0x3] %v7760_v30  ;;  %341 = vst [vmem:[%s285_s8 + $0x1e] sm:$0x3] %v7761_v31 }
  0x2c PF: > { %396 = sbr.rel (!%p8483_p3) target bundleno = 59 (0x3b), region = 102  ;;  %s398_s9 = sand.u32 (%p8483_p3), 1, %s8412_s13  }
  0x2d   : > { %s7763_s10 = smul.u32 (%p8483_p3), 96, %s8420_s15  ;;  %s7762_s11 = sshll.u32 (%p8483_p3), %s398_s9, 5 }
  0x2e   : > { %s400_s18 = scalar_lea.vmem (%p8483_p3), [#allocation7], %s7762_s11 }
  0x2f   : > { %s8551_s22 = scalar_lea.vmem (%p8483_p3), %s10101_s2, %s7763_s10 }
  0x30   : > { %v7764_v32 = vld [vmem:[%s8551_s22 + $0x4] sm:$0x3] (%p8483_p3)  ;;  %v7765_v33 = vld [vmem:[%s8551_s22 + $0xa] sm:$0x3] (%p8483_p3)  ;;  %v7766_v34 = vld [vmem:[%s8551_s22 + $0x10] sm:$0x3] (%p8483_p3) }
  0x31   : > { %426 = vst [vmem:[%s400_s18] sm:$0x3] (%p8483_p3), %v7764_v32  ;;  %428 = vst [vmem:[%s400_s18 + $0x2] sm:$0x3] (%p8483_p3), %v7765_v33  ;;  %v7767_v35 = vld [vmem:[%s8551_s22 + $0x16] sm:$0x3] (%p8483_p3) }
  0x32   : > { %430 = vst [vmem:[%s400_s18 + $0x4] sm:$0x3] (%p8483_p3), %v7766_v34  ;;  %v7768_v36 = vld [vmem:[%s8551_s22 + $0x1c] sm:$0x3] (%p8483_p3)  ;;  %v7769_v37 = vld [vmem:[%s8551_s22 + $0x22] sm:$0x3] (%p8483_p3) }
  0x33   : > { %432 = vst [vmem:[%s400_s18 + $0x6] sm:$0x3] %v7767_v35  ;;  %434 = vst [vmem:[%s400_s18 + $0x8] sm:$0x3] %v7768_v36  ;;  %v7770_v38 = vld [vmem:[%s8551_s22 + $0x28] sm:$0x3] }
  0x34   : > { %436 = vst [vmem:[%s400_s18 + $0xa] sm:$0x3] %v7769_v37  ;;  %v7771_v39 = vld [vmem:[%s8551_s22 + $0x2e] sm:$0x3]  ;;  %v7772_v40 = vld [vmem:[%s8551_s22 + $0x34] sm:$0x3] }
  0x35   : > { %438 = vst [vmem:[%s400_s18 + $0xc] sm:$0x3] %v7770_v38  ;;  %440 = vst [vmem:[%s400_s18 + $0xe] sm:$0x3] %v7771_v39  ;;  %v7773_v41 = vld [vmem:[%s8551_s22 + $0x3a] sm:$0x3] }
  0x36   : > { %442 = vst [vmem:[%s400_s18 + $0x10] sm:$0x3] %v7772_v40  ;;  %v7774_v42 = vld [vmem:[%s8551_s22 + $0x40] sm:$0x3]  ;;  %v7775_v43 = vld [vmem:[%s8551_s22 + $0x46] sm:$0x3] }
  0x37   : > { %444 = vst [vmem:[%s400_s18 + $0x12] sm:$0x3] %v7773_v41  ;;  %446 = vst [vmem:[%s400_s18 + $0x14] sm:$0x3] %v7774_v42  ;;  %v7776_v44 = vld [vmem:[%s8551_s22 + $0x4c] sm:$0x3] }
  0x38   : > { %448 = vst [vmem:[%s400_s18 + $0x16] sm:$0x3] %v7775_v43  ;;  %v7777_v45 = vld [vmem:[%s8551_s22 + $0x52] sm:$0x3]  ;;  %v7778_v46 = vld [vmem:[%s8551_s22 + $0x58] sm:$0x3] }
  0x39   : > { %450 = vst [vmem:[%s400_s18 + $0x18] sm:$0x3] %v7776_v44  ;;  %452 = vst [vmem:[%s400_s18 + $0x1a] sm:$0x3] %v7777_v45  ;;  %v7779_v47 = vld [vmem:[%s8551_s22 + $0x5e] sm:$0x3] }
  0x3a   : > { %454 = vst [vmem:[%s400_s18 + $0x1c] sm:$0x3] %v7778_v46  ;;  %456 = vst [vmem:[%s400_s18 + $0x1e] sm:$0x3] %v7779_v47 }
  0x3b PF: > { %p7780_p6 = scmp.ge.s32.totalorder %s8424_s16, 1  ;;  %p510_p7 = scmp.lt.s32.totalorder %s8424_s16, 3 }
  0x3d   : > { %p511_p8 = pnand %p7780_p6, %p510_p7 }
  0x3f   : > { %514 = sbr.rel (%p511_p8) target bundleno = 1492 (0x5d4), region = 143 }
  0x46   : > { %s517_s23 = sand.u32 1, %s8408_s12   ;;  %vm605_vm0 = vcmask 64512   ;;  %v10135_v48 = vmov 0.0   ;;  %vm8427_vm1 = vmmov 0   ;;  %vm3729_vm2 = vcmask 1041409   ;;  %p574_p9 = scmp.lt.s32.totalorder %s8416_s14, 1 }
  0x47   : > { %8241 = vmatprep.subr.bf16.mxu0 %v10135_v48  ;;  %s8573_s24 = sshll.u32 %s517_s23, 5  ;;  %606 = vst.msk [vmem:[#allocation4] sm:$0xff] %vm605_vm0, %v10135_v48  ;;  %607 = vst.msk [vmem:[#allocation4 + $0x8] sm:$0xff] %vm605_vm0, %v10135_v48  ;;  %8247 = vmatprep.subr.bf16.mxu1 %v10135_v48  ;;  %vm3732_vm3 = vcmask 1042434   ;;  %vm3735_vm4 = vcmask 1043459   ;;  %vm3738_vm5 = vcmask 1044484  }
  0x48   : > { %608 = vst.msk [vmem:[#allocation4 + $0x10] sm:$0xff] %vm605_vm0, %v10135_v48  ;;  %609 = vst.msk [vmem:[#allocation4 + $0x18] sm:$0xff] %vm605_vm0, %v10135_v48  ;;  %s8593_s12 = scalar_lea.vmem [#allocation6], %s8573_s24  ;;  %8243 = vmatprep.mubr.msk.bf16.mxu0 %vm8427_vm1, %v10135_v48  ;;  %8249 = vmatprep.mubr.msk.bf16.mxu1 %vm8427_vm1, %v10135_v48  ;;  %vm3741_vm6 = vcmask 1045509   ;;  %vm3744_vm7 = vcmask 1046534   ;;  %vm3747_vm8 = vcmask 1047559  }
  0x49   : > { %610 = vst.msk [vmem:[#allocation4 + $0x20] sm:$0xff] %vm605_vm0, %v10135_v48  ;;  %611 = vst.msk [vmem:[#allocation4 + $0x28] sm:$0xff] %vm605_vm0, %v10135_v48  ;;  %v8596_v49 = vld.sshfl [vmem:[%s8593_s12] sm:$0x1 pattern:$0x76325410] }
  0x4a   : > { %612 = vst.msk [vmem:[#allocation4 + $0x30] sm:$0xff] %vm605_vm0, %v10135_v48  ;;  %613 = vst.msk [vmem:[#allocation4 + $0x38] sm:$0xff] %vm605_vm0, %v10135_v48  ;;  %v8603_v50 = vld.sshfl [vmem:[%s8593_s12 + $0x2] sm:$0x1 pattern:$0x76325410]  ;;  %v10134_v52 = vunpack.c.l.b16 %v8596_v49 }
  0x4b   : > { %v8606_v51 = vld.sshfl [vmem:[%s8593_s12 + $0x4] sm:$0x1 pattern:$0x76325410]  ;;  %v10131_v53 = vunpack.c.l.b16 %v8603_v50  ;;  %s8701_s25 = scalar_lea.vmem [#allocation5], %s8573_s24  ;;  %vm588_vm9 = vcmask 7168  }
  0x4c   : > { %v8611_v54 = vld.sshfl [vmem:[%s8593_s12 + $0x6] sm:$0x1 pattern:$0x76325410]  ;;  %v10133_v55 = vunpack.c.l.b16 %v8606_v51  ;;  %597 = vst.msk [vmem:[#allocation3] sm:$0xff] %vm588_vm9, %v10135_v48  ;;  %598 = vst.msk [vmem:[#allocation3 + $0x8] sm:$0xff] %vm588_vm9, %v10135_v48 }
  0x4d   : > { %v8615_v56 = vld.sshfl [vmem:[%s8593_s12 + $0x8] sm:$0x1 pattern:$0x76325410]  ;;  %v10130_v57 = vunpack.c.l.b16 %v8611_v54  ;;  %v3908_v58 = vrot.slane %v10131_v53, 7  ;;  %599 = vst.msk [vmem:[#allocation3 + $0x10] sm:$0xff] %vm588_vm9, %v10135_v48 }
  0x4e   : > { %v8621_v59 = vld.sshfl [vmem:[%s8593_s12 + $0xa] sm:$0x1 pattern:$0x76325410]  ;;  %v10125_v60 = vunpack.c.l.b16 %v8615_v56  ;;  %v3910_v61 = vrot.slane %v10133_v55, 6  ;;  %600 = vst.msk [vmem:[#allocation3 + $0x18] sm:$0xff] %vm588_vm9, %v10135_v48 }
  0x4f   : > { %v8627_v62 = vld.sshfl [vmem:[%s8593_s12 + $0xc] sm:$0x1 pattern:$0x76325410]  ;;  %v10114_v63 = vunpack.c.l.b16 %v8621_v59  ;;  %v3909_v0 = vsel %vm3729_vm2, %v3908_v58, %v10134_v52  ;;  %v3912_v1 = vrot.slane %v10130_v57, 5  ;;  %601 = vst.msk [vmem:[#allocation3 + $0x20] sm:$0xff] %vm588_vm9, %v10135_v48 }
  0x50   : > { %v8636_v2 = vld.sshfl [vmem:[%s8593_s12 + $0xe] sm:$0x1 pattern:$0x76325410]  ;;  %v10109_v3 = vunpack.c.l.b16 %v8627_v62  ;;  %v3911_v4 = vsel %vm3732_vm3, %v3910_v61, %v3909_v0  ;;  %v3914_v5 = vrot.slane %v10125_v60, 4  ;;  %602 = vst.msk [vmem:[#allocation3 + $0x28] sm:$0xff] %vm588_vm9, %v10135_v48 }
  0x51   : > { %v8643_v6 = vld.sshfl [vmem:[%s8593_s12 + $0x10] sm:$0x1 pattern:$0x76325410]  ;;  %v3913_v7 = vsel %vm3735_vm4, %v3912_v1, %v3911_v4  ;;  %v3916_v8 = vrot.slane %v10114_v63, 3  ;;  %v10105_v10 = vunpack.c.l.b16 %v8636_v2  ;;  %603 = vst.msk [vmem:[#allocation3 + $0x30] sm:$0xff] %vm588_vm9, %v10135_v48 }
  0x52   : > { %v8649_v9 = vld.sshfl [vmem:[%s8593_s12 + $0x12] sm:$0x1 pattern:$0x76325410]  ;;  %v3915_v11 = vsel %vm3738_vm5, %v3914_v5, %v3913_v7  ;;  %v10132_v13 = vunpack.c.l.b16 %v8643_v6  ;;  %v3918_v15 = vrot.slane %v10109_v3, 2  ;;  %604 = vst.msk [vmem:[#allocation3 + $0x38] sm:$0xff] %vm588_vm9, %v10135_v48 }
  0x53   : > { %v8654_v12 = vld.sshfl [vmem:[%s8593_s12 + $0x14] sm:$0x1 pattern:$0x76325410]  ;;  %v10128_v14 = vunpack.c.l.b16 %v8649_v9  ;;  %v3917_v18 = vsel %vm3741_vm6, %v3916_v8, %v3915_v11  ;;  %v3920_v24 = vrot.slane %v10105_v10, 1  ;;  %vm3989_vm11 = vcmask 130048  }
  0x54   : > { %v8661_v16 = vld.sshfl [vmem:[%s8593_s12 + $0x16] sm:$0x1 pattern:$0x76325410]  ;;  %v10129_v17 = vunpack.c.l.b16 %v8654_v12  ;;  %v3919_v28 = vsel %vm3744_vm7, %v3918_v15, %v3917_v18  ;;  %s8884_s26 = scalar_lea.vmem [#allocation7], %s8573_s24  ;;  %s10209_s14 = smov (!%p574_p9, %s8416_s14), 1 }
  0x55   : > { %v8666_v19 = vld.sshfl [vmem:[%s8593_s12 + $0x18] sm:$0x1 pattern:$0x76325410]  ;;  %v10124_v20 = vunpack.c.l.b16 %v8661_v16  ;;  %v3922_v21 = vrot.slane %v10128_v14, 7  ;;  %v3921_v39 = vsel %vm3747_vm8, %v3920_v24, %v3919_v28  ;;  %s8224_s27 = sshll.u32 %s10209_s14, 5 }
  0x56   : > { %v8672_v22 = vld.sshfl [vmem:[%s8593_s12 + $0x1a] sm:$0x1 pattern:$0x76325410]  ;;  %v10112_v23 = vunpack.c.l.b16 %v8666_v19  ;;  %v3924_v25 = vrot.slane %v10129_v17, 6  ;;  %vm6712_vm13 = vcmask 57344   ;;  %s9636_s14 = scalar_lea.vmem %s10102_s3, %s8224_s27 }
  0x57   : > { %v8680_v26 = vld.sshfl [vmem:[%s8593_s12 + $0x1c] sm:$0x1 pattern:$0x76325410]  ;;  %v10110_v27 = vunpack.c.l.b16 %v8672_v22  ;;  %v3923_v29 = vsel %vm3729_vm2, %v3922_v21, %v10132_v13  ;;  %v3926_v30 = vrot.slane %v10124_v20, 5 }
  0x58   : > { %v8690_v31 = vld.sshfl [vmem:[%s8593_s12 + $0x1e] sm:$0x1 pattern:$0x76325410]  ;;  %v10108_v32 = vunpack.c.l.b16 %v8680_v26  ;;  %v3925_v33 = vsel %vm3732_vm3, %v3924_v25, %v3923_v29  ;;  %v3928_v34 = vrot.slane %v10112_v23, 4 }
  0x59   : > { %v10103_v35 = vunpack.c.l.b16 %v8690_v31  ;;  %v3927_v36 = vsel %vm3735_vm4, %v3926_v30, %v3925_v33  ;;  %v3930_v37 = vrot.slane %v10110_v27, 3  ;;  %v8704_v38 = vld.sshfl [vmem:[%s8701_s25] sm:$0x1 pattern:$0x76325410] }
  0x5a   : > { %v3929_v40 = vsel %vm3738_vm5, %v3928_v34, %v3927_v36  ;;  %v3932_v41 = vrot.slane %v10108_v32, 2  ;;  %v8711_v42 = vld.sshfl [vmem:[%s8701_s25 + $0x2] sm:$0x1 pattern:$0x76325410]  ;;  %v10127_v46 = vunpack.c.l.b16 %v8704_v38 }
  0x5b   : > { %v3931_v43 = vsel %vm3741_vm6, %v3930_v37, %v3929_v40  ;;  %v3934_v44 = vrot.slane %v10103_v35, 1  ;;  %v8717_v45 = vld.sshfl [vmem:[%s8701_s25 + $0x4] sm:$0x1 pattern:$0x76325410]  ;;  %v10117_v47 = vunpack.c.l.b16 %v8711_v42 }
  0x5c   : > { %v3933_v58 = vsel %vm3744_vm7, %v3932_v41, %v3931_v43  ;;  %v8723_v61 = vld.sshfl [vmem:[%s8701_s25 + $0x6] sm:$0x1 pattern:$0x76325410]  ;;  %v10123_v0 = vunpack.c.l.b16 %v8717_v45  ;;  %vm6713_vm14 = vsmask.f32 256 }
  0x5d   : > { %v3935_v1 = vsel %vm3747_vm8, %v3934_v44, %v3933_v58  ;;  %v8728_v4 = vld.sshfl [vmem:[%s8701_s25 + $0x8] sm:$0x1 pattern:$0x76325410]  ;;  %v10111_v5 = vunpack.c.l.b16 %v8723_v61  ;;  %v3728_v7 = vrot.slane %v10117_v47, 7  ;;  %vm9654_vm15 = vmand %vm6712_vm13, %vm6713_vm14 }
  0x5e   : > { %v3936_v8 = vpack.c.b16 %v3935_v1, %v3921_v39  ;;  %v8734_v11 = vld.sshfl [vmem:[%s8701_s25 + $0xa] sm:$0x1 pattern:$0x76325410]  ;;  %v10107_v15 = vunpack.c.l.b16 %v8728_v4  ;;  %v3731_v18 = vrot.slane %v10123_v0, 6 }
  0x5f   : > { %v8740_v21 = vld.sshfl [vmem:[%s8701_s25 + $0xc] sm:$0x1 pattern:$0x76325410]  ;;  %v10104_v24 = vunpack.c.l.b16 %v8734_v11  ;;  %v3730_v25 = vsel %vm3729_vm2, %v3728_v7, %v10127_v46  ;;  %v3734_v28 = vrot.slane %v10111_v5, 5 }
  0x60   : > { %v3942_v29 = vsel %vm605_vm0, %v3936_v8, 0  ;;  %v8750_v30 = vld.sshfl [vmem:[%s8701_s25 + $0xe] sm:$0x1 pattern:$0x76325410]  ;;  %v10106_v33 = vunpack.c.l.b16 %v8740_v21  ;;  %v3733_v34 = vsel %vm3732_vm3, %v3731_v18, %v3730_v25  ;;  %v3737_v36 = vrot.slane %v10107_v15, 4 }
  0x61   : > { %8242 = vmatpush3.bf16.xpose.msra.mxu0 %v3942_v29  ;;  %v8757_v37 = vld.sshfl [vmem:[%s8701_s25 + $0x10] sm:$0x1 pattern:$0x76325410]  ;;  %v3736_v39 = vsel %vm3735_vm4, %v3734_v28, %v3733_v34  ;;  %v3740_v40 = vrot.slane %v10104_v24, 3  ;;  %v10113_v58 = vunpack.c.l.b16 %v8750_v30 }
  0x62   : > { %v8763_v41 = vld.sshfl [vmem:[%s8701_s25 + $0x12] sm:$0x1 pattern:$0x76325410]  ;;  %v3739_v43 = vsel %vm3738_vm5, %v3737_v36, %v3736_v39  ;;  %8259 = vmatprep.subr.bf16.mxu0 %v10135_v48  ;;  %v10126_v1 = vunpack.c.l.b16 %v8757_v37  ;;  %v3743_v25 = vrot.slane %v10106_v33, 2 }
  0x63   : > { %v8768_v44 = vld.sshfl [vmem:[%s8701_s25 + $0x14] sm:$0x1 pattern:$0x76325410]  ;;  %v10116_v7 = vunpack.c.l.b16 %v8763_v41  ;;  %v3742_v34 = vsel %vm3741_vm6, %v3740_v40, %v3739_v43  ;;  %v3746_v15 = vrot.slane %v10113_v58, 1 }
  0x64   : > { %v8774_v8 = vld.sshfl [vmem:[%s8701_s25 + $0x16] sm:$0x1 pattern:$0x76325410]  ;;  %v10122_v18 = vunpack.c.l.b16 %v8768_v44  ;;  %v3745_v27 = vsel %vm3744_vm7, %v3743_v25, %v3742_v34 }
  0x65   : > { %v8780_v28 = vld.sshfl [vmem:[%s8701_s25 + $0x18] sm:$0x1 pattern:$0x76325410]  ;;  %v10115_v29 = vunpack.c.l.b16 %v8774_v8  ;;  %v3749_v36 = vrot.slane %v10116_v7, 7  ;;  %v3748_v47 = vsel %vm3747_vm8, %v3746_v15, %v3745_v27 }
  0x66   : > { %v8787_v39 = vld.sshfl [vmem:[%s8701_s25 + $0x1a] sm:$0x1 pattern:$0x76325410]  ;;  %v10121_v35 = vunpack.c.l.b16 %v8780_v28  ;;  %v3751_v24 = vrot.slane %v10122_v18, 6 }
  0x67   : > { %v8793_v10 = vld.sshfl [vmem:[%s8701_s25 + $0x1c] sm:$0x1 pattern:$0x76325410]  ;;  %v10120_v33 = vunpack.c.l.b16 %v8787_v39  ;;  %v3750_v40 = vsel %vm3729_vm2, %v3749_v36, %v10126_v1  ;;  %v3753_v43 = vrot.slane %v10115_v29, 5 }
  0x68   : > { %v8804_v32 = vld.sshfl [vmem:[%s8701_s25 + $0x1e] sm:$0x1 pattern:$0x76325410]  ;;  %v10119_v3 = vunpack.c.l.b16 %v8793_v10  ;;  %v3752_v5 = vsel %vm3732_vm3, %v3751_v24, %v3750_v40  ;;  %v3755_v23 = vrot.slane %v10121_v35, 4 }
  0x69   : > { %v10118_v58 = vunpack.c.l.b16 %v8804_v32  ;;  %v3754_v63 = vsel %vm3735_vm4, %v3753_v43, %v3752_v5  ;;  %v3757_v36 = vrot.slane %v10120_v33, 3  ;;  %v8022_v33 = vld.sshfl [vmem:[%s8884_s26 + $0x6] sm:$0x1 pattern:$0x76325410] }
  0x6a   : > { %v3756_v29 = vsel %vm3738_vm5, %v3755_v23, %v3754_v63  ;;  %v3759_v7 = vrot.slane %v10119_v3, 2  ;;  %v8428_v63 = vmov -inf   ;;  %v3545_v23 = vlaneseq  ;;  %v8023_v18 = vld.sshfl [vmem:[%s8884_s26 + $0x8] sm:$0x1 pattern:$0x76325410] }
  0x6b   : > { %v3758_v25 = vsel %vm3741_vm6, %v3757_v36, %v3756_v29  ;;  %v3761_v24 = vrot.slane %v10118_v58, 1  ;;  %589 = vst.msk [vmem:[#allocation2] sm:$0xff] %vm588_vm9, %v8428_v63  ;;  %590 = vst.msk [vmem:[#allocation2 + $0x8] sm:$0xff] %vm588_vm9, %v8428_v63 }
  0x6c   : > { %v3760_v34 = vsel %vm3744_vm7, %v3759_v7, %v3758_v25  ;;  %591 = vst.msk [vmem:[#allocation2 + $0x10] sm:$0xff] %vm588_vm9, %v8428_v63  ;;  %592 = vst.msk [vmem:[#allocation2 + $0x18] sm:$0xff] %vm588_vm9, %v8428_v63  ;;  %v8851_v27 = vshrl.u32 %v3545_v23, 7 }
  0x6d   : > { %v3762_v40 = vsel %vm3747_vm8, %v3761_v24, %v3760_v34  ;;  %593 = vst.msk [vmem:[#allocation2 + $0x20] sm:$0xff] %vm588_vm9, %v8428_v63  ;;  %594 = vst.msk [vmem:[#allocation2 + $0x28] sm:$0xff] %vm588_vm9, %v8428_v63  ;;  %v8027_v46 = vld.sshfl [vmem:[%s8884_s26 + $0x10] sm:$0x1 pattern:$0x76325410] }
  0x6e   : > { %v3763_v5 = vpack.c.b16 %v3762_v40, %v3748_v47  ;;  %595 = vst.msk [vmem:[#allocation2 + $0x30] sm:$0xff] %vm588_vm9, %v8428_v63  ;;  %596 = vst.msk [vmem:[#allocation2 + $0x38] sm:$0xff] %vm588_vm9, %v8428_v63  ;;  %v8853_v47 = vand.u32 127, %v3545_v23  ;;  %v8856_v15 = vadd.s32 8, %v8851_v27 }
  0x6f   : > { %v8028_v53 = vld.sshfl [vmem:[%s8884_s26 + $0x12] sm:$0x1 pattern:$0x76325410] }
  0x70   : > { %8244 = vmatmul.mubr.msk.bf16.vlgmr.msra.gmra.mrb[0].mxu0 %vm605_vm0, %v3763_v5  ;;  %vm3550_vm10 = vcmp.ge.s32.totalorder %v8851_v27, %v8853_v47  ;;  %vm3551_vm12 = vcmp.ge.s32.totalorder %v8856_v15, %v8853_v47  ;;  %v8429_v5 = vmov 0   ;;  %v4203_v55 = vunpack.c.l.b16 %v8028_v53  ;;  %v8031_v52 = vld.sshfl [vmem:[%s8884_s26 + $0x18] sm:$0x1 pattern:$0x76325410] }
  0x71   : > { %8261 = vmatprep.mubr.msk.bf16.mxu0 %vm8427_vm1, %v10135_v48  ;;  %8336 = vset.pattern.permute.xlu1 %v8429_v5  ;;  %v8033_v48 = vld.sshfl [vmem:[%s8884_s26 + $0x1c] sm:$0x1 pattern:$0x76325410] }
  0x72   : > { %8337 = vset.pattern.permute.xlu0 %v8429_v5  ;;  %v8876_v63 = vld [vmem:[#allocation2] sm:$0xff] }
  0x73   : > { %10145 = vst [vmem:[#allocation8_spill] sm:$0xff] %v8876_v63 }
 0x143   : > { %v3978_v7 = vpop.f32.mrb[0].mxu0 }
 0x144   : > { %v8865_v29 = vsel %vm3550_vm10, %v3978_v7, -1e+30  ;;  %v8245_v43 = vpop.f32.mrb[1].mxu0 }
 0x145   : > { %v3981_v36 = vpop.f32.mrb[2].mxu0  ;;  %v3990_v25 = vsel %vm3989_vm11, %v8865_v29, -inf  ;;  %v8881_v43 = vld [vmem:[#allocation2 + $0x8] sm:$0xff] }
 0x146   : > { %v8872_v24 = vsel %vm3551_vm12, %v3981_v36, -1e+30  ;;  %3991 = vmax.xlane.f32.xlu0 %v3990_v25  ;;  %v8246_v34 = vpop.f32.mrb[3].mxu0  ;;  %v4197_v25 = vunpack.c.l.b16 %v8022_v33 }
 0x147   : > { %v3993_v40 = vsel %vm3989_vm11, %v8872_v24, -inf  ;;  %v8020_v36 = vld.sshfl [vmem:[%s8884_s26 + $0x2] sm:$0x1 pattern:$0x76325410] }
 0x148   : > { %v8021_v34 = vld.sshfl [vmem:[%s8884_s26 + $0x4] sm:$0x1 pattern:$0x76325410]  ;;  %v4214_v33 = vrot.slane %v4197_v25, 5 }
 0x149   : > { %v4196_v58 = vunpack.c.l.b16 %v8021_v34  ;;  %v4198_v34 = vunpack.c.l.b16 %v8023_v18  ;;  %v8029_v18 = vld.sshfl [vmem:[%s8884_s26 + $0x14] sm:$0x1 pattern:$0x76325410] }
 0x14a   : > { %3994 = vmax.xlane.f32.xlu0 %v3993_v40  ;;  %v4195_v40 = vunpack.c.l.b16 %v8020_v36  ;;  %v8024_v36 = vld.sshfl [vmem:[%s8884_s26 + $0xa] sm:$0x1 pattern:$0x76325410]  ;;  %v4204_v25 = vunpack.c.l.b16 %v8029_v18 }
 0x14b   : > { %v4212_v20 = vrot.slane %v4196_v58, 6  ;;  %v4199_v1 = vunpack.c.l.b16 %v8024_v36  ;;  %v4216_v17 = vrot.slane %v4198_v34, 4  ;;  %v4202_v36 = vunpack.c.l.b16 %v8027_v46 }
 0x14c   : > { %v4210_v0 = vrot.slane %v4195_v40, 7  ;;  %v8026_v40 = vld.sshfl [vmem:[%s8884_s26 + $0xe] sm:$0x1 pattern:$0x76325410]  ;;  %v4206_v34 = vunpack.c.l.b16 %v8031_v52 }
 0x14d   : > { %v4218_v57 = vrot.slane %v4199_v1, 3  ;;  %v4201_v13 = vunpack.c.l.b16 %v8026_v40  ;;  %v4226_v1 = vrot.slane %v4204_v25, 6  ;;  %v8034_v40 = vld.sshfl [vmem:[%s8884_s26 + $0x1e] sm:$0x1 pattern:$0x76325410] }
 0x14e   : > { %v4230_v18 = vrot.slane %v4206_v34, 4 }
 0x1d3   : > { %v3992_v23 = vpop.xlane.xlu0 %3991 }
 0x1d4   : > { %v8879_v7 = vmax.f32 %v8876_v63, %v3992_v23  ;;  %v8019_v23 = vld.sshfl [vmem:[%s8884_s26] sm:$0x1 pattern:$0x76325410]  ;;  %v4222_v63 = vrot.slane %v4201_v13, 1 }
 0x1d5   : > { %v4194_v35 = vunpack.c.l.b16 %v8019_v23 }
 0x1d6   : > { %10146 = vst [vmem:[#allocation9_spill] sm:$0xff] %v8879_v7  ;;  %4288 = vst.msk [vmem:[#allocation2] sm:$0xff] %vm588_vm9, %v8879_v7  ;;  %4006 = vperm.xlu1 %8336, %v8879_v7  }
 0x1d7   : > { %v3995_v5 = vpop.xlane.xlu0 %3994  ;;  %v4211_v23 = vsel %vm3729_vm2, %v4210_v0, %v4194_v35  ;;  %v8030_v0 = vld.sshfl [vmem:[%s8884_s26 + $0x16] sm:$0x1 pattern:$0x76325410] }
 0x1d8   : > { %v8895_v3 = vmax.f32 %v8881_v43, %v3995_v5  ;;  %v8025_v5 = vld.sshfl [vmem:[%s8884_s26 + $0xc] sm:$0x1 pattern:$0x76325410]  ;;  %v4213_v60 = vsel %vm3732_vm3, %v4212_v20, %v4211_v23  ;;  %v4205_v20 = vunpack.c.l.b16 %v8030_v0  ;;  %v4209_v0 = vunpack.c.l.b16 %v8034_v40 }
 0x1d9   : > { %v4200_v58 = vunpack.c.l.b16 %v8025_v5  ;;  %v4215_v14 = vsel %vm3735_vm4, %v4214_v33, %v4213_v60  ;;  %v4224_v60 = vrot.slane %v4203_v55, 7  ;;  %v8032_v33 = vld.sshfl [vmem:[%s8884_s26 + $0x1a] sm:$0x1 pattern:$0x76325410]  ;;  %v10152_v40 = vunpack.c.l.b16 %v8611_v54 }
 0x1da   : > { %4289 = vst.msk [vmem:[#allocation2 + $0x8] sm:$0xff] %vm588_vm9, %v8895_v3  ;;  %4011 = vperm.xlu1 %8336, %v8895_v3   ;;  %v4217_v35 = vsel %vm3738_vm5, %v4216_v17, %v4215_v14  ;;  %v4207_v7 = vunpack.c.l.b16 %v8032_v33  ;;  %v4228_v53 = vrot.slane %v4205_v20, 5  ;;  %v4208_v14 = vunpack.c.l.b16 %v8033_v48 }
 0x1db   : > { %v4220_v5 = vrot.slane %v4200_v58, 2  ;;  %v4219_v23 = vsel %vm3741_vm6, %v4218_v57, %v4217_v35  ;;  %v4225_v46 = vsel %vm3729_vm2, %v4224_v60, %v4202_v36  ;;  %v4236_v36 = vrot.slane %v4209_v0, 1 }
 0x1dc   : > { %v4227_v58 = vsel %vm3732_vm3, %v4226_v1, %v4225_v46  ;;  %v4232_v55 = vrot.slane %v4207_v7, 3  ;;  %v4234_v35 = vrot.slane %v4208_v14, 2  ;;  %v10148_v60 = vunpack.c.l.b16 %v8596_v49 }
 0x1dd   : > { %v4221_v17 = vsel %vm3744_vm7, %v4220_v5, %v4219_v23  ;;  %v4229_v57 = vsel %vm3735_vm4, %v4228_v53, %v4227_v58  ;;  %v10147_v23 = vmov 0.0   ;;  %v10149_v7 = vunpack.c.l.b16 %v8606_v51 }
 0x1de   : > { %v4231_v52 = vsel %vm3738_vm5, %v4230_v18, %v4229_v57  ;;  %v4223_v25 = vsel %vm3747_vm8, %v4222_v63, %v4221_v17  ;;  %v4639_v33 = vrot.slane %v10148_v60, 1  ;;  %v10150_v63 = vunpack.c.l.b16 %v8643_v6 }
 0x1df   : > { %v4233_v13 = vsel %vm3741_vm6, %v4232_v55, %v4231_v52  ;;  %v4641_v34 = vrot.slane %v10149_v7, 7  ;;  %v10151_v46 = vunpack.c.l.b16 %v8603_v50  ;;  %v4643_v14 = vrot.slane %v10152_v40, 6 }
 0x1e0   : > { %v4235_v20 = vsel %vm3744_vm7, %v4234_v35, %v4233_v13  ;;  %v4653_v1 = vrot.slane %v10150_v63, 1  ;;  %v10153_v17 = vunpack.c.l.b16 %v8654_v12  ;;  %v10154_v51 = vunpack.c.l.b16 %v8649_v9 }
 0x1e1   : > { %v4237_v48 = vsel %vm3747_vm8, %v4236_v36, %v4235_v20  ;;  %v4640_v53 = vsel %vm3729_vm2, %v10151_v46, %v4639_v33  ;;  %v10155_v6 = vunpack.c.l.b16 %v8704_v38  ;;  %v10156_v50 = vunpack.c.l.b16 %v8757_v37  ;;  %v8962_v20 = vld.sshfl [vmem:[%s8593_s12] sm:$0x2 pattern:$0x76325410] }
 0x1e2   : > { %v4238_v5 = vpack.c.b16 %v4237_v48, %v4223_v25  ;;  %v4655_v58 = vrot.slane %v10153_v17, 7  ;;  %v4642_v49 = vsel %vm3732_vm3, %v4641_v34, %v4640_v53  ;;  %v4654_v18 = vsel %vm3729_vm2, %v10154_v51, %v4653_v1  ;;  %v8986_v53 = vld.sshfl [vmem:[%s8593_s12 + $0x10] sm:$0x2 pattern:$0x76325410] }
 0x1e3   : > { %v4466_v0 = vrot.slane %v10155_v6, 1  ;;  %v4480_v57 = vrot.slane %v10156_v50, 1  ;;  %v10157_v55 = vunpack.c.l.b16 %v8615_v56  ;;  %v10158_v52 = vunpack.c.l.b16 %v8661_v16 }
 0x1e4   : > { %8248 = vmatpush3.bf16.msra.mxu1 %v4238_v5  ;;  %v4644_v12 = vsel %vm3735_vm4, %v4643_v14, %v4642_v49  ;;  %v4656_v25 = vsel %vm3732_vm3, %v4655_v58, %v4654_v18  ;;  %v10159_v9 = vunpack.c.l.b16 %v8717_v45  ;;  %v10160_v38 = vunpack.c.l.b16 %v8768_v44  ;;  %v8971_v5 = vld.sshfl [vmem:[%s8593_s12 + $0x2] sm:$0x2 pattern:$0x76325410] }
 0x1e5   : > { %8253 = vmatprep.subr.bf16.mxu1 %v10147_v23  ;;  %v4645_v54 = vrot.slane %v10157_v55, 5  ;;  %v4657_v35 = vrot.slane %v10158_v52, 6  ;;  %v10161_v37 = vunpack.c.l.b16 %v8711_v42  ;;  %v10162_v16 = vunpack.c.l.b16 %v8763_v41  ;;  %v9008_v52 = vld.sshfl [vmem:[%s8593_s12 + $0x6] sm:$0x2 pattern:$0x76325410] }
 0x1e6   : > { %v4468_v13 = vrot.slane %v10159_v9, 7  ;;  %v4482_v36 = vrot.slane %v10160_v38, 7  ;;  %v10163_v60 = vunpack.c.l.b16 %v8621_v59  ;;  %v10164_v33 = vunpack.c.l.b16 %v8666_v19 }
 0x1e7   : > { %v4467_v56 = vsel %vm3729_vm2, %v10161_v37, %v4466_v0  ;;  %v4481_v48 = vsel %vm3729_vm2, %v10162_v16, %v4480_v57  ;;  %v4646_v7 = vsel %vm3738_vm5, %v4645_v54, %v4644_v12  ;;  %v4658_v34 = vsel %vm3735_vm4, %v4657_v35, %v4656_v25  ;;  %v9028_v16 = vld.sshfl [vmem:[%s8593_s12 + $0x8] sm:$0x2 pattern:$0x76325410] }
 0x1e8   : > { %v4647_v45 = vrot.slane %v10163_v60, 4  ;;  %v4659_v44 = vrot.slane %v10164_v33, 5  ;;  %v10165_v42 = vunpack.c.l.b16 %v8723_v61  ;;  %v10166_v1 = vunpack.c.l.b16 %v8774_v8  ;;  %v8993_v61 = vld.sshfl [vmem:[%s8593_s12 + $0x12] sm:$0x2 pattern:$0x76325410] }
 0x1e9   : > { %v4469_v46 = vsel %vm3732_vm3, %v4468_v13, %v4467_v56  ;;  %v4483_v59 = vsel %vm3732_vm3, %v4482_v36, %v4481_v48  ;;  %v5354_v19 = vunpack.c.l.b16 %v8962_v20  ;;  %v5355_v40 = vunpack.c.l.b16 %v8971_v5 }
 0x1ea   : > { %v4470_v63 = vrot.slane %v10165_v42, 6  ;;  %v4484_v41 = vrot.slane %v10166_v1, 6  ;;  %v10167_v14 = vunpack.c.l.b16 %v8672_v22  ;;  %v4648_v8 = vsel %vm3741_vm6, %v4647_v45, %v4646_v7 }
 0x1eb   : > { %v10168_v58 = vunpack.c.l.b16 %v8627_v62  ;;  %v4660_v51 = vsel %vm3738_vm5, %v4659_v44, %v4658_v34  ;;  %v10169_v18 = vunpack.c.l.b16 %v8680_v26  ;;  %v10170_v50 = vunpack.c.l.b16 %v8728_v4  ;;  %v9011_v62 = vld.sshfl [vmem:[%s8593_s12 + $0x4] sm:$0x2 pattern:$0x76325410] }
 0x1ec   : > { %v4661_v17 = vrot.slane %v10167_v14, 4  ;;  %v4471_v0 = vsel %vm3735_vm4, %v4470_v63, %v4469_v46  ;;  %v4485_v22 = vsel %vm3735_vm4, %v4484_v41, %v4483_v59  ;;  %v10171_v55 = vunpack.c.l.b16 %v8780_v28  ;;  %v9036_v44 = vld.sshfl [vmem:[%s8593_s12 + $0xa] sm:$0x2 pattern:$0x76325410] }
 0x1ed   : > { %v4649_v49 = vrot.slane %v10168_v58, 3  ;;  %v4663_v6 = vrot.slane %v10169_v18, 3  ;;  %v4472_v57 = vrot.slane %v10170_v50, 5  ;;  %v5362_v26 = vunpack.c.l.b16 %v8986_v53 }
 0x1ee   : > { %v4486_v54 = vrot.slane %v10171_v55, 5  ;;  %v5363_v35 = vunpack.c.l.b16 %v8993_v61  ;;  %v5370_v12 = vrot.slane %v5354_v19, 2  ;;  %v5371_v4 = vrot.slane %v5355_v40, 1 }
 0x1ef   : > { %v10172_v28 = vunpack.c.l.b16 %v8636_v2  ;;  %v4662_v9 = vsel %vm3741_vm6, %v4661_v17, %v4660_v51  ;;  %v4650_v13 = vsel %vm3744_vm7, %v4649_v49, %v4648_v8  ;;  %v10173_v38 = vunpack.c.l.b16 %v8734_v11  ;;  %v9039_v11 = vld.sshfl [vmem:[%s8593_s12 + $0x16] sm:$0x2 pattern:$0x76325410] }
 0x1f0   : > { %v10174_v37 = vunpack.c.l.b16 %v8787_v39  ;;  %v5357_v48 = vunpack.c.l.b16 %v9008_v52  ;;  %v10175_v60 = vunpack.c.l.b16 %v8690_v31  ;;  %v4473_v2 = vsel %vm3738_vm5, %v4472_v57, %v4471_v0  ;;  %v9044_v34 = vld.sshfl [vmem:[%s8593_s12 + $0x14] sm:$0x2 pattern:$0x76325410] }
 0x1f1   : > { %v4651_v25 = vrot.slane %v10172_v28, 2  ;;  %v4474_v36 = vrot.slane %v10173_v38, 4  ;;  %v4487_v33 = vsel %vm3738_vm5, %v4486_v54, %v4485_v22  ;;  %v5356_v39 = vunpack.c.l.b16 %v9011_v62  ;;  %v9056_v14 = vld.sshfl [vmem:[%s8593_s12 + $0xc] sm:$0x2 pattern:$0x76325410] }
 0x1f2   : > { %v4488_v56 = vrot.slane %v10174_v37, 4  ;;  %v4665_v45 = vrot.slane %v10175_v60, 2  ;;  %v4664_v7 = vsel %vm3744_vm7, %v4663_v6, %v4662_v9  ;;  %v5372_v42 = vsel %vm3729_vm2, %v5371_v4, %v5370_v12  ;;  %v9062_v49 = vld.sshfl [vmem:[%s8593_s12 + $0x18] sm:$0x2 pattern:$0x76325410] }
 0x1f3   : > { %v5384_v31 = vrot.slane %v5362_v26, 2  ;;  %v5385_v63 = vrot.slane %v5363_v35, 1  ;;  %v10176_v1 = vunpack.c.l.b16 %v8740_v21  ;;  %v10177_v46 = vunpack.c.l.b16 %v8793_v10  ;;  %v9070_v6 = vld.sshfl [vmem:[%s8593_s12 + $0xe] sm:$0x2 pattern:$0x76325410] }
 0x1f4   : > { %v5358_v17 = vunpack.c.l.b16 %v9028_v16  ;;  %v4475_v8 = vsel %vm3741_vm6, %v4474_v36, %v4473_v2  ;;  %v4489_v58 = vsel %vm3741_vm6, %v4488_v56, %v4487_v33  ;;  %v5365_v51 = vunpack.c.l.b16 %v9039_v11  ;;  %v9081_v12 = vld.sshfl [vmem:[%s8593_s12 + $0x1a] sm:$0x2 pattern:$0x76325410] }
 0x1f5   : > { %v4476_v41 = vrot.slane %v10176_v1, 3  ;;  %v4490_v59 = vrot.slane %v10177_v46, 3  ;;  %v5374_v21 = vrot.slane %v5357_v48, 7  ;;  %v4652_v10 = vsel %vm3747_vm8, %v4651_v25, %v4650_v13 }
 0x1f6   : > { %v4666_v18 = vsel %vm3747_vm8, %v4665_v45, %v4664_v7  ;;  %v5364_v0 = vunpack.c.l.b16 %v9044_v34  ;;  %v5373_v50 = vsel %vm3732_vm3, %v5356_v39, %v5372_v42  ;;  %v10178_v57 = vunpack.c.l.b16 %v8750_v30  ;;  %v9088_v13 = vld.sshfl [vmem:[%s8593_s12 + $0x1c] sm:$0x2 pattern:$0x76325410] }
 0x1f7   : > { %v10179_v55 = vunpack.c.l.b16 %v8804_v32  ;;  %v5359_v4 = vunpack.c.l.b16 %v9036_v44  ;;  %v5386_v28 = vsel %vm3729_vm2, %v5385_v63, %v5384_v31  ;;  %v4477_v25 = vsel %vm3744_vm7, %v4476_v41, %v4475_v8  ;;  %v9103_v33 = vld.sshfl [vmem:[%s8701_s25] sm:$0x2 pattern:$0x76325410] }
 0x1f8   : > { %v4478_v22 = vrot.slane %v10178_v57, 2  ;;  %v4491_v9 = vsel %vm3744_vm7, %v4490_v59, %v4489_v58  ;;  %v5366_v30 = vunpack.c.l.b16 %v9062_v49  ;;  %v5376_v32 = vrot.slane %v5358_v17, 6  ;;  %v9115_v41 = vld.sshfl [vmem:[%s8701_s25 + $0x2] sm:$0x2 pattern:$0x76325410] }
 0x1f9   : > { %v4492_v54 = vrot.slane %v10179_v55, 2  ;;  %v4667_v38 = vpack.c.b16 %v4666_v18, %v4652_v10  ;;  %v10141_v36 = vunpack.c.l.b16 %v9056_v14  ;;  %v5375_v37 = vsel %vm3735_vm4, %v5374_v21, %v5373_v50  ;;  %v9119_v59 = vld.sshfl [vmem:[%s8593_s12 + $0x1e] sm:$0x2 pattern:$0x76325410] }
 0x1fa   : > { %v5388_v56 = vrot.slane %v5365_v51, 7  ;;  %v10139_v60 = vunpack.c.l.b16 %v9070_v6  ;;  %v10142_v45 = vunpack.c.l.b16 %v9081_v12  ;;  %v5387_v2 = vsel %vm3732_vm3, %v5364_v0, %v5386_v28  ;;  %v9125_v21 = vld.sshfl [vmem:[%s8701_s25 + $0x10] sm:$0x2 pattern:$0x76325410] }
 0x1fb   : > { %v9106_v42 = vsel %vm3747_vm8, %v4478_v22, %v4477_v25  ;;  %v9109_v31 = vsel %vm3747_vm8, %v4492_v54, %v4491_v9  ;;  %v10140_v63 = vunpack.c.l.b16 %v9088_v13  ;;  %v5378_v1 = vrot.slane %v5359_v4, 5  ;;  %v9134_v57 = vld.sshfl [vmem:[%s8701_s25 + $0x12] sm:$0x2 pattern:$0x76325410] }
 0x1fc   : > { %v5377_v8 = vsel %vm3738_vm5, %v5376_v32, %v5375_v37  ;;  %v5390_v58 = vrot.slane %v5366_v30, 6  ;;  %v9128_v10 = vsel %vm605_vm0, %v4667_v38, 0  ;;  %v5380_v18 = vrot.slane %v10141_v36, 4 }
 0x1fd   : > { %v5389_v50 = vsel %vm3735_vm4, %v5388_v56, %v5387_v2  ;;  %v5382_v22 = vrot.slane %v10139_v60, 3  ;;  %v5392_v55 = vrot.slane %v10142_v45, 5  ;;  %v9143_v54 = vld.sshfl [vmem:[%s8701_s25 + $0x6] sm:$0x2 pattern:$0x76325410]  ;;  %v5181_v28 = vunpack.c.l.b16 %v9103_v33 }
 0x1fe   : > { %v5379_v32 = vsel %vm3741_vm6, %v5378_v1, %v5377_v8  ;;  %v5394_v38 = vrot.slane %v10140_v63, 4  ;;  %v5182_v37 = vunpack.c.l.b16 %v9115_v41  ;;  %v5391_v2 = vsel %vm3738_vm5, %v5390_v58, %v5389_v50  ;;  %v9159_v1 = vld.sshfl [vmem:[%s8701_s25 + $0x8] sm:$0x2 pattern:$0x76325410] }
 0x1ff   : > { %v10143_v60 = vunpack.c.l.b16 %v9119_v59  ;;  %v5184_v8 = vunpack.c.l.b16 %v9143_v54  ;;  %v6101_v41 = vrot.slane %v5354_v19, 3  ;;  %v9167_v50 = vld.sshfl [vmem:[%s8701_s25 + $0xa] sm:$0x2 pattern:$0x76325410]  ;;  %v6116_v63 = vrot.slane %v5363_v35, 2 }
 0x200   : > { %v5381_v20 = vsel %vm3744_vm7, %v5380_v18, %v5379_v32  ;;  %v5393_v5 = vsel %vm3741_vm6, %v5392_v55, %v5391_v2  ;;  %v9181_v19 = vld.sshfl [vmem:[%s8701_s25 + $0xc] sm:$0x2 pattern:$0x76325410]  ;;  %v6104_v53 = vrot.slane %v5356_v39, 1  ;;  %v6118_v55 = vrot.slane %v5364_v0, 1 }
 0x201   : > { %v5396_v61 = vrot.slane %v10143_v60, 3  ;;  %v9199_v32 = vld.sshfl [vmem:[%s8701_s25 + $0x18] sm:$0x2 pattern:$0x76325410]  ;;  %v5185_v2 = vunpack.c.l.b16 %v9159_v1 }
 0x202   : > { %v9225_v60 = vld.sshfl [vmem:[%s8701_s25 + $0x1c] sm:$0x2 pattern:$0x76325410] }
 0x203   : > { %v5195_v52 = vunpack.c.l.b16 %v9225_v60  ;;  %v5203_v49 = vrot.slane %v5185_v2, 6 }
 0x255   : > { %v4007_v7 = vpop.permute.xlu1 %4006 }
 0x256   : > { %v4014_v46 = vsub.f32 %v8865_v29, %v4007_v7  ;;  %v9153_v7 = vld.sshfl [vmem:[%s8701_s25 + $0x4] sm:$0x2 pattern:$0x76325410]  ;;  %v5189_v29 = vunpack.c.l.b16 %v9125_v21 }
 0x257   : > { %v9170_v21 = vld.sshfl [vmem:[%s8701_s25 + $0x14] sm:$0x2 pattern:$0x76325410]  ;;  %v5183_v35 = vunpack.c.l.b16 %v9153_v7 }
 0x258   : > { %v4016_v25 = vmul.f32 1.442695, %v4014_v46  ;;  %v5190_v46 = vunpack.c.l.b16 %v9134_v57  ;;  %v5197_v57 = vrot.slane %v5181_v28, 2  ;;  %v5211_v36 = vrot.slane %v5189_v29, 2 }
 0x259   : > { %v4012_v9 = vpop.permute.xlu1 %4011  ;;  %v9208_v7 = vld.sshfl [vmem:[%s8701_s25 + $0x1a] sm:$0x2 pattern:$0x76325410]  ;;  %v5191_v34 = vunpack.c.l.b16 %v9170_v21  ;;  %v5942_v16 = vrot.slane %v5189_v29, 3  ;;  %v10180_v29 = vunpack.c.l.b16 %v9081_v12 }
 0x25a   : > { %v4015_v56 = vsub.f32 %v8872_v24, %v4012_v9  ;;  %v6102_v24 = vrot.slane %v5355_v40, 2  ;;  %v6115_v9 = vrot.slane %v5362_v26, 3  ;;  %8338 = vpow2.f32 %v4016_v25  ;;  %v9184_v40 = vld.sshfl [vmem:[%s8701_s25 + $0x16] sm:$0x2 pattern:$0x76325410] }
 0x25b   : > { %v5212_v45 = vrot.slane %v5190_v46, 1  ;;  %v9191_v26 = vld.sshfl [vmem:[%s8701_s25 + $0xe] sm:$0x2 pattern:$0x76325410]  ;;  %v5395_v25 = vsel %vm3744_vm7, %v5394_v38, %v5393_v5  ;;  %v5192_v62 = vunpack.c.l.b16 %v9184_v40  ;;  %v5187_v38 = vunpack.c.l.b16 %v9181_v19 }
 0x25c   : > { %v4018_v58 = vmul.f32 1.442695, %v4015_v56  ;;  %v5198_v56 = vrot.slane %v5182_v37, 1  ;;  %v6103_v18 = vsel %vm3729_vm2, %v6102_v24, %v6101_v41  ;;  %v6117_v39 = vsel %vm3729_vm2, %v6116_v63, %v6115_v9 }
 0x25d   : > { %v5186_v41 = vunpack.c.l.b16 %v9167_v50  ;;  %v5201_v24 = vrot.slane %v5184_v8, 7  ;;  %v5213_v5 = vsel %vm3729_vm2, %v5212_v45, %v5211_v36  ;;  %v6105_v63 = vsel %vm3732_vm3, %v6104_v53, %v6103_v18 }
 0x25e   : > { %8340 = vpow2.f32 %v4018_v58  ;;  %v9205_v58 = vsel %vm3747_vm8, %v5382_v22, %v5381_v20  ;;  %v5199_v0 = vsel %vm3729_vm2, %v5198_v56, %v5197_v57  ;;  %v9219_v22 = vsel %vm3747_vm8, %v5396_v61, %v5395_v25 }
 0x25f   : > { %v5188_v9 = vunpack.c.l.b16 %v9191_v26  ;;  %v5193_v20 = vunpack.c.l.b16 %v9199_v32  ;;  %v6119_v21 = vsel %vm3732_vm3, %v6118_v55, %v6117_v39  ;;  %v5194_v57 = vunpack.c.l.b16 %v9208_v7 }
 0x260   : > { %v5200_v56 = vsel %vm3732_vm3, %v5183_v35, %v5199_v0  ;;  %v5215_v36 = vrot.slane %v5192_v62, 7  ;;  %v6107_v45 = vrot.slane %v5358_v17, 7  ;;  %v5214_v53 = vsel %vm3732_vm3, %v5191_v34, %v5213_v5 }
 0x261   : > { %v6106_v61 = vsel %vm3735_vm4, %v5357_v48, %v6105_v63  ;;  %v6121_v18 = vrot.slane %v5366_v30, 7  ;;  %v5928_v55 = vrot.slane %v5181_v28, 3  ;;  %v6120_v25 = vsel %vm3735_vm4, %v5365_v51, %v6119_v21 }
 0x262   : > { %v5929_v32 = vrot.slane %v5182_v37, 2  ;;  %v5943_v17 = vrot.slane %v5190_v46, 2  ;;  %v5202_v48 = vsel %vm3735_vm4, %v5201_v24, %v5200_v56  ;;  %v5217_v30 = vrot.slane %v5193_v20, 6 }
 0x263   : > { %v5216_v11 = vsel %vm3735_vm4, %v5215_v36, %v5214_v53  ;;  %v6108_v28 = vsel %vm3738_vm5, %v6107_v45, %v6106_v61  ;;  %v6109_v51 = vrot.slane %v5359_v4, 6  ;;  %v6123_v37 = vrot.slane %v10180_v29, 6  ;;  %v8101_v46 = vld.sshfl [vmem:[%s8701_s25 + $0x1e] sm:$0x2 pattern:$0x76325410] }
 0x264   : > { %v9244_v39 = vpop.eup %8338  ;;  %v6122_v0 = vsel %vm3738_vm5, %v6121_v18, %v6120_v25  ;;  %v5931_v24 = vrot.slane %v5183_v35, 1  ;;  %v5945_v5 = vrot.slane %v5191_v34, 1  ;;  %v5205_v63 = vrot.slane %v5186_v41, 5 }
 0x265   : > { %v5219_v21 = vrot.slane %v5194_v57, 5  ;;  %v5930_v44 = vsel %vm3729_vm2, %v5929_v32, %v5928_v55  ;;  %v5944_v4 = vsel %vm3729_vm2, %v5943_v17, %v5942_v16  ;;  %v5204_v12 = vsel %vm3738_vm5, %v5203_v49, %v5202_v48 }
 0x266   : > { %v5218_v56 = vsel %vm3738_vm5, %v5217_v30, %v5216_v11  ;;  %v10181_v36 = vunpack.c.l.b16 %v9056_v14  ;;  %v10182_v34 = vunpack.c.l.b16 %v9088_v13  ;;  %v5398_v53 = vpack.c.b16 %v9219_v22, %v9205_v58 }
 0x267   : > { %v5196_v61 = vunpack.c.l.b16 %v8101_v46  ;;  %v6110_v18 = vsel %vm3741_vm6, %v6109_v51, %v6108_v28  ;;  %v6124_v55 = vsel %vm3741_vm6, %v6123_v37, %v6122_v0  ;;  %v5207_v14 = vrot.slane %v5187_v38, 4 }
 0x268   : > { %v9250_v33 = vpop.eup %8340  ;;  %v6111_v35 = vrot.slane %v10181_v36, 5  ;;  %v6125_v45 = vrot.slane %v10182_v34, 5  ;;  %v5221_v13 = vrot.slane %v5195_v52, 4  ;;  %v5932_v25 = vsel %vm3732_vm3, %v5931_v24, %v5930_v44 }
 0x269   : > { %v4049_v60 = vpack.c.bf16 %v9250_v33, %v9244_v39  ;;  %v5206_v32 = vsel %vm3741_vm6, %v5205_v63, %v5204_v12  ;;  %v5220_v16 = vsel %vm3741_vm6, %v5219_v21, %v5218_v56  ;;  %v10183_v58 = vunpack.c.l.b16 %v9070_v6 }
 0x26a   : > { %v10184_v17 = vunpack.c.l.b16 %v9119_v59  ;;  %v6112_v49 = vsel %vm3744_vm7, %v6111_v35, %v6110_v18  ;;  %v6126_v30 = vsel %vm3744_vm7, %v6125_v45, %v6124_v55  ;;  %v5934_v11 = vrot.slane %v5185_v2, 7 }
 0x26b   : > { %8250 = vmatmul.mubr.msk.bf16.vlgmr.msra.gmra.mrb[0].mxu1 %vm3989_vm11, %v4049_v60  ;;  %v6113_v22 = vrot.slane %v10183_v58, 4  ;;  %v5948_v28 = vrot.slane %v5193_v20, 7  ;;  %v5209_v51 = vrot.slane %v5188_v9, 3  ;;  %v5223_v29 = vrot.slane %v5196_v61, 3 }
 0x26c   : > { %8254 = vmatpush3.bf16.xpose.msra.mxu1 %v9128_v10  ;;  %8255 = vmatprep.mubr.msk.bf16.mxu1 %vm8427_vm1, %v10147_v23  ;;  %v5946_v10 = vsel %vm3732_vm3, %v5945_v5, %v5944_v4  ;;  %v6127_v48 = vrot.slane %v10184_v17, 4  ;;  %v5933_v6 = vsel %vm3735_vm4, %v5184_v8, %v5932_v25  ;;  %v5403_v37 = vsel %vm605_vm0, %v5398_v53, 0 }
 0x26d   : > { %8265 = vmatprep.subr.bf16.mxu1 %v10147_v23  ;;  %v5947_v59 = vsel %vm3735_vm4, %v5192_v62, %v5946_v10  ;;  %v5208_v60 = vsel %vm3744_vm7, %v5207_v14, %v5206_v32  ;;  %v5222_v1 = vsel %vm3744_vm7, %v5221_v13, %v5220_v16  ;;  %v6114_v2 = vsel %vm3747_vm8, %v6113_v22, %v6112_v49 }
 0x26e   : > { %v6128_v20 = vsel %vm3747_vm8, %v6127_v48, %v6126_v30  ;;  %v5936_v46 = vrot.slane %v5186_v41, 6  ;;  %v5950_v54 = vrot.slane %v5194_v57, 6  ;;  %v10185_v8 = vpack.c.b16 %v9109_v31, %v9106_v42 }
 0x26f   : > { %v5935_v40 = vsel %vm3738_vm5, %v5934_v11, %v5933_v6  ;;  %v5949_v62 = vsel %vm3738_vm5, %v5948_v28, %v5947_v59  ;;  %v5210_v0 = vsel %vm3747_vm8, %v5209_v51, %v5208_v60  ;;  %v5224_v50 = vsel %vm3747_vm8, %v5223_v29, %v5222_v1  ;;  %v9386_v6 = vld [vmem:[#allocation2 + $0x10] sm:$0xff] }
 0x270   : > { %v6129_v7 = vpack.c.b16 %v6128_v20, %v6114_v2  ;;  %v5938_v42 = vrot.slane %v5187_v38, 5  ;;  %v5952_v31 = vrot.slane %v5195_v52, 5  ;;  %v5937_v41 = vsel %vm3741_vm6, %v5936_v46, %v5935_v40  ;;  %v8069_v20 = vld.sshfl [vmem:[%s8884_s26] sm:$0x1 pattern:$0x76325410] }
 0x271   : > { %v5951_v57 = vsel %vm3741_vm6, %v5950_v54, %v5949_v62  ;;  %v5225_v24 = vpack.c.b16 %v5224_v50, %v5210_v0  ;;  %v5940_v5 = vrot.slane %v5188_v9, 4  ;;  %v5954_v63 = vrot.slane %v5196_v61, 4  ;;  %v9407_v46 = vld [vmem:[#allocation2 + $0x20] sm:$0xff] }
 0x272   : > { %v6134_v21 = vsel %vm605_vm0, %v6129_v7, 0  ;;  %v5939_v44 = vsel %vm3744_vm7, %v5938_v42, %v5937_v41  ;;  %v5953_v4 = vsel %vm3744_vm7, %v5952_v31, %v5951_v57  ;;  %v8071_v54 = vld.sshfl [vmem:[%s8884_s26 + $0x4] sm:$0x1 pattern:$0x76325410] }
 0x273   : > { %8256 = vmatmul.mubr.msk.bf16.vlgmr.msra.gmra.mrb[4].mxu1 %vm605_vm0, %v10185_v8  ;;  %v5941_v19 = vsel %vm3747_vm8, %v5940_v5, %v5939_v44  ;;  %v5955_v38 = vsel %vm3747_vm8, %v5954_v63, %v5953_v4  ;;  %v4925_v8 = vunpack.c.l.b16 %v8069_v20  ;;  %v8070_v40 = vld.sshfl [vmem:[%s8884_s26 + $0x2] sm:$0x1 pattern:$0x76325410]  ;;  %v4927_v62 = vunpack.c.l.b16 %v8071_v54  ;;  %v9416_v5 = vld [vmem:[#allocation2 + $0x28] sm:$0xff] }
 0x274   : > { %8266 = vmatpush3.bf16.xpose.msra.mxu1 %v5403_v37  ;;  %8267 = vmatprep.mubr.msk.bf16.mxu1 %vm8427_vm1, %v10147_v23  ;;  %v5956_v52 = vpack.c.b16 %v5955_v38, %v5941_v19  ;;  %v9388_v37 = vld [vmem:[#allocation2 + $0x18] sm:$0xff]  ;;  %v8072_v50 = vld.sshfl [vmem:[%s8884_s26 + $0x6] sm:$0x1 pattern:$0x76325410]  ;;  %v4926_v7 = vunpack.c.l.b16 %v8070_v40 }
 0x275   : > { %8277 = vmatprep.subr.bf16.mxu1 %v10147_v23  ;;  %v4941_v42 = vrot.slane %v4925_v8, 1  ;;  %v8073_v41 = vld.sshfl [vmem:[%s8884_s26 + $0x8] sm:$0x1 pattern:$0x76325410]  ;;  %v4928_v57 = vunpack.c.l.b16 %v8072_v50  ;;  %v9448_v40 = vld [vmem:[#allocation2 + $0x38] sm:$0xff] }
 0x276   : > { %v8074_v63 = vld.sshfl [vmem:[%s8884_s26 + $0xa] sm:$0x1 pattern:$0x76325410] }
 0x277   : > { %v4942_v44 = vsel %vm3729_vm2, %v4926_v7, %v4941_v42  ;;  %v8075_v19 = vld.sshfl [vmem:[%s8884_s26 + $0xc] sm:$0x1 pattern:$0x76325410]  ;;  %v4930_v38 = vunpack.c.l.b16 %v8074_v63 }
 0x278   : > { %v8081_v20 = vld.sshfl [vmem:[%s8884_s26 + $0x18] sm:$0x1 pattern:$0x76325410] }
 0x27b   : > { %8268 = vmatmul.mubr.msk.bf16.vlgmr.msra.gmra.mrb[8].mxu1 %vm605_vm0, %v5225_v24  ;;  %v4943_v24 = vrot.slane %v4927_v62, 7  ;;  %v8082_v62 = vld.sshfl [vmem:[%s8884_s26 + $0x1a] sm:$0x1 pattern:$0x76325410] }
 0x27c   : > { %8278 = vmatpush3.bf16.xpose.msra.mxu1 %v6134_v21  ;;  %8279 = vmatprep.mubr.msk.bf16.mxu1 %vm8427_vm1, %v10147_v23  ;;  %v4929_v21 = vunpack.c.l.b16 %v8073_v41 }
 0x283   : > { %8280 = vmatmul.mubr.msk.bf16.vlgmr.msra.gmra.mrb[12].mxu1 %vm605_vm0, %v5956_v52  ;;  %v4944_v52 = vsel %vm3732_vm3, %v4943_v24, %v4942_v44  ;;  %v4938_v24 = vunpack.c.l.b16 %v8082_v62  ;;  %v8084_v44 = vld.sshfl [vmem:[%s8884_s26 + $0x1e] sm:$0x1 pattern:$0x76325410] }
 0x33e   : > { %v9340_v26 = vpop.f32.mrb[0].mxu1 }
 0x33f   : > { %v8251_v9 = vpop.f32.mrb[1].mxu1 }
 0x340   : > { %v9342_v12 = vpop.f32.mrb[2].mxu1  ;;  %v4945_v9 = vrot.slane %v4928_v57, 6  ;;  %v8083_v57 = vld.sshfl [vmem:[%s8884_s26 + $0x1c] sm:$0x1 pattern:$0x76325410] }
 0x341   : > { %v8252_v56 = vpop.f32.mrb[3].mxu1 }
 0x346   : > { %v4708_v36 = vpop.f32.mrb[4].mxu1 }
 0x347   : > { %v9347_v35 = vsel %vm3550_vm10, %v4708_v36, -1e+30  ;;  %v8257_v34 = vpop.f32.mrb[5].mxu1 }
 0x348   : > { %v4711_v45 = vpop.f32.mrb[6].mxu1  ;;  %v4720_v53 = vsel %vm3989_vm11, %v9347_v35, -inf  ;;  %v8076_v36 = vld.sshfl [vmem:[%s8884_s26 + $0xe] sm:$0x1 pattern:$0x76325410] }
 0x349   : > { %v9354_v61 = vsel %vm3551_vm12, %v4711_v45, -1e+30  ;;  %4721 = vmax.xlane.f32.xlu0 %v4720_v53  ;;  %v8258_v18 = vpop.f32.mrb[7].mxu1  ;;  %v4947_v34 = vrot.slane %v4929_v21, 5 }
 0x34a   : > { %v4723_v55 = vsel %vm3989_vm11, %v9354_v61, -inf  ;;  %v8077_v53 = vld.sshfl [vmem:[%s8884_s26 + $0x10] sm:$0x1 pattern:$0x76325410]  ;;  %v4931_v18 = vunpack.c.l.b16 %v8075_v19  ;;  %v4939_v19 = vunpack.c.l.b16 %v8083_v57 }
 0x34b   : > { %4724 = vmax.xlane.f32.xlu1 %v4723_v55  ;;  %v4946_v55 = vsel %vm3735_vm4, %v4945_v9, %v4944_v52  ;;  %v9490_v57 = vld.sshfl [vmem:[%s8884_s26 + $0x16] sm:$0x2 pattern:$0x76325410] }
 0x34c   : > { %v4951_v8 = vrot.slane %v4931_v18, 3 }
 0x34e   : > { %v5439_v14 = vpop.f32.mrb[8].mxu1 }
 0x34f   : > { %v9361_v13 = vsel %vm3550_vm10, %v5439_v14, -1e+30  ;;  %v8269_v25 = vpop.f32.mrb[9].mxu1  ;;  %v9433_v14 = vld [vmem:[#allocation2 + $0x30] sm:$0xff] }
 0x350   : > { %v5442_v10 = vpop.f32.mrb[10].mxu1  ;;  %v5451_v32 = vsel %vm3989_vm11, %v9361_v13, -inf  ;;  %v8078_v25 = vld.sshfl [vmem:[%s8884_s26 + $0x12] sm:$0x1 pattern:$0x76325410] }
 0x351   : > { %v9368_v16 = vsel %vm3551_vm12, %v5442_v10, -1e+30  ;;  %5452 = vmax.xlane.f32.xlu0 %v5451_v32  ;;  %v8270_v58 = vpop.f32.mrb[11].mxu1  ;;  %v4933_v10 = vunpack.c.l.b16 %v8077_v53  ;;  %v4949_v32 = vrot.slane %v4930_v38, 4 }
 0x352   : > { %v5454_v22 = vsel %vm3989_vm11, %v9368_v16, -inf }
 0x355   : > { %5455 = vmax.xlane.f32.xlu0 %v5454_v22  ;;  %v8079_v22 = vld.sshfl [vmem:[%s8884_s26 + $0x14] sm:$0x1 pattern:$0x76325410] }
 0x356   : > { %v6170_v17 = vpop.f32.mrb[12].mxu1 }
 0x357   : > { %v9375_v48 = vsel %vm3550_vm10, %v6170_v17, -1e+30  ;;  %v8281_v49 = vpop.f32.mrb[13].mxu1  ;;  %v4934_v17 = vunpack.c.l.b16 %v8078_v25  ;;  %v4965_v25 = vrot.slane %v4939_v19, 3 }
 0x358   : > { %v6173_v30 = vpop.f32.mrb[14].mxu1  ;;  %v6182_v11 = vsel %vm3989_vm11, %v9375_v48, -inf  ;;  %v4948_v49 = vsel %vm3738_vm5, %v4947_v34, %v4946_v55  ;;  %v4963_v55 = vrot.slane %v4938_v24, 4 }
 0x359   : > { %v9382_v28 = vsel %vm3551_vm12, %v6173_v30, -1e+30  ;;  %6183 = vmax.xlane.f32.xlu0 %v6182_v11  ;;  %v8282_v51 = vpop.f32.mrb[15].mxu1  ;;  %v4950_v50 = vsel %vm3741_vm6, %v4949_v32, %v4948_v49 }
 0x35a   : > { %v6185_v29 = vsel %vm3989_vm11, %v9382_v28, -inf  ;;  %v8080_v11 = vld.sshfl [vmem:[%s8884_s26 + $0x16] sm:$0x1 pattern:$0x76325410]  ;;  %v4932_v51 = vunpack.c.l.b16 %v8076_v36  ;;  %v4940_v36 = vunpack.c.l.b16 %v8084_v44  ;;  %v4952_v34 = vsel %vm3744_vm7, %v4951_v8, %v4950_v50 }
 0x35b   : > { %v4936_v54 = vunpack.c.l.b16 %v8080_v11  ;;  %v8128_v8 = vld.sshfl [vmem:[%s8884_s26 + $0x12] sm:$0x2 pattern:$0x76325410] }
 0x35c   : > { %v4953_v38 = vrot.slane %v4932_v51, 2  ;;  %v4967_v32 = vrot.slane %v4940_v36, 2  ;;  %v4027_v51 = vsel %vm3989_vm11, %v9250_v33, 0.0  ;;  %v5667_v36 = vunpack.c.l.b16 %v9490_v57 }
 0x35d   : > { %6186 = vmax.xlane.f32.xlu0 %v6185_v29  ;;  %v4935_v29 = vunpack.c.l.b16 %v8079_v22  ;;  %v4959_v63 = vrot.slane %v4936_v54, 6  ;;  %v8127_v54 = vld.sshfl [vmem:[%s8884_s26 + $0x10] sm:$0x2 pattern:$0x76325410] }
 0x35e   : > { %v4954_v22 = vsel %vm3747_vm8, %v4953_v38, %v4952_v34  ;;  %v5664_v50 = vunpack.c.l.b16 %v8127_v54  ;;  %v9487_v33 = vld.sshfl [vmem:[%s8884_s26 + $0x6] sm:$0x2 pattern:$0x76325410] }
 0x35f   : > { %v4957_v42 = vrot.slane %v4935_v29, 7  ;;  %v4024_v29 = vsel %vm3989_vm11, %v9244_v39, 0.0  ;;  %v9494_v19 = vld.sshfl [vmem:[%s8884_s26 + $0x8] sm:$0x2 pattern:$0x76325410]  ;;  %v5659_v38 = vunpack.c.l.b16 %v9487_v33 }
 0x360   : > { %v9500_v34 = vld.sshfl [vmem:[%s8884_s26 + $0xa] sm:$0x2 pattern:$0x76325410] }
 0x3d6   : > { %v4722_v59 = vpop.xlane.xlu0 %4721 }
 0x3d7   : > { %v9391_v60 = vmax.f32 %v9386_v6, %v4722_v59  ;;  %v4955_v59 = vrot.slane %v4933_v10, 1 }
 0x3d8   : > { %v4725_v47 = vpop.xlane.xlu1 %4724 }
 0x3d9   : > { %v4728_v15 = vsub.f32 %v9386_v6, %v9391_v60  ;;  %5019 = vst.msk [vmem:[#allocation2 + $0x10] sm:$0xff] %vm588_vm9, %v9391_v60  ;;  %v9398_v1 = vmax.f32 %v9388_v37, %v4725_v47  ;;  %4736 = vperm.xlu0 %8337, %v9391_v60   ;;  %v4956_v7 = vsel %vm3729_vm2, %v4934_v17, %v4955_v59  ;;  %v8119_v59 = vld.sshfl [vmem:[%s8884_s26] sm:$0x2 pattern:$0x76325410] }
 0x3da   : > { %v4958_v52 = vsel %vm3732_vm3, %v4957_v42, %v4956_v7  ;;  %v5656_v62 = vunpack.c.l.b16 %v8119_v59  ;;  %v5665_v7 = vunpack.c.l.b16 %v8128_v8  ;;  %v8121_v42 = vld.sshfl [vmem:[%s8884_s26 + $0x4] sm:$0x2 pattern:$0x76325410] }
 0x3db   : > { %v4729_v2 = vsub.f32 %v9388_v37, %v9398_v1  ;;  %5020 = vst.msk [vmem:[#allocation2 + $0x18] sm:$0xff] %vm588_vm9, %v9398_v1  ;;  %4741 = vperm.xlu1 %8336, %v9398_v1   ;;  %v4960_v53 = vsel %vm3735_vm4, %v4959_v63, %v4958_v52  ;;  %v8129_v63 = vld.sshfl [vmem:[%s8884_s26 + $0x14] sm:$0x2 pattern:$0x76325410] }
 0x3dc   : > { %v5672_v24 = vrot.slane %v5656_v62, 2  ;;  %v5687_v44 = vrot.slane %v5665_v7, 1  ;;  %v8131_v52 = vld.sshfl [vmem:[%s8884_s26 + $0x18] sm:$0x2 pattern:$0x76325410] }
 0x3dd   : > { %v6418_v10 = vrot.slane %v5665_v7, 2 }
 0x3de   : > { %v5453_v0 = vpop.xlane.xlu0 %5452 }
 0x3df   : > { %v9413_v31 = vmax.f32 %v9407_v46, %v5453_v0  ;;  %v4937_v0 = vunpack.c.l.b16 %v8081_v20  ;;  %v8120_v20 = vld.sshfl [vmem:[%s8884_s26 + $0x2] sm:$0x2 pattern:$0x76325410] }
 0x3e1   : > { %5750 = vst.msk [vmem:[#allocation2 + $0x20] sm:$0xff] %vm588_vm9, %v9413_v31  ;;  %5467 = vperm.xlu1 %8336, %v9413_v31   ;;  %v4961_v9 = vrot.slane %v4937_v0, 5  ;;  %v5657_v0 = vunpack.c.l.b16 %v8120_v20  ;;  %v9517_v20 = vld.sshfl [vmem:[%s8884_s26 + $0x1c] sm:$0x2 pattern:$0x76325410] }
 0x3e2   : > { %v5456_v56 = vpop.xlane.xlu0 %5455 }
 0x3e3   : > { %v9429_v45 = vmax.f32 %v9416_v5, %v5456_v56  ;;  %v4962_v18 = vsel %vm3738_vm5, %v4961_v9, %v4960_v53  ;;  %v5673_v39 = vrot.slane %v5657_v0, 1  ;;  %v5658_v9 = vunpack.c.l.b16 %v8121_v42 }
 0x3e4   : > { %v4964_v17 = vsel %vm3741_vm6, %v4963_v55, %v4962_v18  ;;  %v5666_v53 = vunpack.c.l.b16 %v8129_v63  ;;  %v9504_v55 = vld.sshfl [vmem:[%s8884_s26 + $0xc] sm:$0x2 pattern:$0x76325410] }
 0x3e5   : > { %5751 = vst.msk [vmem:[#allocation2 + $0x28] sm:$0xff] %vm588_vm9, %v9429_v45  ;;  %5472 = vperm.xlu1 %8336, %v9429_v45   ;;  %v4966_v49 = vsel %vm3744_vm7, %v4965_v25, %v4964_v17  ;;  %v5674_v18 = vsel %vm3729_vm2, %v5673_v39, %v5672_v24  ;;  %v5660_v25 = vunpack.c.l.b16 %v9494_v19  ;;  %v5668_v17 = vunpack.c.l.b16 %v8131_v52  ;;  %v9522_v63 = vld.sshfl [vmem:[%s8884_s26 + $0xe] sm:$0x2 pattern:$0x76325410] }
 0x3e6   : > { %v6184_v30 = vpop.xlane.xlu0 %6183  ;;  %v5662_v54 = vunpack.c.l.b16 %v9504_v55  ;;  %v6403_v24 = vrot.slane %v5656_v62, 3  ;;  %v6404_v19 = vrot.slane %v5657_v0, 2  ;;  %v5670_v62 = vunpack.c.l.b16 %v9517_v20 }
 0x3e7   : > { %v9445_v47 = vmax.f32 %v9433_v14, %v6184_v30  ;;  %v4968_v30 = vsel %vm3747_vm8, %v4967_v32, %v4966_v49  ;;  %v5676_v49 = vrot.slane %v5659_v38, 7  ;;  %v5678_v42 = vrot.slane %v5660_v25, 6 }
 0x3e8   : > { %v4969_v11 = vpack.c.b16 %v4968_v30, %v4954_v22  ;;  %v8132_v22 = vld.sshfl [vmem:[%s8884_s26 + $0x1a] sm:$0x2 pattern:$0x76325410]  ;;  %v5661_v30 = vunpack.c.l.b16 %v9500_v34  ;;  %v6420_v58 = vrot.slane %v5666_v53, 1  ;;  %v6405_v7 = vsel %vm3729_vm2, %v6404_v19, %v6403_v24 }
 0x3e9   : > { %6481 = vst.msk [vmem:[#allocation2 + $0x30] sm:$0xff] %vm588_vm9, %v9445_v47  ;;  %6198 = vperm.xlu1 %8336, %v9445_v47   ;;  %v5669_v8 = vunpack.c.l.b16 %v8132_v22  ;;  %v8134_v22 = vld.sshfl [vmem:[%s8884_s26 + $0x1e] sm:$0x2 pattern:$0x76325410]  ;;  %v5696_v20 = vrot.slane %v5670_v62, 4  ;;  %v10192_v37 = vsub.f32 %v9433_v14, %v9445_v47 }
 0x3ea   : > { %v6187_v21 = vpop.xlane.xlu0 %6186  ;;  %8260 = vmatpush3.bf16.msra.mxu0 %v4969_v11  ;;  %v5675_v11 = vsel %vm3732_vm3, %v5658_v9, %v5674_v18  ;;  %v5680_v34 = vrot.slane %v5661_v30, 5  ;;  %v6409_v19 = vrot.slane %v5660_v25, 7  ;;  %v4020_v14 = vld [vmem:[#allocation3] sm:$0xff] }
 0x3eb   : > { %v9462_v56 = vmax.f32 %v9448_v40, %v6187_v21  ;;  %8271 = vmatprep.subr.bf16.mxu0 %v10147_v23  ;;  %v5686_v21 = vrot.slane %v5664_v50, 2  ;;  %v5694_v4 = vrot.slane %v5669_v8, 5  ;;  %v6192_v1 = vmul.f32 1.442695, %v10192_v37 }
 0x3ed   : > { %6482 = vst.msk [vmem:[#allocation2 + $0x38] sm:$0xff] %vm588_vm9, %v9462_v56  ;;  %6203 = vperm.xlu0 %8337, %v9462_v56   ;;  %v5688_v32 = vsel %vm3729_vm2, %v5687_v44, %v5686_v21  ;;  %v5677_v21 = vsel %vm3735_vm4, %v5676_v49, %v5675_v11  ;;  %v5692_v44 = vrot.slane %v5668_v17, 6  ;;  %v6406_v49 = vrot.slane %v5658_v9, 1 }
 0x3ee   : > { %v10193_v6 = vsub.f32 %v9448_v40, %v9462_v56 }
 0x3f0   : > { %v6194_v60 = vmul.f32 1.442695, %v10193_v6 }
 0x40c   : > { %4028 = vadd.xlane.f32.xlu0 %v4027_v51  ;;  %v5690_v51 = vrot.slane %v5667_v36, 7 }
 0x40d   : > { %4025 = vadd.xlane.f32.xlu1 %v4024_v29  ;;  %v5689_v29 = vsel %vm3732_vm3, %v5666_v53, %v5688_v32  ;;  %v6417_v32 = vrot.slane %v5664_v50, 3  ;;  %v5682_v50 = vrot.slane %v5662_v54, 4 }
 0x40e   : > { %v5691_v18 = vsel %vm3735_vm4, %v5690_v51, %v5689_v29  ;;  %v5671_v51 = vunpack.c.l.b16 %v8134_v22  ;;  %v6425_v22 = vrot.slane %v5669_v8, 6 }
 0x40f   : > { %v5693_v11 = vsel %vm3738_vm5, %v5692_v44, %v5691_v18 }
 0x410   : > { %v5698_v44 = vrot.slane %v5671_v51, 3 }
 0x458   : > { %v4737_v59 = vpop.permute.xlu0 %4736 }
 0x459   : > { %v4744_v39 = vsub.f32 %v9347_v35, %v4737_v59  ;;  %v5663_v35 = vunpack.c.l.b16 %v9522_v63  ;;  %v5679_v59 = vsel %vm3738_vm5, %v5678_v42, %v5677_v21  ;;  %v5695_v42 = vsel %vm3741_vm6, %v5694_v4, %v5693_v11 }
 0x45a   : > { %v4742_v52 = vpop.permute.xlu1 %4741  ;;  %v5681_v29 = vsel %vm3741_vm6, %v5680_v34, %v5679_v59  ;;  %v6427_v11 = vrot.slane %v5670_v62, 5 }
 0x45b   : > { %v4746_v41 = vmul.f32 1.442695, %v4744_v39  ;;  %v4745_v55 = vsub.f32 %v9354_v61, %v4742_v52  ;;  %v6419_v61 = vsel %vm3729_vm2, %v6418_v10, %v6417_v32  ;;  %v5683_v53 = vsel %vm3744_vm7, %v5682_v50, %v5681_v29 }
 0x45c   : > { %v6421_v63 = vsel %vm3732_vm3, %v6420_v58, %v6419_v61  ;;  %v5684_v21 = vrot.slane %v5663_v35, 3  ;;  %v5697_v10 = vsel %vm3744_vm7, %v5696_v20, %v5695_v42  ;;  %v6423_v52 = vrot.slane %v5668_v17, 7 }
 0x45d   : > { %8342 = vpow2.f32 %v4746_v41  ;;  %v4748_v0 = vmul.f32 1.442695, %v4745_v55  ;;  %v6407_v41 = vsel %vm3732_vm3, %v6406_v49, %v6405_v7  ;;  %v5699_v32 = vsel %vm3747_vm8, %v5698_v44, %v5697_v10 }
 0x45e   : > { %v6408_v4 = vsel %vm3735_vm4, %v5659_v38, %v6407_v41  ;;  %v5685_v18 = vsel %vm3747_vm8, %v5684_v21, %v5683_v53  ;;  %v6411_v55 = vrot.slane %v5661_v30, 6  ;;  %v6413_v49 = vrot.slane %v5662_v54, 5 }
 0x45f   : > { %8344 = vpow2.f32 %v4748_v0  ;;  %v6410_v59 = vsel %vm3738_vm5, %v6409_v19, %v6408_v4  ;;  %v5700_v0 = vpack.c.b16 %v5699_v32, %v5685_v18  ;;  %v6415_v54 = vrot.slane %v5663_v35, 4 }
 0x460   : > { %v5468_v39 = vpop.permute.xlu1 %5467  ;;  %v6412_v50 = vsel %vm3741_vm6, %v6411_v55, %v6410_v59  ;;  %v6429_v20 = vrot.slane %v5671_v51, 4  ;;  %v4730_v55 = vmul.f32 1.442695, %v4728_v15  ;;  %vm7271_vm2 = vcmask 58369  }
 0x461   : > { %v5475_v9 = vsub.f32 %v9361_v13, %v5468_v39  ;;  %v6422_v13 = vsel %vm3735_vm4, %v5667_v36, %v6421_v63  ;;  %v6414_v62 = vsel %vm3744_vm7, %v6413_v49, %v6412_v50  ;;  %vm7272_vm3 = vsmask.f32 1280 }
 0x462   : > { %v6424_v33 = vsel %vm3738_vm5, %v6423_v52, %v6422_v13  ;;  %v6416_v35 = vsel %vm3747_vm8, %v6415_v54, %v6414_v62  ;;  %v10187_v13 = vld [vmem:[#allocation8_spill] sm:$0xff]  ;;  %vm9893_vm4 = vmand %vm7271_vm2, %vm7272_vm3  ;;  %vm7551_vm5 = vsmask.f32 7942 }
 0x463   : > { %v5477_v24 = vmul.f32 1.442695, %v5475_v9  ;;  %v6426_v7 = vsel %vm3741_vm6, %v6425_v22, %v6424_v33  ;;  %v10190_v22 = vsub.f32 %v9416_v5, %v9429_v45  ;;  %vm10000_vm6 = vmand %vm7271_vm2, %vm7551_vm5 }
 0x464   : > { %v5473_v34 = vpop.permute.xlu1 %5472  ;;  %v6428_v39 = vsel %vm3744_vm7, %v6427_v11, %v6426_v7 }
 0x465   : > { %8346 = vpow2.f32 %v5477_v24  ;;  %v5476_v58 = vsub.f32 %v9368_v16, %v5473_v34  ;;  %v6430_v51 = vsel %vm3747_vm8, %v6429_v20, %v6428_v39  ;;  %v10186_v34 = vsub.f32 %v8881_v43, %v8895_v3 }
 0x466   : > { %v6431_v63 = vpack.c.b16 %v6430_v51, %v6416_v35  ;;  %v5463_v3 = vmul.f32 1.442695, %v10190_v22  ;;  %v10191_v43 = vsub.f32 %v9407_v46, %v9413_v31  ;;  %v4021_v31 = vld [vmem:[#allocation3 + $0x8] sm:$0xff] }
 0x467   : > { %v8343_v25 = vpop.eup %8342  ;;  %v5479_v17 = vmul.f32 1.442695, %v5476_v58  ;;  %v4002_v4 = vmul.f32 1.442695, %v10186_v34  ;;  %v10188_v58 = vld [vmem:[#allocation9_spill] sm:$0xff] }
 0x468   : > { %v6199_v38 = vpop.permute.xlu1 %6198  ;;  %v4755_v57 = vsel %vm3989_vm11, %v8343_v25, 0.0  ;;  %v10189_v18 = vsub.f32 %v10187_v13, %v10188_v58  ;;  %v4035_v58 = vld [vmem:[#allocation4] sm:$0xff] }
 0x469   : > { %v8345_v36 = vpop.eup %8344  ;;  %8348 = vpow2.f32 %v5479_v17  ;;  %v6206_v16 = vsub.f32 %v9375_v48, %v6199_v38  ;;  %4756 = vadd.xlane.f32.xlu1 %v4755_v57 }
 0x46a   : > { %v4758_v30 = vsel %vm3989_vm11, %v8345_v36, 0.0  ;;  %v4780_v8 = vpack.c.bf16 %v8345_v36, %v8343_v25  ;;  %v4000_v32 = vmul.f32 1.442695, %v10189_v18  ;;  %v5461_v25 = vmul.f32 1.442695, %v10191_v43  ;;  %v4036_v18 = vld [vmem:[#allocation4 + $0x8] sm:$0xff] }
 0x46b   : > { %v6208_v61 = vmul.f32 1.442695, %v6206_v16  ;;  %4759 = vadd.xlane.f32.xlu0 %v4758_v30  ;;  %v4751_v30 = vld [vmem:[#allocation3 + $0x10] sm:$0xff] }
 0x46c   : > { %8262 = vmatmul.mubr.msk.bf16.vlgmr.msra.gmra.mrb[4].mxu0 %vm3989_vm11, %v4780_v8  ;;  %v6204_v29 = vpop.permute.xlu0 %6203  ;;  %v4752_v8 = vld [vmem:[#allocation3 + $0x18] sm:$0xff] }
 0x46d   : > { %8350 = vpow2.f32 %v6208_v61  ;;  %v6207_v48 = vsub.f32 %v9382_v28, %v6204_v29  ;;  %8272 = vmatpush3.bf16.msra.mxu0 %v5700_v0  ;;  %8273 = vmatprep.mubr.msk.bf16.mxu0 %vm8427_vm1, %v10147_v23 }
 0x46e   : > { %8283 = vmatprep.subr.bf16.mxu0 %v10147_v23 }
 0x46f   : > { %v8347_v42 = vpop.eup %8346  ;;  %v6210_v9 = vmul.f32 1.442695, %v6207_v48  ;;  %v5482_v48 = vld [vmem:[#allocation3 + $0x20] sm:$0xff] }
 0x470   : > { %v5486_v41 = vsel %vm3989_vm11, %v8347_v42, 0.0 }
 0x471   : > { %8352 = vpow2.f32 %v6210_v9  ;;  %5487 = vadd.xlane.f32.xlu1 %v5486_v41 }
 0x472   : > { %8354 = vpow2.f32 %v4002_v4 }
 0x473   : > { %v8349_v28 = vpop.eup %8348  ;;  %8356 = vpow2.f32 %v4000_v32 }
 0x474   : > { %v5489_v53 = vsel %vm3989_vm11, %v8349_v28, 0.0  ;;  %v5511_v21 = vpack.c.bf16 %v8349_v28, %v8347_v42  ;;  %v5483_v42 = vld [vmem:[#allocation3 + $0x28] sm:$0xff]  ;;  %v6213_v28 = vld [vmem:[#allocation3 + $0x30] sm:$0xff] }
 0x475   : > { %5490 = vadd.xlane.f32.xlu0 %v5489_v53 }
 0x476   : > { %8274 = vmatmul.mubr.msk.bf16.vlgmr.msra.gmra.mrb[8].mxu0 %vm3989_vm11, %v5511_v21 }
 0x477   : > { %v8351_v44 = vpop.eup %8350  ;;  %8284 = vmatpush3.bf16.msra.mxu0 %v6431_v63  ;;  %8285 = vmatprep.mubr.msk.bf16.mxu0 %vm8427_vm1, %v10147_v23  ;;  %v4732_v23 = vmul.f32 1.442695, %v4729_v2  ;;  %vm6992_vm1 = vsmask.f32 7938 }
 0x478   : > { %v6217_v24 = vsel %vm3989_vm11, %v8351_v44, 0.0 }
 0x479   : > { %6218 = vadd.xlane.f32.xlu0 %v6217_v24  ;;  %8358 = vpow2.f32 %v4732_v23  ;;  %v6214_v24 = vld [vmem:[#allocation3 + $0x38] sm:$0xff] }
 0x47a   : > { %8360 = vpow2.f32 %v4730_v55 }
 0x47b   : > { %v8353_v10 = vpop.eup %8352  ;;  %8362 = vpow2.f32 %v5463_v3 }
 0x47c   : > { %v6220_v19 = vsel %vm3989_vm11, %v8353_v10, 0.0  ;;  %v6242_v52 = vpack.c.bf16 %v8353_v10, %v8351_v44  ;;  %8364 = vpow2.f32 %v5461_v25  ;;  %v8355_v15 = vpop.eup %8354 }
 0x47d   : > { %6221 = vadd.xlane.f32.xlu1 %v6220_v19  ;;  %v8357_v2 = vpop.eup %8356  ;;  %8366 = vpow2.f32 %v6192_v1  ;;  %v4023_v47 = vmul.f32 %v8355_v15, %v4021_v31  ;;  %v8430_v31 = vmov 1966171168  }
 0x47e   : > { %8286 = vmatmul.mubr.msk.bf16.vlgmr.msra.gmra.mrb[12].mxu0 %vm3989_vm11, %v6242_v52  ;;  %8368 = vpow2.f32 %v6194_v60  ;;  %v4022_v56 = vmul.f32 %v8357_v2, %v4020_v14 }
 0x483   : > { %v8359_v5 = vpop.eup %8358 }
 0x484   : > { %v8361_v45 = vpop.eup %8360  ;;  %v4754_v29 = vmul.f32 %v8359_v5, %v4752_v8 }
 0x485   : > { %v8363_v46 = vpop.eup %8362  ;;  %v4753_v50 = vmul.f32 %v8361_v45, %v4751_v30 }
 0x486   : > { %v8365_v17 = vpop.eup %8364  ;;  %v5485_v35 = vmul.f32 %v8363_v46, %v5483_v42 }
 0x487   : > { %v8367_v59 = vpop.eup %8366  ;;  %v5484_v62 = vmul.f32 %v8365_v17, %v5482_v48 }
 0x488   : > { %v8369_v33 = vpop.eup %8368  ;;  %v6215_v21 = vmul.f32 %v8367_v59, %v6213_v28 }
 0x489   : > { %v6216_v52 = vmul.f32 %v8369_v33, %v6214_v24  ;;  %v6739_v24 = vld [vmem:[%s9636_s14 + $0x10] sm:$0x1] }
 0x48e   : > { %4044 = vperm.xlu1 %8336, %v8355_v15  }
 0x48f   : > { %4039 = vperm.xlu0 %8337, %v8357_v2  }
 0x492   : > { %4775 = vperm.xlu1 %8336, %v8359_v5  }
 0x493   : > { %4770 = vperm.xlu0 %8337, %v8361_v45  }
 0x496   : > { %5506 = vperm.xlu1 %8336, %v8363_v46  }
 0x497   : > { %5501 = vperm.xlu0 %8337, %v8365_v17   ;;  %v6505_v17 = vunpack.c.l.s4 %v8430_v31 }
 0x499   : > { %v4029_v40 = vpop.xlane.xlu0 %4028 }
 0x49a   : > { %v4031_v38 = vadd.f32 %v4029_v40, %v4023_v47  ;;  %v4026_v57 = vpop.xlane.xlu1 %4025  ;;  %6232 = vperm.xlu1 %8336, %v8367_v59   ;;  %v6506_v47 = vunpack.c.0.s8 %v6505_v17  ;;  %v8431_v40 = vmov 857870592  }
 0x49b   : > { %v4030_v49 = vadd.f32 %v4026_v57, %v4022_v56  ;;  %6237 = vperm.xlu0 %8337, %v8369_v33   ;;  %v6585_v56 = vunpack.c.l.s4 %v8431_v40 }
 0x49c   : > { %4034 = vst.msk [vmem:[#allocation3 + $0x8] sm:$0xff] %vm588_vm9, %v4031_v38  ;;  %v9620_v57 = vsub.s32 %v6506_v47, %v8851_v27  ;;  %v6760_v47 = vld [vmem:[%s9636_s14 + $0x1e] sm:$0x1] }
 0x49d   : > { %4033 = vst.msk [vmem:[#allocation3] sm:$0xff] %vm588_vm9, %v4030_v49 }
 0x4a3   : > { %v6484_v36 = vld [vmem:[#allocation3 + $0x8] sm:$0xff] }
 0x4a4   : > { %8370 = vrcp.f32 %v6484_v36  ;;  %v6483_v16 = vld [vmem:[#allocation3] sm:$0xff] }
 0x4a5   : > { %8372 = vrcp.f32 %v6483_v16 }
 0x4ae   : > { %v8371_v0 = vpop.eup %8370 }
 0x4af   : > { %v8373_v11 = vpop.eup %8372  ;;  %6496 = vperm.xlu0 %8337, %v8371_v0   ;;  %v6586_v0 = vunpack.c.0.s8 %v6585_v56 }
 0x4b0   : > { %6491 = vperm.xlu1 %8336, %v8373_v11  }
 0x4f6   : > { %v4757_v7 = vpop.xlane.xlu1 %4756 }
 0x4f7   : > { %v4761_v61 = vadd.f32 %v4757_v7, %v4753_v50  ;;  %v4766_v50 = vld [vmem:[#allocation4 + $0x10] sm:$0xff]  ;;  %v4767_v7 = vld [vmem:[#allocation4 + $0x18] sm:$0xff] }
 0x4f8   : > { %v4760_v54 = vpop.xlane.xlu0 %4759 }
 0x4f9   : > { %4763 = vst.msk [vmem:[#allocation3 + $0x10] sm:$0xff] %vm588_vm9, %v4761_v61  ;;  %v4762_v20 = vadd.f32 %v4760_v54, %v4754_v29  ;;  %v9625_v29 = vsub.s32 %v6586_v0, %v8851_v27 }
 0x4fb   : > { %4764 = vst.msk [vmem:[#allocation3 + $0x18] sm:$0xff] %vm588_vm9, %v4762_v20 }
 0x4fe   : > { %v5488_v39 = vpop.xlane.xlu1 %5487 }
 0x4ff   : > { %v5492_v9 = vadd.f32 %v5488_v39, %v5484_v62 }
 0x500   : > { %v6763_v41 = vld [vmem:[#allocation3 + $0x10] sm:$0xff] }
 0x501   : > { %5494 = vst.msk [vmem:[#allocation3 + $0x20] sm:$0xff] %vm588_vm9, %v5492_v9  ;;  %8374 = vrcp.f32 %v6763_v41 }
 0x502   : > { %v5491_v51 = vpop.xlane.xlu0 %5490  ;;  %v6764_v63 = vld [vmem:[#allocation3 + $0x18] sm:$0xff] }
 0x503   : > { %v5493_v53 = vadd.f32 %v5491_v51, %v5485_v35  ;;  %8376 = vrcp.f32 %v6764_v63 }
 0x505   : > { %5495 = vst.msk [vmem:[#allocation3 + $0x28] sm:$0xff] %vm588_vm9, %v5493_v53 }
 0x506   : > { %v6219_v44 = vpop.xlane.xlu0 %6218 }
 0x507   : > { %v6223_v10 = vadd.f32 %v6219_v44, %v6215_v21 }
 0x508   : > { %v7042_v19 = vld [vmem:[#allocation3 + $0x20] sm:$0xff] }
 0x509   : > { %6225 = vst.msk [vmem:[#allocation3 + $0x30] sm:$0xff] %vm588_vm9, %v6223_v10  ;;  %8378 = vrcp.f32 %v7042_v19 }
 0x50a   : > { %v6222_v34 = vpop.xlane.xlu1 %6221 }
 0x50b   : > { %v8375_v4 = vpop.eup %8374  ;;  %v6224_v13 = vadd.f32 %v6222_v34, %v6216_v52 }
 0x50c   : > { %6771 = vperm.xlu1 %8336, %v8375_v4   ;;  %v7043_v32 = vld [vmem:[#allocation3 + $0x28] sm:$0xff] }
 0x50d   : > { %v8377_v23 = vpop.eup %8376  ;;  %6226 = vst.msk [vmem:[#allocation3 + $0x38] sm:$0xff] %vm588_vm9, %v6224_v13  ;;  %8380 = vrcp.f32 %v7043_v32  ;;  %v6742_v32 = vld [vmem:[%s9636_s14 + $0x12] sm:$0x1] }
 0x50e   : > { %v4040_v55 = vpop.permute.xlu0 %4039  ;;  %v4045_v22 = vpop.permute.xlu1 %4044  ;;  %6776 = vperm.xlu0 %8337, %v8377_v23   ;;  %v6745_v23 = vld [vmem:[%s9636_s14 + $0x14] sm:$0x1] }
 0x50f   : > { %v4047_v3 = vmul.f32 %v4040_v55, %v4035_v58  ;;  %v4048_v43 = vmul.f32 %v4045_v22, %v4036_v18  ;;  %v6751_v55 = vld [vmem:[%s9636_s14 + $0x18] sm:$0x1] }
 0x510   : > { %v7322_v25 = vld [vmem:[#allocation3 + $0x30] sm:$0xff] }
 0x511   : > { %v4284_v37 = vadd.f32 %v9340_v26, %v4047_v3  ;;  %v4285_v1 = vadd.f32 %v9342_v12, %v4048_v43  ;;  %8382 = vrcp.f32 %v7322_v25 }
 0x512   : > { %v4771_v5 = vpop.permute.xlu0 %4770  ;;  %v4776_v26 = vpop.permute.xlu1 %4775 }
 0x513   : > { %v8379_v6 = vpop.eup %8378  ;;  %4286 = vst.msk [vmem:[#allocation4] sm:$0xff] %vm605_vm0, %v4284_v37  ;;  %4287 = vst.msk [vmem:[#allocation4 + $0x8] sm:$0xff] %vm605_vm0, %v4285_v1  ;;  %v9629_v62 = vmul.f32 %v4771_v5, %v4766_v50  ;;  %v9631_v39 = vmul.f32 %v4776_v26, %v4767_v7  ;;  %v6748_v37 = vld [vmem:[%s9636_s14 + $0x16] sm:$0x1]  ;;  %v6754_v1 = vld [vmem:[%s9636_s14 + $0x1a] sm:$0x1] }
 0x514   : > { %7050 = vperm.xlu1 %8336, %v8379_v6   ;;  %v7323_v60 = vld [vmem:[#allocation3 + $0x38] sm:$0xff] }
 0x515   : > { %8384 = vrcp.f32 %v7323_v60  ;;  %v6757_v6 = vld [vmem:[%s9636_s14 + $0x1c] sm:$0x1] }
 0x516   : > { %v9610_v12 = vpop.permute.xlu0 %5501  ;;  %v9612_v46 = vpop.permute.xlu1 %5506 }
 0x517   : > { %v8381_v15 = vpop.eup %8380 }
 0x518   : > { %7055 = vperm.xlu0 %8337, %v8381_v15  }
 0x51a   : > { %v9614_v14 = vpop.permute.xlu0 %6237  ;;  %v9616_v59 = vpop.permute.xlu1 %6232  ;;  %v6488_v33 = vld [vmem:[#allocation4 + $0x8] sm:$0xff]  ;;  %v6487_v36 = vld [vmem:[#allocation4] sm:$0xff] }
 0x51b   : > { %v8383_v2 = vpop.eup %8382 }
 0x51c   : > { %7330 = vperm.xlu1 %8336, %v8383_v2  }
 0x51f   : > { %v8385_v45 = vpop.eup %8384 }
 0x520   : > { %7335 = vperm.xlu0 %8337, %v8385_v45  }
 0x52e   : > { %v6497_v38 = vpop.permute.xlu0 %6496 }
 0x52f   : > { %v6500_v49 = vmul.f32 %v6497_v38, %v6488_v33  ;;  %v6492_v16 = vpop.permute.xlu1 %6491 }
 0x530   : > { %v6499_v11 = vmul.f32 %v6492_v16, %v6487_v36 }
 0x531   : > { %v8186_v30 = vpack.c.bf16 %v6500_v49, %v6500_v49 }
 0x532   : > { %v6501_v8 = vpack.c.bf16 %v6500_v49, %v6499_v11 }
 0x533   : > { %v6517_v61 = vrot.slane %v8186_v30, %v9620_v57  ;;  %v6715_v30 = vld [vmem:[%s9636_s14] sm:$0x1] }
 0x534   : > { %v6510_v54 = vrot.slane %v6501_v8, %v9620_v57  ;;  %v6718_v8 = vld [vmem:[%s9636_s14 + $0x2] sm:$0x1] }
 0x535   : > { %v6519_v20 = vcombine.high %v6517_v61, %v6517_v61  ;;  %v6533_v48 = vrot.slane %v6517_v61, %v9620_v57 }
 0x536   : > { %v6518_v42 = vcombine.high %v6510_v54, %v6510_v54  ;;  %v9639_v27 = vrot.slane %v6510_v54, %v9620_v57 }
 0x537   : > { %v6547_v9 = vrot.slane %v6519_v20, %v9620_v57  ;;  %v6549_v41 = vcombine.high %v6533_v48, %v6533_v48  ;;  %v6561_v35 = vunpack.i.h.s16 %v6533_v48  ;;  %v8191_v51 = vpack.i.b16 %v6533_v48, %v6533_v48 }
 0x538   : > { %v9643_v28 = vrot.slane %v6518_v42, %v9620_v57  ;;  %v9647_v63 = vcombine.high %v9639_v27, %v9639_v27  ;;  %v6553_v53 = vunpack.i.h.s16 %v9639_v27  ;;  %v8187_v21 = vpack.i.b16 %v9639_v27, %v9639_v27  ;;  %v6721_v42 = vld [vmem:[%s9636_s14 + $0x4] sm:$0x1] }
 0x539   : > { %v6551_v10 = vcombine.high %v6547_v9, %v6547_v9  ;;  %v6563_v19 = vunpack.i.h.s16 %v6547_v9  ;;  %v6565_v52 = vunpack.i.h.s16 %v6549_v41  ;;  %v6577_v34 = vpack.i.b16 %v6561_v35, %v6561_v35 }
 0x53a   : > { %v8192_v4 = vpack.i.b16 %v6547_v9, %v6547_v9  ;;  %v8193_v13 = vpack.i.b16 %v6549_v41, %v6549_v41  ;;  %v6646_v58 = vrot.slane %v8191_v51, %v9625_v29  ;;  %v9662_v18 = vcombine.high %v9643_v28, %v9643_v28  ;;  %v6724_v9 = vld [vmem:[%s9636_s14 + $0x6] sm:$0x1] }
 0x53b   : > { %v6567_v22 = vunpack.i.h.s16 %v6551_v10  ;;  %v6579_v3 = vpack.i.b16 %v6563_v19, %v6563_v19  ;;  %v6581_v43 = vpack.i.b16 %v6565_v52, %v6565_v52  ;;  %v8194_v25 = vpack.i.b16 %v6551_v10, %v6551_v10  ;;  %v6733_v10 = vld [vmem:[%s9636_s14 + $0xc] sm:$0x1] }
 0x53c   : > { %v6653_v60 = vrot.slane %v6577_v34, %v9625_v29  ;;  %v6660_v15 = vrot.slane %v8192_v4, %v9625_v29  ;;  %v6674_v2 = vrot.slane %v8193_v13, %v9625_v29  ;;  %v6740_v5 = vsel %vm9654_vm15, %v6646_v58, %v6739_v24  ;;  %v6736_v13 = vld [vmem:[%s9636_s14 + $0xe] sm:$0x1] }
 0x53d   : > { %v6583_v45 = vpack.i.b16 %v6567_v22, %v6567_v22  ;;  %v6667_v26 = vrot.slane %v6579_v3, %v9625_v29  ;;  %v6681_v31 = vrot.slane %v6581_v43, %v9625_v29  ;;  %v6688_v17 = vrot.slane %v8194_v25, %v9625_v29  ;;  %6741 = vst [vmem:[%s9636_s14 + $0x10] sm:$0x1] %v6740_v5  ;;  %v5497_v3 = vld [vmem:[#allocation4 + $0x20] sm:$0xff]  ;;  %v5498_v5 = vld [vmem:[#allocation4 + $0x28] sm:$0xff] }
 0x53e   : > { %v6743_v40 = vsel %vm9654_vm15, %v6653_v60, %v6742_v32  ;;  %v6746_v56 = vsel %vm9654_vm15, %v6660_v15, %v6745_v23  ;;  %v6752_v33 = vsel %vm9654_vm15, %v6674_v2, %v6751_v55  ;;  %v6555_v38 = vunpack.i.h.s16 %v9643_v28 }
 0x53f   : > { %v6695_v49 = vrot.slane %v6583_v45, %v9625_v29  ;;  %6744 = vst [vmem:[%s9636_s14 + $0x12] sm:$0x1] %v6743_v40  ;;  %6747 = vst [vmem:[%s9636_s14 + $0x14] sm:$0x1] %v6746_v56  ;;  %v6749_v36 = vsel %vm9654_vm15, %v6667_v26, %v6748_v37  ;;  %v6755_v16 = vsel %vm9654_vm15, %v6681_v31, %v6754_v1  ;;  %v5008_v11 = vpop.f32.mrb[4].mxu0  ;;  %v6557_v50 = vunpack.i.h.s16 %v9647_v63  ;;  %v6229_v56 = vld [vmem:[#allocation4 + $0x38] sm:$0xff] }
 0x540   : > { %6753 = vst [vmem:[%s9636_s14 + $0x18] sm:$0x1] %v6752_v33  ;;  %v6758_v0 = vsel %vm9654_vm15, %v6688_v17, %v6757_v6  ;;  %6750 = vst [vmem:[%s9636_s14 + $0x16] sm:$0x1] %v6749_v36  ;;  %v6559_v7 = vunpack.i.h.s16 %v9662_v18  ;;  %v6569_v61 = vpack.i.b16 %v6553_v53, %v6553_v53  ;;  %v8188_v54 = vpack.i.b16 %v9643_v28, %v9643_v28  ;;  %v8263_v20 = vpop.f32.mrb[5].mxu0 }
 0x541   : > { %6756 = vst [vmem:[%s9636_s14 + $0x1a] sm:$0x1] %v6755_v16  ;;  %6759 = vst [vmem:[%s9636_s14 + $0x1c] sm:$0x1] %v6758_v0  ;;  %v6761_v48 = vsel %vm9654_vm15, %v6695_v49, %v6760_v47  ;;  %v6571_v41 = vpack.i.b16 %v6555_v38, %v6555_v38  ;;  %v8189_v35 = vpack.i.b16 %v9647_v63, %v9647_v63  ;;  %v5011_v24 = vpop.f32.mrb[6].mxu0 }
 0x542   : > { %v8190_v51 = vpack.i.b16 %v9662_v18, %v9662_v18  ;;  %6762 = vst [vmem:[%s9636_s14 + $0x1e] sm:$0x1] %v6761_v48  ;;  %v6727_v53 = vld [vmem:[%s9636_s14 + $0x8] sm:$0x1]  ;;  %v6573_v28 = vpack.i.b16 %v6557_v50, %v6557_v50  ;;  %v6575_v19 = vpack.i.b16 %v6559_v7, %v6559_v7  ;;  %v6590_v52 = vrot.slane %v8187_v21, %v9625_v29  ;;  %v8264_v4 = vpop.f32.mrb[7].mxu0 }
 0x543   : > { %v6597_v34 = vrot.slane %v6569_v61, %v9625_v29  ;;  %v6730_v63 = vld [vmem:[%s9636_s14 + $0xa] sm:$0x1]  ;;  %v6604_v58 = vrot.slane %v8188_v54, %v9625_v29  ;;  %v6611_v18 = vrot.slane %v6571_v41, %v9625_v29  ;;  %v6618_v32 = vrot.slane %v8189_v35, %v9625_v29 }
 0x544   : > { %v6632_v23 = vrot.slane %v8190_v51, %v9625_v29  ;;  %v6625_v27 = vrot.slane %v6573_v28, %v9625_v29  ;;  %v6639_v21 = vrot.slane %v6575_v19, %v9625_v29  ;;  %v6716_v55 = vsel %vm9654_vm15, %v6590_v52, %v6715_v30 }
 0x545   : > { %v6719_v22 = vsel %vm9654_vm15, %v6597_v34, %v6718_v8  ;;  %6717 = vst [vmem:[%s9636_s14] sm:$0x1] %v6716_v55  ;;  %v6722_v43 = vsel %vm9654_vm15, %v6604_v58, %v6721_v42  ;;  %v6725_v25 = vsel %vm9654_vm15, %v6611_v18, %v6724_v9  ;;  %v6728_v37 = vsel %vm9654_vm15, %v6618_v32, %v6727_v53 }
 0x546   : > { %6720 = vst [vmem:[%s9636_s14 + $0x2] sm:$0x1] %v6719_v22  ;;  %v6734_v1 = vsel %vm9654_vm15, %v6632_v23, %v6733_v10  ;;  %6723 = vst [vmem:[%s9636_s14 + $0x4] sm:$0x1] %v6722_v43  ;;  %v6731_v6 = vsel %vm9654_vm15, %v6625_v27, %v6730_v63  ;;  %v6737_v60 = vsel %vm9654_vm15, %v6639_v21, %v6736_v13 }
 0x547   : > { %6726 = vst [vmem:[%s9636_s14 + $0x6] sm:$0x1] %v6725_v25  ;;  %6729 = vst [vmem:[%s9636_s14 + $0x8] sm:$0x1] %v6728_v37  ;;  %v5015_v15 = vadd.f32 %v5008_v11, %v9629_v62  ;;  %v5016_v2 = vadd.f32 %v5011_v24, %v9631_v39  ;;  %v5509_v45 = vmul.f32 %v9610_v12, %v5497_v3  ;;  %v6228_v39 = vld [vmem:[#allocation4 + $0x30] sm:$0xff] }
 0x548   : > { %6735 = vst [vmem:[%s9636_s14 + $0xc] sm:$0x1] %v6734_v1  ;;  %6732 = vst [vmem:[%s9636_s14 + $0xa] sm:$0x1] %v6731_v6  ;;  %v5510_v31 = vmul.f32 %v9612_v46, %v5498_v5  ;;  %v6240_v12 = vmul.f32 %v9616_v59, %v6228_v39  ;;  %v6241_v38 = vmul.f32 %v9614_v14, %v6229_v56 }
 0x549   : > { %6738 = vst [vmem:[%s9636_s14 + $0xe] sm:$0x1] %v6737_v60  ;;  %5017 = vst.msk [vmem:[#allocation4 + $0x10] sm:$0xff] %vm605_vm0, %v5015_v15  ;;  %v5739_v26 = vpop.f32.mrb[8].mxu0 }
 0x54a   : > { %5018 = vst.msk [vmem:[#allocation4 + $0x18] sm:$0xff] %vm605_vm0, %v5016_v2  ;;  %v5746_v17 = vadd.f32 %v5739_v26, %v5509_v45  ;;  %v8275_v47 = vpop.f32.mrb[9].mxu0 }
 0x54b   : > { %v5742_v44 = vpop.f32.mrb[10].mxu0 }
 0x54c   : > { %5748 = vst.msk [vmem:[#allocation4 + $0x20] sm:$0xff] %vm605_vm0, %v5746_v17  ;;  %v5747_v62 = vadd.f32 %v5742_v44, %v5510_v31  ;;  %v8276_v40 = vpop.f32.mrb[11].mxu0 }
 0x54e   : > { %5749 = vst.msk [vmem:[#allocation4 + $0x28] sm:$0xff] %vm605_vm0, %v5747_v62 }
 0x550   : > { %v6767_v30 = vld [vmem:[#allocation4 + $0x10] sm:$0xff] }
 0x551   : > { %v6470_v33 = vpop.f32.mrb[12].mxu0  ;;  %v6768_v50 = vld [vmem:[#allocation4 + $0x18] sm:$0xff] }
 0x552   : > { %v6477_v49 = vadd.f32 %v6470_v33, %v6240_v12  ;;  %v8287_v36 = vpop.f32.mrb[13].mxu0 }
 0x553   : > { %v6473_v16 = vpop.f32.mrb[14].mxu0  ;;  %v6997_v36 = vld [vmem:[%s9636_s14 + $0x2] sm:$0x1] }
 0x554   : > { %6479 = vst.msk [vmem:[#allocation4 + $0x30] sm:$0xff] %vm605_vm0, %v6477_v49  ;;  %v6478_v46 = vadd.f32 %v6473_v16, %v6241_v38  ;;  %v8288_v0 = vpop.f32.mrb[15].mxu0  ;;  %v6994_v49 = vld [vmem:[%s9636_s14] sm:$0x1]  ;;  %v7000_v16 = vld [vmem:[%s9636_s14 + $0x4] sm:$0x1] }
 0x555   : > { %v7021_v0 = vld [vmem:[%s9636_s14 + $0x12] sm:$0x1] }
 0x556   : > { %6480 = vst.msk [vmem:[#allocation4 + $0x38] sm:$0xff] %vm605_vm0, %v6478_v46  ;;  %vm9782_vm0 = vmand %vm6712_vm13, %vm6992_vm1  ;;  %v7018_v46 = vld [vmem:[%s9636_s14 + $0x10] sm:$0x1] }
 0x58b   : > { %v6772_v11 = vpop.permute.xlu1 %6771 }
 0x58c   : > { %v6779_v7 = vmul.f32 %v6772_v11, %v6767_v30 }
 0x58d   : > { %v6777_v8 = vpop.permute.xlu0 %6776 }
 0x58e   : > { %v6780_v61 = vmul.f32 %v6777_v8, %v6768_v50 }
 0x590   : > { %v6781_v54 = vpack.c.bf16 %v6780_v61, %v6779_v7  ;;  %v8195_v59 = vpack.c.bf16 %v6780_v61, %v6780_v61  ;;  %v7003_v7 = vld [vmem:[%s9636_s14 + $0x6] sm:$0x1]  ;;  %v7006_v61 = vld [vmem:[%s9636_s14 + $0x8] sm:$0x1] }
 0x592   : > { %v6790_v20 = vrot.slane %v6781_v54, %v9620_v57  ;;  %v6797_v14 = vrot.slane %v8195_v59, %v9620_v57  ;;  %v7009_v54 = vld [vmem:[%s9636_s14 + $0xa] sm:$0x1]  ;;  %v7024_v59 = vld [vmem:[%s9636_s14 + $0x14] sm:$0x1] }
 0x593   : > { %v7051_v33 = vpop.permute.xlu1 %7050 }
 0x594   : > { %v6798_v48 = vcombine.high %v6790_v20, %v6790_v20  ;;  %v6799_v42 = vcombine.high %v6797_v14, %v6797_v14  ;;  %v6806_v9 = vrot.slane %v6790_v20, %v9620_v57  ;;  %v6813_v41 = vrot.slane %v6797_v14, %v9620_v57 }
 0x596   : > { %v6820_v35 = vrot.slane %v6798_v48, %v9620_v57  ;;  %v6827_v51 = vrot.slane %v6799_v42, %v9620_v57  ;;  %v6828_v24 = vcombine.high %v6806_v9, %v6806_v9  ;;  %v6829_v53 = vcombine.high %v6813_v41, %v6813_v41 }
 0x597   : > { %v6833_v10 = vunpack.i.h.s16 %v6806_v9  ;;  %v6841_v28 = vunpack.i.h.s16 %v6813_v41  ;;  %v8196_v19 = vpack.i.b16 %v6806_v9, %v6806_v9  ;;  %v8200_v52 = vpack.i.b16 %v6813_v41, %v6813_v41  ;;  %v7056_v38 = vpop.permute.xlu0 %7055  ;;  %v7012_v9 = vld [vmem:[%s9636_s14 + $0xc] sm:$0x1]  ;;  %v7015_v41 = vld [vmem:[%s9636_s14 + $0xe] sm:$0x1] }
 0x598   : > { %v6830_v34 = vcombine.high %v6820_v35, %v6820_v35  ;;  %v6831_v4 = vcombine.high %v6827_v51, %v6827_v51  ;;  %v6835_v63 = vunpack.i.h.s16 %v6820_v35  ;;  %v6837_v13 = vunpack.i.h.s16 %v6828_v24 }
 0x599   : > { %v6843_v58 = vunpack.i.h.s16 %v6827_v51  ;;  %v6845_v18 = vunpack.i.h.s16 %v6829_v53  ;;  %v6849_v32 = vpack.i.b16 %v6833_v10, %v6833_v10  ;;  %v8197_v23 = vpack.i.b16 %v6820_v35, %v6820_v35  ;;  %v7030_v35 = vld [vmem:[%s9636_s14 + $0x18] sm:$0x1] }
 0x59a   : > { %v6839_v27 = vunpack.i.h.s16 %v6830_v34  ;;  %v6847_v21 = vunpack.i.h.s16 %v6831_v4  ;;  %v6851_v55 = vpack.i.b16 %v6835_v63, %v6835_v63  ;;  %v8198_v22 = vpack.i.b16 %v6828_v24, %v6828_v24 }
 0x59b   : > { %v6853_v3 = vpack.i.b16 %v6837_v13, %v6837_v13  ;;  %v8199_v43 = vpack.i.b16 %v6830_v34, %v6830_v34  ;;  %v6857_v25 = vpack.i.b16 %v6841_v28, %v6841_v28  ;;  %v8201_v37 = vpack.i.b16 %v6827_v51, %v6827_v51  ;;  %v7027_v28 = vld [vmem:[%s9636_s14 + $0x16] sm:$0x1] }
 0x59c   : > { %v6855_v1 = vpack.i.b16 %v6839_v27, %v6839_v27  ;;  %v9772_v6 = vpack.i.b16 %v6843_v58, %v6843_v58  ;;  %v8202_v60 = vpack.i.b16 %v6829_v53, %v6829_v53  ;;  %v9774_v15 = vpack.i.b16 %v6845_v18, %v6845_v18  ;;  %v7331_v58 = vpop.permute.xlu1 %7330 }
 0x59d   : > { %v8203_v2 = vpack.i.b16 %v6831_v4, %v6831_v4  ;;  %v9776_v5 = vpack.i.b16 %v6847_v21, %v6847_v21  ;;  %v6870_v45 = vrot.slane %v8196_v19, %v9625_v29  ;;  %v6877_v26 = vrot.slane %v6849_v32, %v9625_v29  ;;  %v7033_v19 = vld [vmem:[%s9636_s14 + $0x1a] sm:$0x1]  ;;  %v7039_v32 = vld [vmem:[%s9636_s14 + $0x1e] sm:$0x1] }
 0x59e   : > { %v6884_v17 = vrot.slane %v8197_v23, %v9625_v29  ;;  %v6891_v47 = vrot.slane %v6851_v55, %v9625_v29  ;;  %v6898_v44 = vrot.slane %v8198_v22, %v9625_v29  ;;  %v6905_v62 = vrot.slane %v6853_v3, %v9625_v29  ;;  %v7046_v22 = vld [vmem:[#allocation4 + $0x20] sm:$0xff]  ;;  %v7047_v3 = vld [vmem:[#allocation4 + $0x28] sm:$0xff] }
 0x59f   : > { %v6912_v40 = vrot.slane %v8199_v43, %v9625_v29  ;;  %v6919_v39 = vrot.slane %v6855_v1, %v9625_v29  ;;  %v6926_v56 = vrot.slane %v8200_v52, %v9625_v29  ;;  %v6933_v12 = vrot.slane %v6857_v25, %v9625_v29  ;;  %v7036_v52 = vld [vmem:[%s9636_s14 + $0x1c] sm:$0x1]  ;;  %v7336_v18 = vpop.permute.xlu0 %7335 }
 0x5a0   : > { %v6940_v11 = vrot.slane %v8201_v37, %v9625_v29  ;;  %v6947_v30 = vrot.slane %v9772_v6, %v9625_v29  ;;  %v6954_v8 = vrot.slane %v8202_v60, %v9625_v29  ;;  %v6961_v50 = vrot.slane %v9774_v15, %v9625_v29  ;;  %v7326_v6 = vld [vmem:[#allocation4 + $0x30] sm:$0xff]  ;;  %v7327_v60 = vld [vmem:[#allocation4 + $0x38] sm:$0xff] }
 0x5a1   : > { %v6968_v20 = vrot.slane %v8203_v2, %v9625_v29  ;;  %v6975_v14 = vrot.slane %v9776_v5, %v9625_v29  ;;  %v6995_v48 = vsel %vm9782_vm0, %v6870_v45, %v6994_v49  ;;  %v6998_v42 = vsel %vm9782_vm0, %v6877_v26, %v6997_v36 }
 0x5a2   : > { %6996 = vst [vmem:[%s9636_s14] sm:$0x1] %v6995_v48  ;;  %6999 = vst [vmem:[%s9636_s14 + $0x2] sm:$0x1] %v6998_v42  ;;  %v7001_v51 = vsel %vm9782_vm0, %v6884_v17, %v7000_v16  ;;  %v7004_v24 = vsel %vm9782_vm0, %v6891_v47, %v7003_v7  ;;  %v7007_v53 = vsel %vm9782_vm0, %v6898_v44, %v7006_v61 }
 0x5a3   : > { %v7010_v10 = vsel %vm9782_vm0, %v6905_v62, %v7009_v54  ;;  %7002 = vst [vmem:[%s9636_s14 + $0x4] sm:$0x1] %v7001_v51  ;;  %7005 = vst [vmem:[%s9636_s14 + $0x6] sm:$0x1] %v7004_v24  ;;  %v7013_v34 = vsel %vm9782_vm0, %v6912_v40, %v7012_v9  ;;  %v7016_v4 = vsel %vm9782_vm0, %v6919_v39, %v7015_v41 }
 0x5a4   : > { %7008 = vst [vmem:[%s9636_s14 + $0x8] sm:$0x1] %v7007_v53  ;;  %7011 = vst [vmem:[%s9636_s14 + $0xa] sm:$0x1] %v7010_v10  ;;  %v7019_v63 = vsel %vm9782_vm0, %v6926_v56, %v7018_v46  ;;  %v7022_v13 = vsel %vm9782_vm0, %v6933_v12, %v7021_v0  ;;  %v7025_v23 = vsel %vm9782_vm0, %v6940_v11, %v7024_v59 }
 0x5a5   : > { %7014 = vst [vmem:[%s9636_s14 + $0xc] sm:$0x1] %v7013_v34  ;;  %7017 = vst [vmem:[%s9636_s14 + $0xe] sm:$0x1] %v7016_v4  ;;  %v7028_v27 = vsel %vm9782_vm0, %v6947_v30, %v7027_v28  ;;  %v7031_v21 = vsel %vm9782_vm0, %v6954_v8, %v7030_v35  ;;  %v7034_v55 = vsel %vm9782_vm0, %v6961_v50, %v7033_v19 }
 0x5a6   : > { %7020 = vst [vmem:[%s9636_s14 + $0x10] sm:$0x1] %v7019_v63  ;;  %7023 = vst [vmem:[%s9636_s14 + $0x12] sm:$0x1] %v7022_v13  ;;  %v7037_v43 = vsel %vm9782_vm0, %v6968_v20, %v7036_v52  ;;  %v7040_v25 = vsel %vm9782_vm0, %v6975_v14, %v7039_v32  ;;  %v7058_v37 = vmul.f32 %v7051_v33, %v7046_v22  ;;  %v7283_v22 = vld [vmem:[%s9636_s14 + $0x6] sm:$0x2] }
 0x5a7   : > { %7026 = vst [vmem:[%s9636_s14 + $0x14] sm:$0x1] %v7025_v23  ;;  %7029 = vst [vmem:[%s9636_s14 + $0x16] sm:$0x1] %v7028_v27  ;;  %v7059_v1 = vmul.f32 %v7056_v38, %v7047_v3  ;;  %v7338_v15 = vmul.f32 %v7331_v58, %v7326_v6  ;;  %v7339_v2 = vmul.f32 %v7336_v18, %v7327_v60  ;;  %v7274_v58 = vld [vmem:[%s9636_s14] sm:$0x2] }
 0x5a8   : > { %7032 = vst [vmem:[%s9636_s14 + $0x18] sm:$0x1] %v7031_v21  ;;  %7035 = vst [vmem:[%s9636_s14 + $0x1a] sm:$0x1] %v7034_v55  ;;  %v7277_v18 = vld [vmem:[%s9636_s14 + $0x2] sm:$0x2] }
 0x5a9   : > { %7038 = vst [vmem:[%s9636_s14 + $0x1c] sm:$0x1] %v7037_v43  ;;  %7041 = vst [vmem:[%s9636_s14 + $0x1e] sm:$0x1] %v7040_v25  ;;  %v7060_v5 = vpack.c.bf16 %v7059_v1, %v7058_v37  ;;  %v8204_v45 = vpack.c.bf16 %v7059_v1, %v7059_v1  ;;  %v7340_v26 = vpack.c.bf16 %v7339_v2, %v7338_v15  ;;  %v7280_v55 = vld [vmem:[%s9636_s14 + $0x4] sm:$0x2] }
 0x5aa   : > { %v8213_v17 = vpack.c.bf16 %v7339_v2, %v7339_v2  ;;  %v7286_v3 = vld [vmem:[%s9636_s14 + $0x8] sm:$0x2]  ;;  %v7289_v6 = vld [vmem:[%s9636_s14 + $0xa] sm:$0x2]  ;;  %v7292_v60 = vld [vmem:[%s9636_s14 + $0xc] sm:$0x2] }
 0x5ab   : > { %v7069_v47 = vrot.slane %v7060_v5, %v9620_v57  ;;  %v7076_v44 = vrot.slane %v8204_v45, %v9620_v57  ;;  %v9870_v31 = vrot.slane %v7340_v26, %v9620_v57  ;;  %v7295_v15 = vld [vmem:[%s9636_s14 + $0xe] sm:$0x2] }
 0x5ac   : > { %v9873_v62 = vrot.slane %v8213_v17, %v9620_v57  ;;  %v7298_v17 = vld [vmem:[%s9636_s14 + $0x10] sm:$0x2] }
 0x5ad   : > { %v7077_v40 = vcombine.high %v7069_v47, %v7069_v47  ;;  %v7078_v39 = vcombine.high %v7076_v44, %v7076_v44  ;;  %v7085_v56 = vrot.slane %v7069_v47, %v9620_v57  ;;  %v7092_v12 = vrot.slane %v7076_v44, %v9620_v57  ;;  %v7301_v47 = vld [vmem:[%s9636_s14 + $0x12] sm:$0x2]  ;;  %v7304_v44 = vld [vmem:[%s9636_s14 + $0x14] sm:$0x2] }
 0x5ae   : > { %v7357_v33 = vcombine.high %v9870_v31, %v9870_v31  ;;  %v7358_v38 = vcombine.high %v9873_v62, %v9873_v62  ;;  %v9883_v49 = vrot.slane %v9870_v31, %v9620_v57  ;;  %v9887_v36 = vrot.slane %v9873_v62, %v9620_v57 }
 0x5af   : > { %v7099_v16 = vrot.slane %v7077_v40, %v9620_v57  ;;  %v7106_v46 = vrot.slane %v7078_v39, %v9620_v57  ;;  %v7107_v0 = vcombine.high %v7085_v56, %v7085_v56  ;;  %v7108_v11 = vcombine.high %v7092_v12, %v7092_v12 }
 0x5b0   : > { %v7112_v30 = vunpack.i.h.s16 %v7085_v56  ;;  %v7120_v8 = vunpack.i.h.s16 %v7092_v12  ;;  %v8205_v50 = vpack.i.b16 %v7085_v56, %v7085_v56  ;;  %v8209_v7 = vpack.i.b16 %v7092_v12, %v7092_v12 }
 0x5b1   : > { %v7109_v61 = vcombine.high %v7099_v16, %v7099_v16  ;;  %v7110_v54 = vcombine.high %v7106_v46, %v7106_v46  ;;  %v7114_v59 = vunpack.i.h.s16 %v7099_v16  ;;  %v7116_v20 = vunpack.i.h.s16 %v7107_v0 }
 0x5b2   : > { %v7122_v14 = vunpack.i.h.s16 %v7106_v46  ;;  %v7124_v48 = vunpack.i.h.s16 %v7108_v11  ;;  %v7128_v42 = vpack.i.b16 %v7112_v30, %v7112_v30  ;;  %v8206_v9 = vpack.i.b16 %v7099_v16, %v7099_v16  ;;  %v7307_v16 = vld [vmem:[%s9636_s14 + $0x16] sm:$0x2] }
 0x5b3   : > { %v7118_v41 = vunpack.i.h.s16 %v7109_v61  ;;  %v7126_v35 = vunpack.i.h.s16 %v7110_v54  ;;  %v7130_v51 = vpack.i.b16 %v7114_v59, %v7114_v59  ;;  %v8207_v24 = vpack.i.b16 %v7107_v0, %v7107_v0  ;;  %v7313_v0 = vld [vmem:[%s9636_s14 + $0x1a] sm:$0x2] }
 0x5b4   : > { %v7132_v53 = vpack.i.b16 %v7116_v20, %v7116_v20  ;;  %v8208_v10 = vpack.i.b16 %v7109_v61, %v7109_v61  ;;  %v7136_v28 = vpack.i.b16 %v7120_v8, %v7120_v8  ;;  %v8210_v19 = vpack.i.b16 %v7106_v46, %v7106_v46  ;;  %v7310_v46 = vld [vmem:[%s9636_s14 + $0x18] sm:$0x2]  ;;  %v7319_v61 = vld [vmem:[%s9636_s14 + $0x1e] sm:$0x2] }
 0x5b5   : > { %v7134_v52 = vpack.i.b16 %v7118_v41, %v7118_v41  ;;  %v7138_v34 = vpack.i.b16 %v7122_v14, %v7122_v14  ;;  %v8211_v4 = vpack.i.b16 %v7108_v11, %v7108_v11  ;;  %v7140_v63 = vpack.i.b16 %v7124_v48, %v7124_v48 }
 0x5b6   : > { %v8212_v32 = vpack.i.b16 %v7110_v54, %v7110_v54  ;;  %v9899_v23 = vpack.i.b16 %v7126_v35, %v7126_v35  ;;  %v7149_v27 = vrot.slane %v8205_v50, %v9625_v29  ;;  %v7156_v21 = vrot.slane %v7128_v42, %v9625_v29 }
 0x5b7   : > { %v7163_v43 = vrot.slane %v8206_v9, %v9625_v29  ;;  %v7170_v25 = vrot.slane %v7130_v51, %v9625_v29  ;;  %v7177_v37 = vrot.slane %v8207_v24, %v9625_v29  ;;  %v7184_v1 = vrot.slane %v7132_v53, %v9625_v29 }
 0x5b8   : > { %v7191_v2 = vrot.slane %v8208_v10, %v9625_v29  ;;  %v7198_v5 = vrot.slane %v7134_v52, %v9625_v29  ;;  %v7205_v45 = vrot.slane %v8209_v7, %v9625_v29  ;;  %v7212_v26 = vrot.slane %v7136_v28, %v9625_v29  ;;  %v7316_v7 = vld [vmem:[%s9636_s14 + $0x1c] sm:$0x2] }
 0x5b9   : > { %v7219_v40 = vrot.slane %v8210_v19, %v9625_v29  ;;  %v7226_v39 = vrot.slane %v7138_v34, %v9625_v29  ;;  %v7233_v56 = vrot.slane %v8211_v4, %v9625_v29  ;;  %v7240_v12 = vrot.slane %v7140_v63, %v9625_v29 }
 0x5ba   : > { %v7247_v11 = vrot.slane %v8212_v32, %v9625_v29  ;;  %v7254_v30 = vrot.slane %v9899_v23, %v9625_v29  ;;  %v7275_v8 = vsel %vm9893_vm4, %v7149_v27, %v7274_v58  ;;  %v7278_v50 = vsel %vm9893_vm4, %v7156_v21, %v7277_v18 }
 0x5bb   : > { %7276 = vst [vmem:[%s9636_s14] sm:$0x2] %v7275_v8  ;;  %7279 = vst [vmem:[%s9636_s14 + $0x2] sm:$0x2] %v7278_v50  ;;  %v7281_v54 = vsel %vm9893_vm4, %v7163_v43, %v7280_v55  ;;  %v7284_v59 = vsel %vm9893_vm4, %v7170_v25, %v7283_v22  ;;  %v7287_v20 = vsel %vm9893_vm4, %v7177_v37, %v7286_v3  ;;  %v7392_v63 = vunpack.i.h.s16 %v9883_v49 }
 0x5bc   : > { %v7290_v14 = vsel %vm9893_vm4, %v7184_v1, %v7289_v6  ;;  %7282 = vst [vmem:[%s9636_s14 + $0x4] sm:$0x2] %v7281_v54  ;;  %7285 = vst [vmem:[%s9636_s14 + $0x6] sm:$0x2] %v7284_v59  ;;  %v7293_v48 = vsel %vm9893_vm4, %v7191_v2, %v7292_v60  ;;  %v7296_v42 = vsel %vm9893_vm4, %v7198_v5, %v7295_v15  ;;  %v7400_v13 = vunpack.i.h.s16 %v9887_v36 }
 0x5bd   : > { %7288 = vst [vmem:[%s9636_s14 + $0x8] sm:$0x2] %v7287_v20  ;;  %7291 = vst [vmem:[%s9636_s14 + $0xa] sm:$0x2] %v7290_v14  ;;  %v7299_v9 = vsel %vm9893_vm4, %v7205_v45, %v7298_v17  ;;  %v7302_v41 = vsel %vm9893_vm4, %v7212_v26, %v7301_v47  ;;  %v7305_v35 = vsel %vm9893_vm4, %v7219_v40, %v7304_v44 }
 0x5be   : > { %7294 = vst [vmem:[%s9636_s14 + $0xc] sm:$0x2] %v7293_v48  ;;  %7297 = vst [vmem:[%s9636_s14 + $0xe] sm:$0x2] %v7296_v42  ;;  %v7308_v51 = vsel %vm9893_vm4, %v7226_v39, %v7307_v16  ;;  %v7311_v24 = vsel %vm9893_vm4, %v7233_v56, %v7310_v46  ;;  %v7314_v53 = vsel %vm9893_vm4, %v7240_v12, %v7313_v0 }
 0x5bf   : > { %7300 = vst [vmem:[%s9636_s14 + $0x10] sm:$0x2] %v7299_v9  ;;  %7303 = vst [vmem:[%s9636_s14 + $0x12] sm:$0x2] %v7302_v41  ;;  %v7317_v10 = vsel %vm9893_vm4, %v7247_v11, %v7316_v7  ;;  %v7320_v28 = vsel %vm9893_vm4, %v7254_v30, %v7319_v61  ;;  %v7379_v19 = vrot.slane %v7357_v33, %v9620_v57 }
 0x5c0   : > { %7306 = vst [vmem:[%s9636_s14 + $0x14] sm:$0x2] %v7305_v35  ;;  %7309 = vst [vmem:[%s9636_s14 + $0x16] sm:$0x2] %v7308_v51  ;;  %v7386_v52 = vrot.slane %v7358_v38, %v9620_v57  ;;  %v7387_v34 = vcombine.high %v9883_v49, %v9883_v49  ;;  %v7388_v4 = vcombine.high %v9887_v36, %v9887_v36 }
 0x5c1   : > { %7312 = vst [vmem:[%s9636_s14 + $0x18] sm:$0x2] %v7311_v24  ;;  %7315 = vst [vmem:[%s9636_s14 + $0x1a] sm:$0x2] %v7314_v53  ;;  %v7389_v58 = vcombine.high %v7379_v19, %v7379_v19  ;;  %v7394_v33 = vunpack.i.h.s16 %v7379_v19  ;;  %v8214_v57 = vpack.i.b16 %v9883_v49, %v9883_v49  ;;  %v7408_v62 = vpack.i.b16 %v7392_v63, %v7392_v63 }
 0x5c2   : > { %7318 = vst [vmem:[%s9636_s14 + $0x1c] sm:$0x2] %v7317_v10  ;;  %7321 = vst [vmem:[%s9636_s14 + $0x1e] sm:$0x2] %v7320_v28  ;;  %v7390_v31 = vcombine.high %v7386_v52, %v7386_v52  ;;  %v7402_v18 = vunpack.i.h.s16 %v7386_v52  ;;  %v7396_v32 = vunpack.i.h.s16 %v7387_v34  ;;  %v7404_v23 = vunpack.i.h.s16 %v7388_v4  ;;  %v7556_v40 = vld [vmem:[%s9636_s14 + $0x2] sm:$0x2] }
 0x5c3   : > { %v7398_v38 = vunpack.i.h.s16 %v7389_v58  ;;  %v8215_v21 = vpack.i.b16 %v7379_v19, %v7379_v19  ;;  %v7410_v55 = vpack.i.b16 %v7394_v33, %v7394_v33  ;;  %v8216_v22 = vpack.i.b16 %v7387_v34, %v7387_v34  ;;  %v7559_v39 = vld [vmem:[%s9636_s14 + $0x4] sm:$0x2]  ;;  %v7562_v56 = vld [vmem:[%s9636_s14 + $0x6] sm:$0x2] }
 0x5c4   : > { %v7406_v27 = vunpack.i.h.s16 %v7390_v31  ;;  %v7412_v3 = vpack.i.b16 %v7396_v32, %v7396_v32  ;;  %v8217_v43 = vpack.i.b16 %v7389_v58, %v7389_v58  ;;  %v8218_v25 = vpack.i.b16 %v9887_v36, %v9887_v36  ;;  %v7553_v36 = vld [vmem:[%s9636_s14] sm:$0x2]  ;;  %v7565_v11 = vld [vmem:[%s9636_s14 + $0x8] sm:$0x2]  ;;  %v7568_v30 = vld [vmem:[%s9636_s14 + $0xa] sm:$0x2] }
 0x5c5   : > { %v7414_v37 = vpack.i.b16 %v7398_v38, %v7398_v38  ;;  %v7416_v1 = vpack.i.b16 %v7400_v13, %v7400_v13  ;;  %v8219_v6 = vpack.i.b16 %v7386_v52, %v7386_v52  ;;  %v7418_v60 = vpack.i.b16 %v7402_v18, %v7402_v18  ;;  %v7571_v8 = vld [vmem:[%s9636_s14 + $0xc] sm:$0x2]  ;;  %v7574_v59 = vld [vmem:[%s9636_s14 + $0xe] sm:$0x2] }
 0x5c6   : > { %v8220_v15 = vpack.i.b16 %v7388_v4, %v7388_v4  ;;  %v7420_v2 = vpack.i.b16 %v7404_v23, %v7404_v23  ;;  %v8221_v5 = vpack.i.b16 %v7390_v31, %v7390_v31  ;;  %v7422_v45 = vpack.i.b16 %v7406_v27, %v7406_v27  ;;  %v7577_v20 = vld [vmem:[%s9636_s14 + $0x10] sm:$0x2]  ;;  %v7580_v14 = vld [vmem:[%s9636_s14 + $0x12] sm:$0x2] }
 0x5c7   : > { %v7429_v26 = vrot.slane %v8214_v57, %v9625_v29  ;;  %v7436_v17 = vrot.slane %v7408_v62, %v9625_v29  ;;  %v7443_v47 = vrot.slane %v8215_v21, %v9625_v29  ;;  %v7450_v44 = vrot.slane %v7410_v55, %v9625_v29  ;;  %v7583_v35 = vld [vmem:[%s9636_s14 + $0x14] sm:$0x2]  ;;  %v7586_v51 = vld [vmem:[%s9636_s14 + $0x16] sm:$0x2] }
 0x5c8   : > { %v7457_v12 = vrot.slane %v8216_v22, %v9625_v29  ;;  %v7464_v16 = vrot.slane %v7412_v3, %v9625_v29  ;;  %v7471_v46 = vrot.slane %v8217_v43, %v9625_v29  ;;  %v7478_v0 = vrot.slane %v7414_v37, %v9625_v29  ;;  %v7589_v24 = vld [vmem:[%s9636_s14 + $0x18] sm:$0x2] }
 0x5c9   : > { %v7485_v50 = vrot.slane %v8218_v25, %v9625_v29  ;;  %v7492_v7 = vrot.slane %v7416_v1, %v9625_v29  ;;  %v7499_v61 = vrot.slane %v8219_v6, %v9625_v29  ;;  %v7506_v54 = vrot.slane %v7418_v60, %v9625_v29  ;;  %v7595_v52 = vld [vmem:[%s9636_s14 + $0x1c] sm:$0x2]  ;;  %v7598_v34 = vld [vmem:[%s9636_s14 + $0x1e] sm:$0x2] }
 0x5ca   : > { %v7513_v48 = vrot.slane %v8220_v15, %v9625_v29  ;;  %v7520_v42 = vrot.slane %v7420_v2, %v9625_v29  ;;  %v7527_v9 = vrot.slane %v8221_v5, %v9625_v29  ;;  %v7534_v41 = vrot.slane %v7422_v45, %v9625_v29  ;;  %v7592_v29 = vld [vmem:[%s9636_s14 + $0x1a] sm:$0x2] }
 0x5cb   : > { %v7554_v53 = vsel %vm10000_vm6, %v7429_v26, %v7553_v36  ;;  %v7557_v10 = vsel %vm10000_vm6, %v7436_v17, %v7556_v40  ;;  %v7560_v28 = vsel %vm10000_vm6, %v7443_v47, %v7559_v39  ;;  %v7563_v19 = vsel %vm10000_vm6, %v7450_v44, %v7562_v56 }
 0x5cc   : > { %7555 = vst [vmem:[%s9636_s14] sm:$0x2] %v7554_v53  ;;  %7558 = vst [vmem:[%s9636_s14 + $0x2] sm:$0x2] %v7557_v10  ;;  %v7566_v4 = vsel %vm10000_vm6, %v7457_v12, %v7565_v11  ;;  %v7569_v63 = vsel %vm10000_vm6, %v7464_v16, %v7568_v30  ;;  %v7572_v13 = vsel %vm10000_vm6, %v7471_v46, %v7571_v8 }
 0x5cd   : > { %7561 = vst [vmem:[%s9636_s14 + $0x4] sm:$0x2] %v7560_v28  ;;  %7564 = vst [vmem:[%s9636_s14 + $0x6] sm:$0x2] %v7563_v19  ;;  %v7575_v58 = vsel %vm10000_vm6, %v7478_v0, %v7574_v59  ;;  %v7578_v31 = vsel %vm10000_vm6, %v7485_v50, %v7577_v20  ;;  %v7581_v33 = vsel %vm10000_vm6, %v7492_v7, %v7580_v14 }
 0x5ce   : > { %7567 = vst [vmem:[%s9636_s14 + $0x8] sm:$0x2] %v7566_v4  ;;  %7570 = vst [vmem:[%s9636_s14 + $0xa] sm:$0x2] %v7569_v63  ;;  %v7584_v18 = vsel %vm10000_vm6, %v7499_v61, %v7583_v35  ;;  %v7587_v32 = vsel %vm10000_vm6, %v7506_v54, %v7586_v51  ;;  %v7590_v23 = vsel %vm10000_vm6, %v7513_v48, %v7589_v24 }
 0x5cf   : > { %7573 = vst [vmem:[%s9636_s14 + $0xc] sm:$0x2] %v7572_v13  ;;  %7576 = vst [vmem:[%s9636_s14 + $0xe] sm:$0x2] %v7575_v58  ;;  %v7593_v57 = vsel %vm10000_vm6, %v7520_v42, %v7592_v29  ;;  %v7596_v62 = vsel %vm10000_vm6, %v7527_v9, %v7595_v52  ;;  %v7599_v38 = vsel %vm10000_vm6, %v7534_v41, %v7598_v34 }
 0x5d0   : > { %7579 = vst [vmem:[%s9636_s14 + $0x10] sm:$0x2] %v7578_v31  ;;  %7582 = vst [vmem:[%s9636_s14 + $0x12] sm:$0x2] %v7581_v33 }
 0x5d1   : > { %7585 = vst [vmem:[%s9636_s14 + $0x14] sm:$0x2] %v7584_v18  ;;  %7588 = vst [vmem:[%s9636_s14 + $0x16] sm:$0x2] %v7587_v32 }
 0x5d2   : > { %7591 = vst [vmem:[%s9636_s14 + $0x18] sm:$0x2] %v7590_v23  ;;  %7594 = vst [vmem:[%s9636_s14 + $0x1a] sm:$0x2] %v7593_v57 }
 0x5d3   : > { %7597 = vst [vmem:[%s9636_s14 + $0x1c] sm:$0x2] %v7596_v62  ;;  %7600 = vst [vmem:[%s9636_s14 + $0x1e] sm:$0x2] %v7599_v38 }
 0x5d4 PF: > { %s13_s16 = sadd.s32 1, %s8424_s16   ;;  %s10202_s12 = smov %s8412_s13 }
 0x5d5   : > { %p10_p10 = scmp.ge.s32.totalorder %s13_s16, 4   ;;  %s10203_s13 = smov %s8491_s21 }
 0x5d6   : > { %s10204_s14 = smov %s8420_s15  ;;  %s10205_s15 = smov %s10207_s17 }
 0x5d7   :  { %12 = sbr.rel (!%p10_p10) target bundleno = 3 (0x3), region = 236 }

</bundles_post_ra>
